<compile_context>
chip_gen: v5e
topology: v5e:2x2
jax: 0.10.0
libtpu: 0.0.40
codegen_flags: <defaults>
</compile_context>

<pallas_src>
from functools import partial

import jax
import jax.numpy as jnp
import numpy as np
from jax.experimental import pallas as pl
from jax.experimental.pallas import tpu as pltpu


def _gate_kernel(x_ref, w_ref, b_ref, o_ref, acc_ref, *, Tp, Ho, Wo, Wp, C4, Cout):
    # x_ref: (1, Ha, Wh, C4) bf16 phase-merged planes (channel = (2*pr+pc)*Cin + c)
    # w_ref: (16, C4, Cout) bf16 (BN scale folded in); b_ref: (1, Cout) f32
    # o_ref: (1, 1, Tp, Wp*Cout); acc_ref: (Tc*Wo, Cout) f32 scratch
    r = pl.program_id(1)
    Tc = 2 * Tp + 2                                   # conv rows in this window (incl. pool halo)
    cs = 2 * Tp * r - 1                               # first conv row (may be -1 / run past Ho)
    rbase = pl.multiple_of(2 * Tp * r, 2 * Tp)        # physical phase-plane row of conv row cs

    # ---- conv7x7/s2 as 16 (dh, dw) taps of K = 4*Cin, accumulated in a f32 VMEM scratch ----
    for dh in range(4):
        for dw in range(4):
            tap = x_ref[0, pl.ds(rbase + dh, Tc), pl.ds(dw, Wo), :].reshape(Tc * Wo, C4)
            contrib = jnp.dot(tap, w_ref[4 * dh + dw], preferred_element_type=jnp.float32)
            if dh == 0 and dw == 0:
                acc_ref[...] = contrib
            else:
                acc_ref[...] += contrib

    # ---- BatchNorm bias (scale already folded into weights) + ReLU, in f32 ----
    y = jnp.maximum(acc_ref[...] + b_ref[...], 0.0).reshape(Tc, Wo, Cout)

    # Window rows outside [0, Ho) are forced to 0.  Safe only because ReLU => all valid values
    # >= 0 and every pool window contains at least one valid row, so max() is unchanged.
    row_ids = cs + jax.lax.broadcasted_iota(jnp.int32, (Tc, 1, 1), 0)
    y = jnp.where((row_ids >= 0) & (row_ids < Ho), y, 0.0)

    # ---- max-pool 3x3 / stride 2 / pad 1, vectorized ----
    # columns: pooled[j] = max(conv cols 2j-1, 2j, 2j+1); missing cols act as 0 (ReLU'd data)
    if Wo % 2:
        y = jnp.concatenate([y, jnp.zeros((Tc, 1, Cout), y.dtype)], axis=1)
    y = y.reshape(Tc, Wp, 2, Cout)
    ce, co = y[:, :, 0, :], y[:, :, 1, :]                       # cols 2j / 2j+1
    if Wp > 1:
        com1 = jnp.concatenate([jnp.zeros((Tc, 1, Cout), co.dtype), co[:, :Wp - 1, :]],
                               axis=1)                           # cols 2j-1
    else:
        com1 = jnp.zeros_like(co)
    colmax = jnp.maximum(jnp.maximum(ce, co), com1)              # (Tc, Wp, Cout)

    # rows: window rows pair up; pooled[t] = max(window rows 2t, 2t+1, 2t+2)
    colmax = colmax.reshape(Tp + 1, 2, Wp, Cout)
    re_, ro_ = colmax[:, 0], colmax[:, 1]
    pooled = jnp.maximum(jnp.maximum(re_[:Tp], ro_[:Tp]), re_[1:Tp + 1])   # (Tp, Wp, Cout)

    # single lane-merged store per grid step
    o_ref[0, 0] = pooled.reshape(Tp, Wp * Cout).astype(o_ref.dtype)


def gate_forward(x_nchw, conv_w, gamma, beta, run_mean, run_var, eps=1e-5,
                 tile_hp=None, out_dtype=jnp.float32):
    N, Cin, H, W = x_nchw.shape
    Cout, Cin_w, KH, KW = conv_w.shape
    assert (Cin_w, KH, KW) == (Cin, 7, 7)
    stride, pad = 2, 3
    Ho = (H + 2 * pad - KH) // stride + 1
    Wo = (W + 2 * pad - KW) // stride + 1
    Hp = (Ho + 2 * 1 - 3) // 2 + 1
    Wp = (Wo + 2 * 1 - 3) // 2 + 1
    C4 = 4 * Cin

    # pooled-row tile (must divide Hp); real stem Hp=56 -> Tp=28 (big slabs amortize grid overhead)
    Tp = min(28 if tile_hp is None else max(1, tile_hp), Hp)
    while Hp % Tp:
        Tp -= 1
    R = Hp // Tp
    Tc = 2 * Tp + 2

    # ---- glue: NCHW -> NHWC (bf16), zero-pad, stride-2 phase split merged into channels ----
    # TODO(synk): keeping the whole model NHWC end-to-end would remove both boundary transposes.
    x = jnp.transpose(x_nchw, (0, 2, 3, 1)).astype(jnp.bfloat16)        # (N, H, W, Cin)
    Ha = 2 * Hp + 5                                   # phase-plane rows the kernel can touch
    Wext = W + 6 + ((W + 6) % 2)                      # padded width, rounded up to even
    Wh = Wext // 2
    top = pad + 2                                     # +2 rows so conv row -1 is addressable
    bottom = 2 * Ha - top - H
    assert bottom >= 0
    left, right = pad, Wext - pad - W
    ext = jnp.pad(x, ((0, 0), (top, bottom), (left, right), (0, 0)))    # (N, 2*Ha, Wext, Cin)
    xm = ext.reshape(N, Ha, 2, Wh, 2, Cin).transpose(0, 1, 3, 2, 4, 5)
    xm = xm.reshape(N, Ha, Wh, C4)                    # channel = (2*row_par + col_par)*Cin + c

    # eval-mode BatchNorm: fold scale into conv weights (in f32), keep only bias for the kernel
    inv_std = 1.0 / jnp.sqrt(run_var.astype(jnp.float32) + eps)
    scale = gamma.astype(jnp.float32) * inv_std                          # (Cout,)
    bias = (beta.astype(jnp.float32)
            - run_mean.astype(jnp.float32) * scale).reshape(1, Cout)     # (1, Cout) f32
    w_f = conv_w.astype(jnp.float32) * scale[:, None, None, None]        # (Cout, Cin, 7, 7)
    # regroup into 16 (dh, dw) taps of K = 4*Cin, zero-padding the missing kh=7 / kw=7 slices
    w_pad = jnp.pad(w_f, ((0, 0), (0, 0), (0, 1), (0, 1)))               # (Cout, Cin, 8, 8)
    wtap = w_pad.reshape(Cout, Cin, 4, 2, 4, 2).transpose(2, 4, 3, 5, 1, 0)  # (dh,dw,pr,pc,Cin,Cout)
    wtap = wtap.reshape(16, C4, Cout).astype(jnp.bfloat16)

    kernel = partial(_gate_kernel, Tp=Tp, Ho=Ho, Wo=Wo, Wp=Wp, C4=C4, Cout=Cout)
    out = pl.pallas_call(
        kernel,
        out_shape=jax.ShapeDtypeStruct((N, R, Tp, Wp * Cout), out_dtype),
        grid_spec=pltpu.PrefetchScalarGridSpec(
            num_scalar_prefetch=0,
            grid=(N, R),
            in_specs=[
                # phase-merged image per batch element; block index constant over r -> one DMA per n
                pl.BlockSpec((1, Ha, Wh, C4), lambda n, r: (n, 0, 0, 0)),
                pl.BlockSpec((16, C4, Cout), lambda n, r: (0, 0, 0)),
                pl.BlockSpec((1, Cout), lambda n, r: (0, 0)),
            ],
            out_specs=pl.BlockSpec((1, 1, Tp, Wp * Cout), lambda n, r: (n, r, 0, 0)),
            scratch_shapes=[pltpu.VMEM((Tc * Wo, Cout), jnp.float32)],
        ),
        compiler_params=pltpu.CompilerParams(
            dimension_semantics=("parallel", "parallel"),
            vmem_limit_bytes=64 * 1024 * 1024,
        ),
    )(xm, wtap, bias)

    out = out.reshape(N, Hp, Wp, Cout)
    return jnp.transpose(out, (0, 3, 1, 2))                             # NCHW, like PyTorch


def gate_reference(x_nchw, conv_w, gamma, beta, run_mean, run_var, eps=1e-5):
    y = jax.lax.conv_general_dilated(
        x_nchw, conv_w, window_strides=(2, 2), padding=((3, 3), (3, 3)),
        dimension_numbers=("NCHW", "OIHW", "NCHW"))
    scale = gamma / jnp.sqrt(run_var + eps)
    bias = beta - run_mean * scale
    y = y * scale[None, :, None, None] + bias[None, :, None, None]
    y = jnp.maximum(y, 0.0)
    y = jax.lax.reduce_window(
        y, -jnp.inf, jax.lax.max,
        window_dimensions=(1, 1, 3, 3), window_strides=(1, 1, 2, 2),
        padding=((0, 0), (0, 0), (1, 1), (1, 1)))
    return y


if __name__ == "__main__":
    key = jax.random.PRNGKey(0)
    k1, k2, k3, k4, k5, k6 = jax.random.split(key, 6)

    N, Cin, H, W = 2, 4, 16, 16          # small NCHW input
    Cout = 8                              # blocks_sizes[0]

    x = jax.random.normal(k1, (N, Cin, H, W), jnp.float32)
    conv_w = 0.1 * jax.random.normal(k2, (Cout, Cin, 7, 7), jnp.float32)
    gamma = 1.0 + 0.1 * jax.random.normal(k3, (Cout,), jnp.float32)
    beta = 0.1 * jax.random.normal(k4, (Cout,), jnp.float32)
    run_mean = 0.1 * jax.random.normal(k5, (Cout,), jnp.float32)
    run_var = jax.random.uniform(k6, (Cout,), jnp.float32, minval=0.5, maxval=1.5)

    # tile_hp=2 -> two pooled-row blocks per image, exercising the (batch, row-slab) grid
    out = gate_forward(x, conv_w, gamma, beta, run_mean, run_var, tile_hp=2)
    out = jax.block_until_ready(out)

    ref = gate_reference(x, conv_w, gamma, beta, run_mean, run_var)
    assert out.shape == (N, Cout, 4, 4), out.shape
    # Conv inputs/weights are streamed in bf16 (per perf review); tolerance loosened vs f32 reference.
    np.testing.assert_allclose(np.asarray(out), np.asarray(ref), rtol=5e-2, atol=5e-2)
    print("KERNEL_OK")
</pallas_src>

<mosaic_0001>
module attributes {stable_mosaic.version = 11 : i64} {
  func.func @_gate_kernel(%arg0: i32, %arg1: i32, %arg2: memref<1x13x11x16xbf16, #tpu.memory_space<vmem>>, %arg3: memref<16x16x8xbf16, #tpu.memory_space<vmem>>, %arg4: memref<1x8xf32, #tpu.memory_space<vmem>>, %arg5: memref<1x1x2x32xf32, #tpu.memory_space<vmem>>, %arg6: memref<48x8xf32, #tpu.memory_space<vmem>>) attributes {dimension_semantics = [#tpu.dimension_semantics<parallel>, #tpu.dimension_semantics<parallel>], iteration_bounds = array<i64: 2, 2>, scalar_prefetch = 0 : i64, scratch_operands = 1 : i64, tpu.core_type = #tpu.core_type<tc>, window_params = [{transform_indices = @transform_0, window_bounds = array<i64: 1, 13, 11, 16>}, {pipeline_mode = #tpu.pipeline_mode<synchronous>, transform_indices = @transform_1, window_bounds = array<i64: 16, 16, 8>}, {pipeline_mode = #tpu.pipeline_mode<synchronous>, transform_indices = @transform_2, window_bounds = array<i64: 1, 8>}, {transform_indices = @transform_3, window_bounds = array<i64: 1, 1, 2, 32>}]} {
    %c4_i32 = arith.constant 4 : i32
    %0 = arith.muli %c4_i32, %arg1 : i32
    %c1_i32 = arith.constant 1 : i32
    %1 = arith.subi %0, %c1_i32 : i32
    %c4_i32_0 = arith.constant 4 : i32
    %2 = arith.muli %c4_i32_0, %arg1 : i32
    %3 = tpu.assume_multiple %2, 4 : i32
    %c0_i32 = arith.constant 0 : i32
    %4 = arith.addi %3, %c0_i32 : i32
    %c0 = arith.constant 0 : index
    %5 = arith.index_cast %4 : i32 to index
    %c0_1 = arith.constant 0 : index
    %c0_2 = arith.constant 0 : index
    %6 = vector.load %arg2[%c0, %5, %c0_1, %c0_2] : memref<1x13x11x16xbf16, #tpu.memory_space<vmem>>, vector<1x6x8x16xbf16>
    %7 = vector.shape_cast %6 : vector<1x6x8x16xbf16> to vector<6x8x16xbf16>
    %8 = vector.shape_cast %7 : vector<6x8x16xbf16> to vector<48x16xbf16>
    %c0_3 = arith.constant 0 : index
    %c0_4 = arith.constant 0 : index
    %c0_5 = arith.constant 0 : index
    %9 = vector.load %arg3[%c0_3, %c0_4, %c0_5] : memref<16x16x8xbf16, #tpu.memory_space<vmem>>, vector<1x16x8xbf16>
    %10 = vector.shape_cast %9 : vector<1x16x8xbf16> to vector<16x8xbf16>
    %cst = arith.constant dense<0.000000e+00> : vector<48x8xf32>
    %11 = tpu.matmul %8, %10, %cst {dimension_numbers = #tpu.dot_dimension_numbers<[1], [0], [0], [1], [0, 0, 1, 1], [], []>} : vector<48x16xbf16>, vector<16x8xbf16>, vector<48x8xf32> -> vector<48x8xf32>
    %c0_6 = arith.constant 0 : index
    %c0_7 = arith.constant 0 : index
    %12 = vector.load %arg6[%c0_6, %c0_7] : memref<48x8xf32, #tpu.memory_space<vmem>>, vector<48x8xf32>
    tpu.vector_store %arg6[%c0_6, %c0_7], %11 {strides = array<i32>} : memref<48x8xf32, #tpu.memory_space<vmem>>, vector<48x8xf32>,
    %c0_i32_8 = arith.constant 0 : i32
    %13 = arith.addi %3, %c0_i32_8 : i32
    %c0_9 = arith.constant 0 : index
    %14 = arith.index_cast %13 : i32 to index
    %c1 = arith.constant 1 : index
    %c0_10 = arith.constant 0 : index
    %15 = vector.load %arg2[%c0_9, %14, %c1, %c0_10] : memref<1x13x11x16xbf16, #tpu.memory_space<vmem>>, vector<1x6x8x16xbf16>
    %16 = vector.shape_cast %15 : vector<1x6x8x16xbf16> to vector<6x8x16xbf16>
    %17 = vector.shape_cast %16 : vector<6x8x16xbf16> to vector<48x16xbf16>
    %c1_11 = arith.constant 1 : index
    %c0_12 = arith.constant 0 : index
    %c0_13 = arith.constant 0 : index
    %18 = vector.load %arg3[%c1_11, %c0_12, %c0_13] : memref<16x16x8xbf16, #tpu.memory_space<vmem>>, vector<1x16x8xbf16>
    %19 = vector.shape_cast %18 : vector<1x16x8xbf16> to vector<16x8xbf16>
    %cst_14 = arith.constant dense<0.000000e+00> : vector<48x8xf32>
    %20 = tpu.matmul %17, %19, %cst_14 {dimension_numbers = #tpu.dot_dimension_numbers<[1], [0], [0], [1], [0, 0, 1, 1], [], []>} : vector<48x16xbf16>, vector<16x8xbf16>, vector<48x8xf32> -> vector<48x8xf32>
    %c0_15 = arith.constant 0 : index
    %c0_16 = arith.constant 0 : index
    %21 = vector.load %arg6[%c0_15, %c0_16] : memref<48x8xf32, #tpu.memory_space<vmem>>, vector<48x8xf32>
    %22 = arith.addf %21, %20 : vector<48x8xf32>
    %c0_17 = arith.constant 0 : index
    %c0_18 = arith.constant 0 : index
    %23 = vector.load %arg6[%c0_17, %c0_18] : memref<48x8xf32, #tpu.memory_space<vmem>>, vector<48x8xf32>
    tpu.vector_store %arg6[%c0_17, %c0_18], %22 {strides = array<i32>} : memref<48x8xf32, #tpu.memory_space<vmem>>, vector<48x8xf32>,
    %c0_i32_19 = arith.constant 0 : i32
    %24 = arith.addi %3, %c0_i32_19 : i32
    %c0_20 = arith.constant 0 : index
    %25 = arith.index_cast %24 : i32 to index
    %c2 = arith.constant 2 : index
    %c0_21 = arith.constant 0 : index
    %26 = vector.load %arg2[%c0_20, %25, %c2, %c0_21] : memref<1x13x11x16xbf16, #tpu.memory_space<vmem>>, vector<1x6x8x16xbf16>
    %27 = vector.shape_cast %26 : vector<1x6x8x16xbf16> to vector<6x8x16xbf16>
    %28 = vector.shape_cast %27 : vector<6x8x16xbf16> to vector<48x16xbf16>
    %c2_22 = arith.constant 2 : index
    %c0_23 = arith.constant 0 : index
    %c0_24 = arith.constant 0 : index
    %29 = vector.load %arg3[%c2_22, %c0_23, %c0_24] : memref<16x16x8xbf16, #tpu.memory_space<vmem>>, vector<1x16x8xbf16>
    %30 = vector.shape_cast %29 : vector<1x16x8xbf16> to vector<16x8xbf16>
    %cst_25 = arith.constant dense<0.000000e+00> : vector<48x8xf32>
    %31 = tpu.matmul %28, %30, %cst_25 {dimension_numbers = #tpu.dot_dimension_numbers<[1], [0], [0], [1], [0, 0, 1, 1], [], []>} : vector<48x16xbf16>, vector<16x8xbf16>, vector<48x8xf32> -> vector<48x8xf32>
    %c0_26 = arith.constant 0 : index
    %c0_27 = arith.constant 0 : index
    %32 = vector.load %arg6[%c0_26, %c0_27] : memref<48x8xf32, #tpu.memory_space<vmem>>, vector<48x8xf32>
    %33 = arith.addf %32, %31 : vector<48x8xf32>
    %c0_28 = arith.constant 0 : index
    %c0_29 = arith.constant 0 : index
    %34 = vector.load %arg6[%c0_28, %c0_29] : memref<48x8xf32, #tpu.memory_space<vmem>>, vector<48x8xf32>
    tpu.vector_store %arg6[%c0_28, %c0_29], %33 {strides = array<i32>} : memref<48x8xf32, #tpu.memory_space<vmem>>, vector<48x8xf32>,
    %c0_i32_30 = arith.constant 0 : i32
    %35 = arith.addi %3, %c0_i32_30 : i32
    %c0_31 = arith.constant 0 : index
    %36 = arith.index_cast %35 : i32 to index
    %c3 = arith.constant 3 : index
    %c0_32 = arith.constant 0 : index
    %37 = vector.load %arg2[%c0_31, %36, %c3, %c0_32] : memref<1x13x11x16xbf16, #tpu.memory_space<vmem>>, vector<1x6x8x16xbf16>
    %38 = vector.shape_cast %37 : vector<1x6x8x16xbf16> to vector<6x8x16xbf16>
    %39 = vector.shape_cast %38 : vector<6x8x16xbf16> to vector<48x16xbf16>
    %c3_33 = arith.constant 3 : index
    %c0_34 = arith.constant 0 : index
    %c0_35 = arith.constant 0 : index
    %40 = vector.load %arg3[%c3_33, %c0_34, %c0_35] : memref<16x16x8xbf16, #tpu.memory_space<vmem>>, vector<1x16x8xbf16>
    %41 = vector.shape_cast %40 : vector<1x16x8xbf16> to vector<16x8xbf16>
    %cst_36 = arith.constant dense<0.000000e+00> : vector<48x8xf32>
    %42 = tpu.matmul %39, %41, %cst_36 {dimension_numbers = #tpu.dot_dimension_numbers<[1], [0], [0], [1], [0, 0, 1, 1], [], []>} : vector<48x16xbf16>, vector<16x8xbf16>, vector<48x8xf32> -> vector<48x8xf32>
    %c0_37 = arith.constant 0 : index
    %c0_38 = arith.constant 0 : index
    %43 = vector.load %arg6[%c0_37, %c0_38] : memref<48x8xf32, #tpu.memory_space<vmem>>, vector<48x8xf32>
    %44 = arith.addf %43, %42 : vector<48x8xf32>
    %c0_39 = arith.constant 0 : index
    %c0_40 = arith.constant 0 : index
    %45 = vector.load %arg6[%c0_39, %c0_40] : memref<48x8xf32, #tpu.memory_space<vmem>>, vector<48x8xf32>
    tpu.vector_store %arg6[%c0_39, %c0_40], %44 {strides = array<i32>} : memref<48x8xf32, #tpu.memory_space<vmem>>, vector<48x8xf32>,
    %c1_i32_41 = arith.constant 1 : i32
    %46 = arith.addi %3, %c1_i32_41 : i32
    %c0_42 = arith.constant 0 : index
    %47 = arith.index_cast %46 : i32 to index
    %c0_43 = arith.constant 0 : index
    %c0_44 = arith.constant 0 : index
    %48 = vector.load %arg2[%c0_42, %47, %c0_43, %c0_44] : memref<1x13x11x16xbf16, #tpu.memory_space<vmem>>, vector<1x6x8x16xbf16>
    %49 = vector.shape_cast %48 : vector<1x6x8x16xbf16> to vector<6x8x16xbf16>
    %50 = vector.shape_cast %49 : vector<6x8x16xbf16> to vector<48x16xbf16>
    %c4 = arith.constant 4 : index
    %c0_45 = arith.constant 0 : index
    %c0_46 = arith.constant 0 : index
    %51 = vector.load %arg3[%c4, %c0_45, %c0_46] : memref<16x16x8xbf16, #tpu.memory_space<vmem>>, vector<1x16x8xbf16>
    %52 = vector.shape_cast %51 : vector<1x16x8xbf16> to vector<16x8xbf16>
    %cst_47 = arith.constant dense<0.000000e+00> : vector<48x8xf32>
    %53 = tpu.matmul %50, %52, %cst_47 {dimension_numbers = #tpu.dot_dimension_numbers<[1], [0], [0], [1], [0, 0, 1, 1], [], []>} : vector<48x16xbf16>, vector<16x8xbf16>, vector<48x8xf32> -> vector<48x8xf32>
    %c0_48 = arith.constant 0 : index
    %c0_49 = arith.constant 0 : index
    %54 = vector.load %arg6[%c0_48, %c0_49] : memref<48x8xf32, #tpu.memory_space<vmem>>, vector<48x8xf32>
    %55 = arith.addf %54, %53 : vector<48x8xf32>
    %c0_50 = arith.constant 0 : index
    %c0_51 = arith.constant 0 : index
    %56 = vector.load %arg6[%c0_50, %c0_51] : memref<48x8xf32, #tpu.memory_space<vmem>>, vector<48x8xf32>
    tpu.vector_store %arg6[%c0_50, %c0_51], %55 {strides = array<i32>} : memref<48x8xf32, #tpu.memory_space<vmem>>, vector<48x8xf32>,
    %c1_i32_52 = arith.constant 1 : i32
    %57 = arith.addi %3, %c1_i32_52 : i32
    %c0_53 = arith.constant 0 : index
    %58 = arith.index_cast %57 : i32 to index
    %c1_54 = arith.constant 1 : index
    %c0_55 = arith.constant 0 : index
    %59 = vector.load %arg2[%c0_53, %58, %c1_54, %c0_55] : memref<1x13x11x16xbf16, #tpu.memory_space<vmem>>, vector<1x6x8x16xbf16>
    %60 = vector.shape_cast %59 : vector<1x6x8x16xbf16> to vector<6x8x16xbf16>
    %61 = vector.shape_cast %60 : vector<6x8x16xbf16> to vector<48x16xbf16>
    %c5 = arith.constant 5 : index
    %c0_56 = arith.constant 0 : index
    %c0_57 = arith.constant 0 : index
    %62 = vector.load %arg3[%c5, %c0_56, %c0_57] : memref<16x16x8xbf16, #tpu.memory_space<vmem>>, vector<1x16x8xbf16>
    %63 = vector.shape_cast %62 : vector<1x16x8xbf16> to vector<16x8xbf16>
    %cst_58 = arith.constant dense<0.000000e+00> : vector<48x8xf32>
    %64 = tpu.matmul %61, %63, %cst_58 {dimension_numbers = #tpu.dot_dimension_numbers<[1], [0], [0], [1], [0, 0, 1, 1], [], []>} : vector<48x16xbf16>, vector<16x8xbf16>, vector<48x8xf32> -> vector<48x8xf32>
    %c0_59 = arith.constant 0 : index
    %c0_60 = arith.constant 0 : index
    %65 = vector.load %arg6[%c0_59, %c0_60] : memref<48x8xf32, #tpu.memory_space<vmem>>, vector<48x8xf32>
    %66 = arith.addf %65, %64 : vector<48x8xf32>
    %c0_61 = arith.constant 0 : index
    %c0_62 = arith.constant 0 : index
    %67 = vector.load %arg6[%c0_61, %c0_62] : memref<48x8xf32, #tpu.memory_space<vmem>>, vector<48x8xf32>
    tpu.vector_store %arg6[%c0_61, %c0_62], %66 {strides = array<i32>} : memref<48x8xf32, #tpu.memory_space<vmem>>, vector<48x8xf32>,
    %c1_i32_63 = arith.constant 1 : i32
    %68 = arith.addi %3, %c1_i32_63 : i32
    %c0_64 = arith.constant 0 : index
    %69 = arith.index_cast %68 : i32 to index
    %c2_65 = arith.constant 2 : index
    %c0_66 = arith.constant 0 : index
    %70 = vector.load %arg2[%c0_64, %69, %c2_65, %c0_66] : memref<1x13x11x16xbf16, #tpu.memory_space<vmem>>, vector<1x6x8x16xbf16>
    %71 = vector.shape_cast %70 : vector<1x6x8x16xbf16> to vector<6x8x16xbf16>
    %72 = vector.shape_cast %71 : vector<6x8x16xbf16> to vector<48x16xbf16>
    %c6 = arith.constant 6 : index
    %c0_67 = arith.constant 0 : index
    %c0_68 = arith.constant 0 : index
    %73 = vector.load %arg3[%c6, %c0_67, %c0_68] : memref<16x16x8xbf16, #tpu.memory_space<vmem>>, vector<1x16x8xbf16>
    %74 = vector.shape_cast %73 : vector<1x16x8xbf16> to vector<16x8xbf16>
    %cst_69 = arith.constant dense<0.000000e+00> : vector<48x8xf32>
    %75 = tpu.matmul %72, %74, %cst_69 {dimension_numbers = #tpu.dot_dimension_numbers<[1], [0], [0], [1], [0, 0, 1, 1], [], []>} : vector<48x16xbf16>, vector<16x8xbf16>, vector<48x8xf32> -> vector<48x8xf32>
    %c0_70 = arith.constant 0 : index
    %c0_71 = arith.constant 0 : index
    %76 = vector.load %arg6[%c0_70, %c0_71] : memref<48x8xf32, #tpu.memory_space<vmem>>, vector<48x8xf32>
    %77 = arith.addf %76, %75 : vector<48x8xf32>
    %c0_72 = arith.constant 0 : index
    %c0_73 = arith.constant 0 : index
    %78 = vector.load %arg6[%c0_72, %c0_73] : memref<48x8xf32, #tpu.memory_space<vmem>>, vector<48x8xf32>
    tpu.vector_store %arg6[%c0_72, %c0_73], %77 {strides = array<i32>} : memref<48x8xf32, #tpu.memory_space<vmem>>, vector<48x8xf32>,
    %c1_i32_74 = arith.constant 1 : i32
    %79 = arith.addi %3, %c1_i32_74 : i32
    %c0_75 = arith.constant 0 : index
    %80 = arith.index_cast %79 : i32 to index
    %c3_76 = arith.constant 3 : index
    %c0_77 = arith.constant 0 : index
    %81 = vector.load %arg2[%c0_75, %80, %c3_76, %c0_77] : memref<1x13x11x16xbf16, #tpu.memory_space<vmem>>, vector<1x6x8x16xbf16>
    %82 = vector.shape_cast %81 : vector<1x6x8x16xbf16> to vector<6x8x16xbf16>
    %83 = vector.shape_cast %82 : vector<6x8x16xbf16> to vector<48x16xbf16>
    %c7 = arith.constant 7 : index
    %c0_78 = arith.constant 0 : index
    %c0_79 = arith.constant 0 : index
    %84 = vector.load %arg3[%c7, %c0_78, %c0_79] : memref<16x16x8xbf16, #tpu.memory_space<vmem>>, vector<1x16x8xbf16>
    %85 = vector.shape_cast %84 : vector<1x16x8xbf16> to vector<16x8xbf16>
    %cst_80 = arith.constant dense<0.000000e+00> : vector<48x8xf32>
    %86 = tpu.matmul %83, %85, %cst_80 {dimension_numbers = #tpu.dot_dimension_numbers<[1], [0], [0], [1], [0, 0, 1, 1], [], []>} : vector<48x16xbf16>, vector<16x8xbf16>, vector<48x8xf32> -> vector<48x8xf32>
    %c0_81 = arith.constant 0 : index
    %c0_82 = arith.constant 0 : index
    %87 = vector.load %arg6[%c0_81, %c0_82] : memref<48x8xf32, #tpu.memory_space<vmem>>, vector<48x8xf32>
    %88 = arith.addf %87, %86 : vector<48x8xf32>
    %c0_83 = arith.constant 0 : index
    %c0_84 = arith.constant 0 : index
    %89 = vector.load %arg6[%c0_83, %c0_84] : memref<48x8xf32, #tpu.memory_space<vmem>>, vector<48x8xf32>
    tpu.vector_store %arg6[%c0_83, %c0_84], %88 {strides = array<i32>} : memref<48x8xf32, #tpu.memory_space<vmem>>, vector<48x8xf32>,
    %c2_i32 = arith.constant 2 : i32
    %90 = arith.addi %3, %c2_i32 : i32
    %c0_85 = arith.constant 0 : index
    %91 = arith.index_cast %90 : i32 to index
    %c0_86 = arith.constant 0 : index
    %c0_87 = arith.constant 0 : index
    %92 = vector.load %arg2[%c0_85, %91, %c0_86, %c0_87] : memref<1x13x11x16xbf16, #tpu.memory_space<vmem>>, vector<1x6x8x16xbf16>
    %93 = vector.shape_cast %92 : vector<1x6x8x16xbf16> to vector<6x8x16xbf16>
    %94 = vector.shape_cast %93 : vector<6x8x16xbf16> to vector<48x16xbf16>
    %c8 = arith.constant 8 : index
    %c0_88 = arith.constant 0 : index
    %c0_89 = arith.constant 0 : index
    %95 = vector.load %arg3[%c8, %c0_88, %c0_89] : memref<16x16x8xbf16, #tpu.memory_space<vmem>>, vector<1x16x8xbf16>
    %96 = vector.shape_cast %95 : vector<1x16x8xbf16> to vector<16x8xbf16>
    %cst_90 = arith.constant dense<0.000000e+00> : vector<48x8xf32>
    %97 = tpu.matmul %94, %96, %cst_90 {dimension_numbers = #tpu.dot_dimension_numbers<[1], [0], [0], [1], [0, 0, 1, 1], [], []>} : vector<48x16xbf16>, vector<16x8xbf16>, vector<48x8xf32> -> vector<48x8xf32>
    %c0_91 = arith.constant 0 : index
    %c0_92 = arith.constant 0 : index
    %98 = vector.load %arg6[%c0_91, %c0_92] : memref<48x8xf32, #tpu.memory_space<vmem>>, vector<48x8xf32>
    %99 = arith.addf %98, %97 : vector<48x8xf32>
    %c0_93 = arith.constant 0 : index
    %c0_94 = arith.constant 0 : index
    %100 = vector.load %arg6[%c0_93, %c0_94] : memref<48x8xf32, #tpu.memory_space<vmem>>, vector<48x8xf32>
    tpu.vector_store %arg6[%c0_93, %c0_94], %99 {strides = array<i32>} : memref<48x8xf32, #tpu.memory_space<vmem>>, vector<48x8xf32>,
    %c2_i32_95 = arith.constant 2 : i32
    %101 = arith.addi %3, %c2_i32_95 : i32
    %c0_96 = arith.constant 0 : index
    %102 = arith.index_cast %101 : i32 to index
    %c1_97 = arith.constant 1 : index
    %c0_98 = arith.constant 0 : index
    %103 = vector.load %arg2[%c0_96, %102, %c1_97, %c0_98] : memref<1x13x11x16xbf16, #tpu.memory_space<vmem>>, vector<1x6x8x16xbf16>
    %104 = vector.shape_cast %103 : vector<1x6x8x16xbf16> to vector<6x8x16xbf16>
    %105 = vector.shape_cast %104 : vector<6x8x16xbf16> to vector<48x16xbf16>
    %c9 = arith.constant 9 : index
    %c0_99 = arith.constant 0 : index
    %c0_100 = arith.constant 0 : index
    %106 = vector.load %arg3[%c9, %c0_99, %c0_100] : memref<16x16x8xbf16, #tpu.memory_space<vmem>>, vector<1x16x8xbf16>
    %107 = vector.shape_cast %106 : vector<1x16x8xbf16> to vector<16x8xbf16>
    %cst_101 = arith.constant dense<0.000000e+00> : vector<48x8xf32>
    %108 = tpu.matmul %105, %107, %cst_101 {dimension_numbers = #tpu.dot_dimension_numbers<[1], [0], [0], [1], [0, 0, 1, 1], [], []>} : vector<48x16xbf16>, vector<16x8xbf16>, vector<48x8xf32> -> vector<48x8xf32>
    %c0_102 = arith.constant 0 : index
    %c0_103 = arith.constant 0 : index
    %109 = vector.load %arg6[%c0_102, %c0_103] : memref<48x8xf32, #tpu.memory_space<vmem>>, vector<48x8xf32>
    %110 = arith.addf %109, %108 : vector<48x8xf32>
    %c0_104 = arith.constant 0 : index
    %c0_105 = arith.constant 0 : index
    %111 = vector.load %arg6[%c0_104, %c0_105] : memref<48x8xf32, #tpu.memory_space<vmem>>, vector<48x8xf32>
    tpu.vector_store %arg6[%c0_104, %c0_105], %110 {strides = array<i32>} : memref<48x8xf32, #tpu.memory_space<vmem>>, vector<48x8xf32>,
    %c2_i32_106 = arith.constant 2 : i32
    %112 = arith.addi %3, %c2_i32_106 : i32
    %c0_107 = arith.constant 0 : index
    %113 = arith.index_cast %112 : i32 to index
    %c2_108 = arith.constant 2 : index
    %c0_109 = arith.constant 0 : index
    %114 = vector.load %arg2[%c0_107, %113, %c2_108, %c0_109] : memref<1x13x11x16xbf16, #tpu.memory_space<vmem>>, vector<1x6x8x16xbf16>
    %115 = vector.shape_cast %114 : vector<1x6x8x16xbf16> to vector<6x8x16xbf16>
    %116 = vector.shape_cast %115 : vector<6x8x16xbf16> to vector<48x16xbf16>
    %c10 = arith.constant 10 : index
    %c0_110 = arith.constant 0 : index
    %c0_111 = arith.constant 0 : index
    %117 = vector.load %arg3[%c10, %c0_110, %c0_111] : memref<16x16x8xbf16, #tpu.memory_space<vmem>>, vector<1x16x8xbf16>
    %118 = vector.shape_cast %117 : vector<1x16x8xbf16> to vector<16x8xbf16>
    %cst_112 = arith.constant dense<0.000000e+00> : vector<48x8xf32>
    %119 = tpu.matmul %116, %118, %cst_112 {dimension_numbers = #tpu.dot_dimension_numbers<[1], [0], [0], [1], [0, 0, 1, 1], [], []>} : vector<48x16xbf16>, vector<16x8xbf16>, vector<48x8xf32> -> vector<48x8xf32>
    %c0_113 = arith.constant 0 : index
    %c0_114 = arith.constant 0 : index
    %120 = vector.load %arg6[%c0_113, %c0_114] : memref<48x8xf32, #tpu.memory_space<vmem>>, vector<48x8xf32>
    %121 = arith.addf %120, %119 : vector<48x8xf32>
    %c0_115 = arith.constant 0 : index
    %c0_116 = arith.constant 0 : index
    %122 = vector.load %arg6[%c0_115, %c0_116] : memref<48x8xf32, #tpu.memory_space<vmem>>, vector<48x8xf32>
    tpu.vector_store %arg6[%c0_115, %c0_116], %121 {strides = array<i32>} : memref<48x8xf32, #tpu.memory_space<vmem>>, vector<48x8xf32>,
    %c2_i32_117 = arith.constant 2 : i32
    %123 = arith.addi %3, %c2_i32_117 : i32
    %c0_118 = arith.constant 0 : index
    %124 = arith.index_cast %123 : i32 to index
    %c3_119 = arith.constant 3 : index
    %c0_120 = arith.constant 0 : index
    %125 = vector.load %arg2[%c0_118, %124, %c3_119, %c0_120] : memref<1x13x11x16xbf16, #tpu.memory_space<vmem>>, vector<1x6x8x16xbf16>
    %126 = vector.shape_cast %125 : vector<1x6x8x16xbf16> to vector<6x8x16xbf16>
    %127 = vector.shape_cast %126 : vector<6x8x16xbf16> to vector<48x16xbf16>
    %c11 = arith.constant 11 : index
    %c0_121 = arith.constant 0 : index
    %c0_122 = arith.constant 0 : index
    %128 = vector.load %arg3[%c11, %c0_121, %c0_122] : memref<16x16x8xbf16, #tpu.memory_space<vmem>>, vector<1x16x8xbf16>
    %129 = vector.shape_cast %128 : vector<1x16x8xbf16> to vector<16x8xbf16>
    %cst_123 = arith.constant dense<0.000000e+00> : vector<48x8xf32>
    %130 = tpu.matmul %127, %129, %cst_123 {dimension_numbers = #tpu.dot_dimension_numbers<[1], [0], [0], [1], [0, 0, 1, 1], [], []>} : vector<48x16xbf16>, vector<16x8xbf16>, vector<48x8xf32> -> vector<48x8xf32>
    %c0_124 = arith.constant 0 : index
    %c0_125 = arith.constant 0 : index
    %131 = vector.load %arg6[%c0_124, %c0_125] : memref<48x8xf32, #tpu.memory_space<vmem>>, vector<48x8xf32>
    %132 = arith.addf %131, %130 : vector<48x8xf32>
    %c0_126 = arith.constant 0 : index
    %c0_127 = arith.constant 0 : index
    %133 = vector.load %arg6[%c0_126, %c0_127] : memref<48x8xf32, #tpu.memory_space<vmem>>, vector<48x8xf32>
    tpu.vector_store %arg6[%c0_126, %c0_127], %132 {strides = array<i32>} : memref<48x8xf32, #tpu.memory_space<vmem>>, vector<48x8xf32>,
    %c3_i32 = arith.constant 3 : i32
    %134 = arith.addi %3, %c3_i32 : i32
    %c0_128 = arith.constant 0 : index
    %135 = arith.index_cast %134 : i32 to index
    %c0_129 = arith.constant 0 : index
    %c0_130 = arith.constant 0 : index
    %136 = vector.load %arg2[%c0_128, %135, %c0_129, %c0_130] : memref<1x13x11x16xbf16, #tpu.memory_space<vmem>>, vector<1x6x8x16xbf16>
    %137 = vector.shape_cast %136 : vector<1x6x8x16xbf16> to vector<6x8x16xbf16>
    %138 = vector.shape_cast %137 : vector<6x8x16xbf16> to vector<48x16xbf16>
    %c12 = arith.constant 12 : index
    %c0_131 = arith.constant 0 : index
    %c0_132 = arith.constant 0 : index
    %139 = vector.load %arg3[%c12, %c0_131, %c0_132] : memref<16x16x8xbf16, #tpu.memory_space<vmem>>, vector<1x16x8xbf16>
    %140 = vector.shape_cast %139 : vector<1x16x8xbf16> to vector<16x8xbf16>
    %cst_133 = arith.constant dense<0.000000e+00> : vector<48x8xf32>
    %141 = tpu.matmul %138, %140, %cst_133 {dimension_numbers = #tpu.dot_dimension_numbers<[1], [0], [0], [1], [0, 0, 1, 1], [], []>} : vector<48x16xbf16>, vector<16x8xbf16>, vector<48x8xf32> -> vector<48x8xf32>
    %c0_134 = arith.constant 0 : index
    %c0_135 = arith.constant 0 : index
    %142 = vector.load %arg6[%c0_134, %c0_135] : memref<48x8xf32, #tpu.memory_space<vmem>>, vector<48x8xf32>
    %143 = arith.addf %142, %141 : vector<48x8xf32>
    %c0_136 = arith.constant 0 : index
    %c0_137 = arith.constant 0 : index
    %144 = vector.load %arg6[%c0_136, %c0_137] : memref<48x8xf32, #tpu.memory_space<vmem>>, vector<48x8xf32>
    tpu.vector_store %arg6[%c0_136, %c0_137], %143 {strides = array<i32>} : memref<48x8xf32, #tpu.memory_space<vmem>>, vector<48x8xf32>,
    %c3_i32_138 = arith.constant 3 : i32
    %145 = arith.addi %3, %c3_i32_138 : i32
    %c0_139 = arith.constant 0 : index
    %146 = arith.index_cast %145 : i32 to index
    %c1_140 = arith.constant 1 : index
    %c0_141 = arith.constant 0 : index
    %147 = vector.load %arg2[%c0_139, %146, %c1_140, %c0_141] : memref<1x13x11x16xbf16, #tpu.memory_space<vmem>>, vector<1x6x8x16xbf16>
    %148 = vector.shape_cast %147 : vector<1x6x8x16xbf16> to vector<6x8x16xbf16>
    %149 = vector.shape_cast %148 : vector<6x8x16xbf16> to vector<48x16xbf16>
    %c13 = arith.constant 13 : index
    %c0_142 = arith.constant 0 : index
    %c0_143 = arith.constant 0 : index
    %150 = vector.load %arg3[%c13, %c0_142, %c0_143] : memref<16x16x8xbf16, #tpu.memory_space<vmem>>, vector<1x16x8xbf16>
    %151 = vector.shape_cast %150 : vector<1x16x8xbf16> to vector<16x8xbf16>
    %cst_144 = arith.constant dense<0.000000e+00> : vector<48x8xf32>
    %152 = tpu.matmul %149, %151, %cst_144 {dimension_numbers = #tpu.dot_dimension_numbers<[1], [0], [0], [1], [0, 0, 1, 1], [], []>} : vector<48x16xbf16>, vector<16x8xbf16>, vector<48x8xf32> -> vector<48x8xf32>
    %c0_145 = arith.constant 0 : index
    %c0_146 = arith.constant 0 : index
    %153 = vector.load %arg6[%c0_145, %c0_146] : memref<48x8xf32, #tpu.memory_space<vmem>>, vector<48x8xf32>
    %154 = arith.addf %153, %152 : vector<48x8xf32>
    %c0_147 = arith.constant 0 : index
    %c0_148 = arith.constant 0 : index
    %155 = vector.load %arg6[%c0_147, %c0_148] : memref<48x8xf32, #tpu.memory_space<vmem>>, vector<48x8xf32>
    tpu.vector_store %arg6[%c0_147, %c0_148], %154 {strides = array<i32>} : memref<48x8xf32, #tpu.memory_space<vmem>>, vector<48x8xf32>,
    %c3_i32_149 = arith.constant 3 : i32
    %156 = arith.addi %3, %c3_i32_149 : i32
    %c0_150 = arith.constant 0 : index
    %157 = arith.index_cast %156 : i32 to index
    %c2_151 = arith.constant 2 : index
    %c0_152 = arith.constant 0 : index
    %158 = vector.load %arg2[%c0_150, %157, %c2_151, %c0_152] : memref<1x13x11x16xbf16, #tpu.memory_space<vmem>>, vector<1x6x8x16xbf16>
    %159 = vector.shape_cast %158 : vector<1x6x8x16xbf16> to vector<6x8x16xbf16>
    %160 = vector.shape_cast %159 : vector<6x8x16xbf16> to vector<48x16xbf16>
    %c14 = arith.constant 14 : index
    %c0_153 = arith.constant 0 : index
    %c0_154 = arith.constant 0 : index
    %161 = vector.load %arg3[%c14, %c0_153, %c0_154] : memref<16x16x8xbf16, #tpu.memory_space<vmem>>, vector<1x16x8xbf16>
    %162 = vector.shape_cast %161 : vector<1x16x8xbf16> to vector<16x8xbf16>
    %cst_155 = arith.constant dense<0.000000e+00> : vector<48x8xf32>
    %163 = tpu.matmul %160, %162, %cst_155 {dimension_numbers = #tpu.dot_dimension_numbers<[1], [0], [0], [1], [0, 0, 1, 1], [], []>} : vector<48x16xbf16>, vector<16x8xbf16>, vector<48x8xf32> -> vector<48x8xf32>
    %c0_156 = arith.constant 0 : index
    %c0_157 = arith.constant 0 : index
    %164 = vector.load %arg6[%c0_156, %c0_157] : memref<48x8xf32, #tpu.memory_space<vmem>>, vector<48x8xf32>
    %165 = arith.addf %164, %163 : vector<48x8xf32>
    %c0_158 = arith.constant 0 : index
    %c0_159 = arith.constant 0 : index
    %166 = vector.load %arg6[%c0_158, %c0_159] : memref<48x8xf32, #tpu.memory_space<vmem>>, vector<48x8xf32>
    tpu.vector_store %arg6[%c0_158, %c0_159], %165 {strides = array<i32>} : memref<48x8xf32, #tpu.memory_space<vmem>>, vector<48x8xf32>,
    %c3_i32_160 = arith.constant 3 : i32
    %167 = arith.addi %3, %c3_i32_160 : i32
    %c0_161 = arith.constant 0 : index
    %168 = arith.index_cast %167 : i32 to index
    %c3_162 = arith.constant 3 : index
    %c0_163 = arith.constant 0 : index
    %169 = vector.load %arg2[%c0_161, %168, %c3_162, %c0_163] : memref<1x13x11x16xbf16, #tpu.memory_space<vmem>>, vector<1x6x8x16xbf16>
    %170 = vector.shape_cast %169 : vector<1x6x8x16xbf16> to vector<6x8x16xbf16>
    %171 = vector.shape_cast %170 : vector<6x8x16xbf16> to vector<48x16xbf16>
    %c15 = arith.constant 15 : index
    %c0_164 = arith.constant 0 : index
    %c0_165 = arith.constant 0 : index
    %172 = vector.load %arg3[%c15, %c0_164, %c0_165] : memref<16x16x8xbf16, #tpu.memory_space<vmem>>, vector<1x16x8xbf16>
    %173 = vector.shape_cast %172 : vector<1x16x8xbf16> to vector<16x8xbf16>
    %cst_166 = arith.constant dense<0.000000e+00> : vector<48x8xf32>
    %174 = tpu.matmul %171, %173, %cst_166 {dimension_numbers = #tpu.dot_dimension_numbers<[1], [0], [0], [1], [0, 0, 1, 1], [], []>} : vector<48x16xbf16>, vector<16x8xbf16>, vector<48x8xf32> -> vector<48x8xf32>
    %c0_167 = arith.constant 0 : index
    %c0_168 = arith.constant 0 : index
    %175 = vector.load %arg6[%c0_167, %c0_168] : memref<48x8xf32, #tpu.memory_space<vmem>>, vector<48x8xf32>
    %176 = arith.addf %175, %174 : vector<48x8xf32>
    %c0_169 = arith.constant 0 : index
    %c0_170 = arith.constant 0 : index
    %177 = vector.load %arg6[%c0_169, %c0_170] : memref<48x8xf32, #tpu.memory_space<vmem>>, vector<48x8xf32>
    tpu.vector_store %arg6[%c0_169, %c0_170], %176 {strides = array<i32>} : memref<48x8xf32, #tpu.memory_space<vmem>>, vector<48x8xf32>,
    %c0_171 = arith.constant 0 : index
    %c0_172 = arith.constant 0 : index
    %178 = vector.load %arg6[%c0_171, %c0_172] : memref<48x8xf32, #tpu.memory_space<vmem>>, vector<48x8xf32>
    %c0_173 = arith.constant 0 : index
    %c0_174 = arith.constant 0 : index
    %179 = vector.load %arg4[%c0_173, %c0_174] : memref<1x8xf32, #tpu.memory_space<vmem>>, vector<1x8xf32>
    %180 = vector.broadcast %179 : vector<1x8xf32> to vector<48x8xf32>
    %181 = arith.addf %178, %180 : vector<48x8xf32>
    %cst_175 = arith.constant 0.000000e+00 : f32
    %182 = vector.broadcast %cst_175 : f32 to vector<48x8xf32>
    %183 = arith.maximumf %181, %182 : vector<48x8xf32>
    %184 = vector.shape_cast %183 : vector<48x8xf32> to vector<6x8x8xf32>
    %185 = tpu.iota {dimensions = array<i32: 0>} : vector<6x1x1xi32>
    %186 = vector.broadcast %1 : i32 to vector<6x1x1xi32>
    %187 = arith.addi %186, %185 : vector<6x1x1xi32>
    %c0_i32_176 = arith.constant 0 : i32
    %188 = vector.broadcast %c0_i32_176 : i32 to vector<6x1x1xi32>
    %189 = arith.cmpi sge, %187, %188 : vector<6x1x1xi32>
    %c8_i32 = arith.constant 8 : i32
    %190 = vector.broadcast %c8_i32 : i32 to vector<6x1x1xi32>
    %191 = arith.cmpi slt, %187, %190 : vector<6x1x1xi32>
    %192 = arith.andi %189, %191 : vector<6x1x1xi1>
    %cst_177 = arith.constant 0.000000e+00 : f32
    %193 = vector.shape_cast %192 : vector<6x1x1xi1> to vector<6x1x1xi1>
    %194 = vector.broadcast %193 : vector<6x1x1xi1> to vector<6x8x8xi1>
    %195 = vector.broadcast %cst_177 : f32 to vector<6x8x8xf32>
    %196 = arith.select %194, %184, %195 : vector<6x8x8xi1>, vector<6x8x8xf32>
    %197 = vector.shape_cast %196 : vector<6x8x8xf32> to vector<6x4x2x8xf32>
    %198 = vector.extract_strided_slice %197 {offsets = [0, 0, 0, 0], sizes = [6, 4, 1, 8], strides = [1, 1, 1, 1]} : vector<6x4x2x8xf32> to vector<6x4x1x8xf32>
    %199 = vector.shape_cast %198 : vector<6x4x1x8xf32> to vector<6x4x8xf32>
    %200 = vector.extract_strided_slice %197 {offsets = [0, 0, 1, 0], sizes = [6, 4, 1, 8], strides = [1, 1, 1, 1]} : vector<6x4x2x8xf32> to vector<6x4x1x8xf32>
    %201 = vector.shape_cast %200 : vector<6x4x1x8xf32> to vector<6x4x8xf32>
    %cst_178 = arith.constant 0.000000e+00 : f32
    %202 = vector.broadcast %cst_178 : f32 to vector<6x1x8xf32>
    %203 = vector.extract_strided_slice %201 {offsets = [0, 0, 0], sizes = [6, 3, 8], strides = [1, 1, 1]} : vector<6x4x8xf32> to vector<6x3x8xf32>
    %204 = tpu.concatenate %202, %203 in 1 : vector<6x1x8xf32>, vector<6x3x8xf32> -> vector<6x4x8xf32>
    %205 = arith.maximumf %199, %201 : vector<6x4x8xf32>
    %206 = arith.maximumf %205, %204 : vector<6x4x8xf32>
    %207 = vector.shape_cast %206 : vector<6x4x8xf32> to vector<3x2x4x8xf32>
    %208 = vector.extract_strided_slice %207 {offsets = [0, 0, 0, 0], sizes = [3, 1, 4, 8], strides = [1, 1, 1, 1]} : vector<3x2x4x8xf32> to vector<3x1x4x8xf32>
    %209 = vector.shape_cast %208 : vector<3x1x4x8xf32> to vector<3x4x8xf32>
    %210 = vector.extract_strided_slice %207 {offsets = [0, 1, 0, 0], sizes = [3, 1, 4, 8], strides = [1, 1, 1, 1]} : vector<3x2x4x8xf32> to vector<3x1x4x8xf32>
    %211 = vector.shape_cast %210 : vector<3x1x4x8xf32> to vector<3x4x8xf32>
    %212 = vector.extract_strided_slice %209 {offsets = [0, 0, 0], sizes = [2, 4, 8], strides = [1, 1, 1]} : vector<3x4x8xf32> to vector<2x4x8xf32>
    %213 = vector.extract_strided_slice %211 {offsets = [0, 0, 0], sizes = [2, 4, 8], strides = [1, 1, 1]} : vector<3x4x8xf32> to vector<2x4x8xf32>
    %214 = arith.maximumf %212, %213 : vector<2x4x8xf32>
    %215 = vector.extract_strided_slice %209 {offsets = [1, 0, 0], sizes = [2, 4, 8], strides = [1, 1, 1]} : vector<3x4x8xf32> to vector<2x4x8xf32>
    %216 = arith.maximumf %214, %215 : vector<2x4x8xf32>
    %217 = vector.shape_cast %216 : vector<2x4x8xf32> to vector<2x32xf32>
    %c0_179 = arith.constant 0 : index
    %c0_180 = arith.constant 0 : index
    %c0_181 = arith.constant 0 : index
    %c0_182 = arith.constant 0 : index
    %218 = vector.load %arg5[%c0_179, %c0_180, %c0_181, %c0_182] : memref<1x1x2x32xf32, #tpu.memory_space<vmem>>, vector<1x1x2x32xf32>
    %219 = vector.shape_cast %218 : vector<1x1x2x32xf32> to vector<2x32xf32>
    %220 = vector.shape_cast %217 : vector<2x32xf32> to vector<1x1x2x32xf32>
    tpu.vector_store %arg5[%c0_179, %c0_180, %c0_181, %c0_182], %220 {strides = array<i32>} : memref<1x1x2x32xf32, #tpu.memory_space<vmem>>, vector<1x1x2x32xf32>,
    return
  }
  func.func @transform_0(%arg0: i32, %arg1: i32) -> (i32, i32, i32, i32) {
    %c0_i32 = arith.constant 0 : i32
    %c0_i32_0 = arith.constant 0 : i32
    %c0_i32_1 = arith.constant 0 : i32
    %c0_i32_2 = arith.constant 0 : i32
    return %arg0, %c0_i32, %c0_i32_0, %c0_i32_1 : i32, i32, i32, i32
  }
  func.func @transform_1(%arg0: i32, %arg1: i32) -> (i32, i32, i32) {
    %c0_i32 = arith.constant 0 : i32
    %c0_i32_0 = arith.constant 0 : i32
    %c0_i32_1 = arith.constant 0 : i32
    %c0_i32_2 = arith.constant 0 : i32
    return %c0_i32, %c0_i32_0, %c0_i32_1 : i32, i32, i32
  }
  func.func @transform_2(%arg0: i32, %arg1: i32) -> (i32, i32) {
    %c0_i32 = arith.constant 0 : i32
    %c0_i32_0 = arith.constant 0 : i32
    %c0_i32_1 = arith.constant 0 : i32
    return %c0_i32, %c0_i32_0 : i32, i32
  }
  func.func @transform_3(%arg0: i32, %arg1: i32) -> (i32, i32, i32, i32) {
    %c0_i32 = arith.constant 0 : i32
    %c0_i32_0 = arith.constant 0 : i32
    %c0_i32_1 = arith.constant 0 : i32
    return %arg0, %arg1, %c0_i32, %c0_i32_0 : i32, i32, i32, i32
  }
}

</mosaic_0001>

<bundles_post_ra>
// kernel: tpu_custom_call.1
= control target key start
LH: loop header
LB: loop body
LE: loop exit
PB: predicated region body
PF: predicated region fallthrough
CT: control target
= control target key end

     0   :  { %8 = vsyncpa [#allocation4], 0  ;;  %s4413_s0 = inlined_call_operand.vmem [shape: bf16[2,13,11,16], index: 0, kind: input, shape index: {}]   ;;  %s4414_s1 = inlined_call_operand.vmem [shape: bf16[16,16,8], index: 1, kind: input, shape index: {}]   ;;  %s4415_s2 = inlined_call_operand.vmem [shape: f32[1,8], index: 2, kind: input, shape index: {}]   ;;  %s4416_s3 = inlined_call_operand.hbm [shape: f32[2,2,2,32], index: 3, kind: output, shape index: {}]  }
   0x1   :  { %10 = vsyncpa [#allocation4 + $0x1], 0  ;;  %s3492_s12 = smov 0   ;;  %s3494_s13 = smov 0  }
   0x2   :  { %s3496_s14 = smov 0   ;;  %s3498_s15 = smov 0  }
   0x3   :  { %s3500_s16 = smov 0   ;;  %s3502_s17 = smov 0  }
   0x4   :  { %s3504_s18 = smov 0   ;;  %s3506_s19 = smov 0  }
   0x5 LB: > { %s2880_s20 = sadd.s32 4294967295, %s3466_s19   ;;  %s2881_s21 = sadd.s32 4294967294, %s3466_s19   ;;  %s3466_s19 = sphi %s3506_s19, %s16_s19   ;;  %s3462_s18 = sphi %s3504_s18, %s4431_s18   ;;  %s3458_s17 = sphi %s3502_s17, %s4430_s17   ;;  %s3454_s16 = sphi %s3500_s16, %s4429_s16   ;;  %s3450_s15 = sphi %s3498_s15, %s4428_s15   ;;  %s3446_s14 = sphi %s3496_s14, %s4427_s14   ;;  %s3442_s13 = sphi %s3494_s13, %s4426_s13   ;;  %s3438_s12 = sphi %s3492_s12, %s4425_s12  }
   0x6   : > { %s25_s22 = sadd.s32 1, %s3458_s17  ;;  %s28_s23 = sadd.s32 1, %s3462_s18 }
   0x7   : > { %p26_p0 = scmp.ge.s32.totalorder %s25_s22, 2  ;;  %p115_p1 = scmp.ne.s32.totalorder %s3446_s14, %s3442_s13 }
   0x8   : > { %p116_p2 = scmp.eq.s32.totalorder %s2880_s20, 3  ;;  %p121_p5 = scmp.ne.s32.totalorder %s3442_s13, %s3438_s12 }
   0x9   : > { %s4433_s22 = smov (%p26_p0, %s25_s22), 0  ;;  %s4435_s23 = smov (!%p26_p0, %s28_s23), %s3462_s18 }
   0xa   : > { %s101_s24 = ssub.s32 %s3458_s17, %s4433_s22  ;;  %p3543_p3 = por %p116_p2, %p115_p1 }
   0xb   : > { %p30_p4 = scmp.ge.s32.totalorder %s4435_s23, 2  ;;  %p122_p6 = scmp.eq.s32.totalorder %s2881_s21, 3 }
   0xc   : > { %p2884_p7 = scmp.ge.s32.totalorder %s3466_s19, 1  ;;  %p154_p9 = scmp.lt.s32.totalorder %s3466_s19, 5 }
   0xd   : > { %s4437_s23 = smov (%p30_p4, %s4435_s23), 0  ;;  %p3552_p8 = por %p122_p6, %p121_p5 }
   0xe   : > { %s100_s27 = ssub.s32 %s3462_s18, %s4437_s23  ;;  %s105_s28 = sadd.s32 1, %s3446_s14 }
   0xf   : > { %s102_s29 = sor.u32 %s101_s24, %s100_s27  ;;  %p155_p10 = pnand %p2884_p7, %p154_p9 }
  0x10   : > { %p103_p11 = scmp.eq.s32.totalorder %s102_s29, 0  ;;  %p178_p12 = scmp.lt.s32.totalorder (!%p155_p10), %s3454_s16, 1 }
  0x11   : > { %158 = sbr.rel (%p155_p10) target bundleno = 554 (0x22a), region = 32  ;;  %s3263_s8 = sshll.u32 (!%p155_p10), %s3450_s15, 5 }
  0x12   : > { %s3561_s30 = scalar_select %p103_p11, %s3446_s14, %s105_s28  }
  0x13   : > { %s3469_s5 = smov (!%p155_p10), 8   ;;  %s3470_s6 = smov (!%p155_p10), 16  }
  0x14   : > { %s175_s9 = sand.u32 (!%p155_p10), 1, %s3442_s13  }
  0x16   : > { %v3267_v0 = vld [vmem:[%s4414_s1] sm:$0xff]  ;;  %v3269_v2 = vld [vmem:[%s4414_s1 + $0x10] sm:$0xff]  ;;  %v3268_v3 = vld [vmem:[%s4414_s1 + $0x8] sm:$0xff]  ;;  %s179_s24 = scalar_select %p178_p12, %s3454_s16, 1  ;;  %vm451_vm0 = vcmask 1042432   ;;  %vm452_vm1 = vcmask 1046532  }
  0x17   : > { %v3275_v1 = vld [vmem:[%s4414_s1 + $0x20] sm:$0xff]  ;;  %v3276_v4 = vld [vmem:[%s4414_s1 + $0x28] sm:$0xff]  ;;  %235 = vmatpush.bf16.msra.mxu0 %v3267_v0  ;;  %512 = vmatpush.bf16.msra.mxu2 %v3269_v2  ;;  %v3270_v5 = vld [vmem:[%s4414_s1 + $0x18] sm:$0xff]  ;;  %vm218_vm2 = vcmask 130048   ;;  %vm271_vm4 = vsmask.f32 3328 }
  0x18   : > { %v3277_v6 = vld [vmem:[%s4414_s1 + $0x30] sm:$0xff]  ;;  %392 = vmatpush.bf16.msra.mxu1 %v3268_v3  ;;  %v3278_v7 = vld [vmem:[%s4414_s1 + $0x38] sm:$0xff]  ;;  %s3295_s7 = smul.u32 104, %s179_s24  ;;  %704 = vmatpush.bf16.msra.mxu3 %v3270_v5  ;;  %vm3595_vm3 = vmor %vm451_vm0, %vm452_vm1  ;;  %vm272_vm5 = vsmask.f32 7440  ;;  %vm252_vm10 = vcmask 64512  }
  0x19   : > { %vm559_vm6 = vsmask.f32 2304  ;;  %vm560_vm7 = vsmask.f32 6416  ;;  %vm3628_vm8 = vmor %vm271_vm4, %vm272_vm5  ;;  %vm2511_vm0 = vcmask 1042434   ;;  %vm2528_vm5 = vcmask 1040384  }
  0x1a   : > { %s182_s11 = scalar_lea.vmem %s4413_s0, %s3295_s7  ;;  %vm3644_vm9 = vmor %vm559_vm6, %vm560_vm7  ;;  %s3471_s7 = smov 24  }
  0x1b   : > { %789 = vmatpush.bf16.msrb.mxu0 %v3275_v1  ;;  %1071 = vmatpush.bf16.msrb.mxu2 %v3277_v6  ;;  %s3593_s20 = scalar_lea.vmem %s182_s11, %s3263_s8  ;;  %s3258_s8 = sshll.u32 %s3454_s16, 1 }
  0x1c   : > { %954 = vmatpush.bf16.msrb.mxu1 %v3276_v4  ;;  %1260 = vmatpush.bf16.msrb.mxu3 %v3278_v7  ;;  %v2893_v9 = vld [vmem:[%s3593_s20] sm:$0xf]  ;;  %v3264_v10 = vld [vmem:[%s3593_s20 + $0x4] sm:$0xf0]  ;;  %v428_v13 = vld [vmem:[%s3593_s20 + $0x4] sm:$0x1]  ;;  %s2787_s10 = sadd.s32 %s3450_s15, %s3258_s8 }
  0x1d   : > { %v427_v11 = vld [vmem:[%s3593_s20] sm:$0xe]  ;;  %v2894_v12 = vor.u32 %v3264_v10, %v2893_v9  ;;  %v429_v14 = vld [vmem:[%s3593_s20 + $0x8] sm:$0xe]  ;;  %v430_v15 = vld [vmem:[%s3593_s20 + $0xc] sm:$0x1] }
  0x1e   : > { %v2919_v16 = vrot.slane %v427_v11, 9  ;;  %v456_v17 = vrot.slane %v428_v13, 5  ;;  %v2920_v18 = vrot.slane %v429_v14, 9  ;;  %v460_v19 = vrot.slane %v430_v15, 5  ;;  %v259_v20 = vld [vmem:[%s3593_s20] sm:$0xf] }
  0x1f   : > { %2907 = vmatmul.msk.bf16.vlgmr.msra.gmra.mxu0 %vm218_vm2, %v2894_v12  ;;  %v260_v21 = vld [vmem:[%s3593_s20 + $0x4] sm:$0x1]  ;;  %v261_v22 = vld [vmem:[%s3593_s20 + $0x8] sm:$0xf]  ;;  %v262_v23 = vld [vmem:[%s3593_s20 + $0xc] sm:$0x1] }
  0x20   : > { %v457_v24 = vsel %vm3595_vm3, %v2919_v16, %v456_v17  ;;  %v461_v25 = vsel %vm3595_vm3, %v2920_v18, %v460_v19  ;;  %v275_v26 = vshrl.u32 %v259_v20, 16  ;;  %v278_v27 = vshll.u32 %v259_v20, 16  ;;  %v3615_v28 = vld [vmem:[%s3593_s20 + $0x10] sm:$0xf]  ;;  %v3618_v29 = vld [vmem:[%s3593_s20 + $0x14] sm:$0xf0] }
  0x21   : > { %v481_v30 = vunpack.c.l.b16 %v457_v24  ;;  %v482_v31 = vunpack.c.l.b16 %v461_v25  ;;  %v284_v32 = vshll.u32 %v260_v21, 16  ;;  %v289_v33 = vshrl.u32 %v261_v22, 16  ;;  %v547_v34 = vld [vmem:[%s3593_s20] sm:$0xe]  ;;  %v548_v35 = vld [vmem:[%s3593_s20 + $0x4] sm:$0x3] }
  0x22   : > { %v277_v36 = vrot.slane %v275_v26, 4  ;;  %v280_v37 = vrot.slane %v278_v27, 5  ;;  %v292_v38 = vshll.u32 %v261_v22, 16  ;;  %v298_v39 = vshll.u32 %v262_v23, 16  ;;  %v549_v40 = vld [vmem:[%s3593_s20 + $0x8] sm:$0xe] }
  0x23   : > { %v487_v41 = vpack.c.b16 %v482_v31, %v481_v30  ;;  %v286_v42 = vrot.slane %v284_v32, 5  ;;  %v291_v43 = vrot.slane %v289_v33, 4  ;;  %v2898_v44 = vor.u32 %v3618_v29, %v3615_v28  ;;  %v550_v50 = vld [vmem:[%s3593_s20 + $0xc] sm:$0x3]  ;;  %v431_v59 = vld [vmem:[%s3593_s20 + $0x10] sm:$0xe] }
  0x24   : > { %v281_v45 = vor.u32 %v280_v37, %v277_v36  ;;  %v294_v46 = vrot.slane %v292_v38, 5  ;;  %v300_v47 = vrot.slane %v298_v39, 5  ;;  %v563_v48 = vshrl.u32 %v547_v34, 16  ;;  %v432_v0 = vld [vmem:[%s3593_s20 + $0x14] sm:$0x1]  ;;  %s2885_s11 = sshll.u32 %s175_s9, 1 }
  0x25   : > { %2931 = vmatmul.msk.bf16.vlgmr.msra.gmra.mxu2 %vm218_vm2, %v487_v41  ;;  %v566_v51 = vshll.u32 %v547_v34, 16  ;;  %v572_v52 = vshrl.u32 %v548_v35, 16  ;;  %v575_v53 = vshll.u32 %v548_v35, 16  ;;  %v581_v54 = vshrl.u32 %v549_v40, 16  ;;  %v433_v5 = vld [vmem:[%s3593_s20 + $0x18] sm:$0xe] }
  0x26   : > { %v282_v55 = vrot.slane %v281_v45, 4  ;;  %v295_v56 = vor.u32 %v294_v46, %v291_v43  ;;  %v565_v57 = vrot.slane %v563_v48, 5  ;;  %v584_v58 = vshll.u32 %v549_v40, 16  ;;  %v434_v11 = vld [vmem:[%s3593_s20 + $0x1c] sm:$0x1]  ;;  %s3259_s21 = sshll.u32 %s2787_s10, 1 }
  0x27   : > { %v568_v60 = vrot.slane %v566_v51, 6  ;;  %v574_v61 = vrot.slane %v572_v52, 5  ;;  %v577_v62 = vrot.slane %v575_v53, 6  ;;  %v583_v63 = vrot.slane %v581_v54, 5  ;;  %v263_v12 = vld [vmem:[%s3593_s20 + $0x10] sm:$0xf] }
  0x28   : > { %v287_v1 = vsel %vm3628_vm8, %v282_v55, %v286_v42  ;;  %v296_v2 = vrot.slane %v295_v56, 4  ;;  %v586_v3 = vrot.slane %v584_v58, 6  ;;  %v590_v4 = vshrl.u32 %v550_v50, 16  ;;  %v264_v25 = vld [vmem:[%s3593_s20 + $0x14] sm:$0x1]  ;;  %s3392_s8 = scalar_lea.hbm %s4416_s3, 8 }
  0x29   : > { %v361_v6 = vunpack.c.l.b16 %v287_v1  ;;  %v569_v7 = vor.u32 %v568_v60, %v565_v57  ;;  %v578_v9 = vor.u32 %v577_v62, %v574_v61  ;;  %v593_v10 = vshll.u32 %v550_v50, 16  ;;  %v265_v31 = vld [vmem:[%s3593_s20 + $0x18] sm:$0xf]  ;;  %v266_v32 = vld [vmem:[%s3593_s20 + $0x1c] sm:$0x1] }
  0x2a   : > { %v301_v13 = vsel %vm3628_vm8, %v296_v2, %v300_v47  ;;  %v587_v15 = vor.u32 %v586_v3, %v583_v63  ;;  %v592_v16 = vrot.slane %v590_v4, 5  ;;  %v2921_v17 = vrot.slane %v431_v59, 9  ;;  %v3658_v37 = vld [vmem:[%s3593_s20 + $0x20] sm:$0xf]  ;;  %v3661_v38 = vld [vmem:[%s3593_s20 + $0x24] sm:$0xf0] }
  0x2b   : > { %v362_v18 = vunpack.c.l.b16 %v301_v13  ;;  %v570_v19 = vrot.slane %v569_v7, 4  ;;  %v595_v20 = vrot.slane %v593_v10, 6  ;;  %v464_v21 = vrot.slane %v432_v0, 5  ;;  %v551_v43 = vld [vmem:[%s3593_s20 + $0x10] sm:$0xe]  ;;  %v3283_v4 = vld [vmem:[%s4414_s1 + $0x40] sm:$0xff] }
  0x2c   : > { %v588_v22 = vrot.slane %v587_v15, 4  ;;  %v2922_v23 = vrot.slane %v433_v5, 9  ;;  %v468_v24 = vrot.slane %v434_v11, 5  ;;  %v303_v26 = vshrl.u32 %v263_v12, 16  ;;  %v552_v50 = vld [vmem:[%s3593_s20 + $0x14] sm:$0x3]  ;;  %1345 = vmatpush.bf16.msra.mxu0 %v3283_v4 }
  0x2d   : > { %v367_v27 = vpack.c.b16 %v362_v18, %v361_v6  ;;  %v579_v28 = vsel %vm3644_vm9, %v570_v19, %v578_v9  ;;  %v596_v29 = vor.u32 %v595_v20, %v592_v16  ;;  %v465_v30 = vsel %vm3595_vm3, %v2921_v17, %v464_v21  ;;  %v554_v0 = vld [vmem:[%s3593_s20 + $0x1c] sm:$0x3]  ;;  %v435_v15 = vld [vmem:[%s3593_s20 + $0x20] sm:$0xe]  ;;  %v436_v20 = vld [vmem:[%s3593_s20 + $0x24] sm:$0x1] }
  0x2e   : > { %v673_v33 = vunpack.c.l.b16 %v579_v28  ;;  %v469_v34 = vsel %vm3595_vm3, %v2922_v23, %v468_v24  ;;  %v483_v35 = vunpack.c.l.b16 %v465_v30  ;;  %v305_v36 = vrot.slane %v303_v26, 4  ;;  %v437_v21 = vld [vmem:[%s3593_s20 + $0x28] sm:$0xe]  ;;  %v438_v26 = vld [vmem:[%s3593_s20 + $0x2c] sm:$0x1]  ;;  %v3285_v4 = vld [vmem:[%s4414_s1 + $0x50] sm:$0xff] }
  0x2f   : > { %2916 = vmatmul.msk.bf16.vlgmr.msra.gmra.mxu1 %vm218_vm2, %v367_v27  ;;  %2908 = vmatmul.msk.bf16.gmra.mxu0 %vm218_vm2, %v2898_v44  ;;  %v597_v39 = vsel %vm3644_vm9, %v588_v22, %v596_v29  ;;  %v484_v40 = vunpack.c.l.b16 %v469_v34  ;;  %v306_v41 = vshll.u32 %v263_v12, 16  ;;  %v312_v42 = vshll.u32 %v264_v25, 16  ;;  %v553_v44 = vld [vmem:[%s3593_s20 + $0x18] sm:$0xe]  ;;  %v3225_v8 = vld [vmem:[%s3593_s20 + $0x3c] sm:$0x3] }
  0x30   : > { %v674_v45 = vunpack.c.l.b16 %v597_v39  ;;  %v317_v46 = vshrl.u32 %v265_v31, 16  ;;  %v320_v47 = vshll.u32 %v265_v31, 16  ;;  %v326_v48 = vshll.u32 %v266_v32, 16  ;;  %v267_v31 = vld [vmem:[%s3593_s20 + $0x20] sm:$0xf]  ;;  %1627 = vmatpush.bf16.msra.mxu2 %v3285_v4 }
  0x31   : > { %v488_v51 = vpack.c.b16 %v484_v40, %v483_v35  ;;  %v308_v52 = vrot.slane %v306_v41, 5  ;;  %v314_v53 = vrot.slane %v312_v42, 5  ;;  %v2902_v54 = vor.u32 %v3661_v38, %v3658_v37  ;;  %v557_v38 = vld [vmem:[%s3593_s20 + $0x28] sm:$0xe] }
  0x32   : > { %v679_v55 = vpack.c.b16 %v674_v45, %v673_v33  ;;  %v319_v56 = vrot.slane %v317_v46, 4  ;;  %v322_v57 = vrot.slane %v320_v47, 5  ;;  %v328_v58 = vrot.slane %v326_v48, 5  ;;  %v269_v46 = vld [vmem:[%s3593_s20 + $0x28] sm:$0xf] }
  0x33   : > { %v309_v59 = vor.u32 %v308_v52, %v305_v36  ;;  %v599_v60 = vshrl.u32 %v551_v43, 16  ;;  %v602_v61 = vshll.u32 %v551_v43, 16  ;;  %v608_v62 = vshrl.u32 %v552_v50, 16  ;;  %v268_v36 = vld [vmem:[%s3593_s20 + $0x24] sm:$0x1] }
  0x34   : > { %2940 = vmatmul.msk.bf16.vlgmr.msra.gmra.mxu3 %vm218_vm2, %v679_v55  ;;  %v323_v63 = vor.u32 %v322_v57, %v319_v56  ;;  %v611_v1 = vshll.u32 %v552_v50, 16  ;;  %v617_v2 = vshrl.u32 %v553_v44, 16  ;;  %v620_v3 = vshll.u32 %v553_v44, 16  ;;  %v270_v47 = vld [vmem:[%s3593_s20 + $0x2c] sm:$0x1] }
  0x35   : > { %2932 = vmatmul.msk.bf16.gmra.mxu2 %vm218_vm2, %v488_v51  ;;  %v310_v5 = vrot.slane %v309_v59, 4  ;;  %v601_v6 = vrot.slane %v599_v60, 5  ;;  %v604_v7 = vrot.slane %v602_v61, 6  ;;  %v610_v9 = vrot.slane %v608_v62, 5  ;;  %v3699_v55 = vld [vmem:[%s3593_s20 + $0x8] sm:$0xf] }
  0x36   : > { %v324_v10 = vrot.slane %v323_v63, 4  ;;  %v613_v11 = vrot.slane %v611_v1, 6  ;;  %v619_v12 = vrot.slane %v617_v2, 5  ;;  %v622_v13 = vrot.slane %v620_v3, 6  ;;  %v3702_v56 = vld [vmem:[%s3593_s20 + $0xc] sm:$0xf0] }
  0x37   : > { %v315_v16 = vsel %vm3628_vm8, %v310_v5, %v314_v53  ;;  %v605_v17 = vor.u32 %v604_v7, %v601_v6  ;;  %v626_v18 = vshrl.u32 %v554_v0, 16  ;;  %v629_v19 = vshll.u32 %v554_v0, 16  ;;  %v555_v61 = vld [vmem:[%s3593_s20 + $0x20] sm:$0xe]  ;;  %v556_v62 = vld [vmem:[%s3593_s20 + $0x24] sm:$0x3] }
  0x38   : > { %v329_v22 = vsel %vm3628_vm8, %v324_v10, %v328_v58  ;;  %v363_v23 = vunpack.c.l.b16 %v315_v16  ;;  %v614_v24 = vor.u32 %v613_v11, %v610_v9  ;;  %v623_v25 = vor.u32 %v622_v13, %v619_v12  ;;  %v3284_v3 = vld [vmem:[%s4414_s1 + $0x48] sm:$0xff] }
  0x39   : > { %v364_v27 = vunpack.c.l.b16 %v329_v22  ;;  %v606_v28 = vrot.slane %v605_v17, 4  ;;  %v628_v29 = vrot.slane %v626_v18, 5  ;;  %v631_v30 = vrot.slane %v629_v19, 6  ;;  %1510 = vmatpush.bf16.msra.mxu1 %v3284_v3  ;;  %v558_v13 = vld [vmem:[%s3593_s20 + $0x2c] sm:$0x3] }
  0x3a   : > { %v624_v32 = vrot.slane %v623_v25, 4  ;;  %v2923_v33 = vrot.slane %v435_v15, 9  ;;  %v472_v34 = vrot.slane %v436_v20, 5  ;;  %v2924_v35 = vrot.slane %v437_v21, 9  ;;  %v2993_v22 = vld [vmem:[%s3593_s20 + $0x8] sm:$0xe] }
  0x3b   : > { %v368_v39 = vpack.c.b16 %v364_v27, %v363_v23  ;;  %v615_v40 = vsel %vm3644_vm9, %v606_v28, %v614_v24  ;;  %v632_v41 = vor.u32 %v631_v30, %v628_v29  ;;  %v476_v42 = vrot.slane %v438_v26, 5  ;;  %v2994_v27 = vld [vmem:[%s3593_s20 + $0xc] sm:$0x1] }
  0x3c   : > { %v675_v43 = vunpack.c.l.b16 %v615_v40  ;;  %v473_v45 = vsel %vm3595_vm3, %v2923_v33, %v472_v34  ;;  %v331_v48 = vshrl.u32 %v267_v31, 16  ;;  %v334_v50 = vshll.u32 %v267_v31, 16  ;;  %v2996_v40 = vld [vmem:[%s3593_s20 + $0x14] sm:$0x1] }
  0x3d   : > { %v633_v51 = vsel %vm3644_vm9, %v624_v32, %v632_v41  ;;  %v477_v52 = vsel %vm3595_vm3, %v2924_v35, %v476_v42  ;;  %v485_v53 = vunpack.c.l.b16 %v473_v45  ;;  %v340_v44 = vshll.u32 %v268_v36, 16  ;;  %v3286_v32 = vld [vmem:[%s4414_s1 + $0x58] sm:$0xff] }
  0x3e   : > { %v676_v57 = vunpack.c.l.b16 %v633_v51  ;;  %v486_v58 = vunpack.c.l.b16 %v477_v52  ;;  %v333_v59 = vrot.slane %v331_v48, 4  ;;  %v336_v60 = vrot.slane %v334_v50, 5  ;;  %1816 = vmatpush.bf16.msra.mxu3 %v3286_v32  ;;  %v2973_v52 = vld [vmem:[%s3593_s20 + $0xc] sm:$0x1]  ;;  %v3023_v32 = vld [vmem:[%s3593_s20 + $0x14] sm:$0x3] }
  0x3f   : > { %2917 = vmatmul.msk.bf16.gmra.mxu1 %vm218_vm2, %v368_v39  ;;  %2909 = vmatmul.msk.bf16.gmra.mxu0 %vm218_vm2, %v2902_v54  ;;  %v342_v63 = vrot.slane %v340_v44, 5  ;;  %v345_v0 = vshrl.u32 %v269_v46, 16  ;;  %v348_v1 = vshll.u32 %v269_v46, 16  ;;  %v354_v2 = vshll.u32 %v270_v47, 16  ;;  %v2995_v39 = vld [vmem:[%s3593_s20 + $0x10] sm:$0xe] }
  0x40   : > { %v680_v5 = vpack.c.b16 %v676_v57, %v675_v43  ;;  %v489_v6 = vpack.c.b16 %v486_v58, %v485_v53  ;;  %v337_v7 = vor.u32 %v336_v60, %v333_v59  ;;  %v2956_v37 = vor.u32 %v3702_v56, %v3699_v55  ;;  %v2972_v46 = vld [vmem:[%s3593_s20 + $0x8] sm:$0xf]  ;;  %v2974_v59 = vld [vmem:[%s3593_s20 + $0x10] sm:$0xf] }
  0x41   : > { %v347_v54 = vrot.slane %v345_v0, 4  ;;  %v350_v9 = vrot.slane %v348_v1, 5  ;;  %v356_v10 = vrot.slane %v354_v2, 5  ;;  %v635_v11 = vshrl.u32 %v555_v61, 16  ;;  %v2975_v2 = vld [vmem:[%s3593_s20 + $0x14] sm:$0x1] }
  0x42   : > { %v338_v12 = vrot.slane %v337_v7, 4  ;;  %v638_v15 = vshll.u32 %v555_v61, 16  ;;  %v644_v16 = vshrl.u32 %v556_v62, 16  ;;  %v647_v17 = vshll.u32 %v556_v62, 16 }
  0x43   : > { %v351_v18 = vor.u32 %v350_v9, %v347_v54  ;;  %v637_v19 = vrot.slane %v635_v11, 5  ;;  %v653_v20 = vshrl.u32 %v557_v38, 16  ;;  %v656_v21 = vshll.u32 %v557_v38, 16  ;;  %v3748_v9 = vld [vmem:[%s3593_s20 + $0x18] sm:$0xf] }
  0x44   : > { %2941 = vmatmul.msk.bf16.gmra.mxu3 %vm218_vm2, %v680_v5  ;;  %v343_v23 = vsel %vm3628_vm8, %v338_v12, %v342_v63  ;;  %v640_v24 = vrot.slane %v638_v15, 6  ;;  %v646_v25 = vrot.slane %v644_v16, 5  ;;  %v649_v26 = vrot.slane %v647_v17, 6  ;;  %v3020_v5 = vld [vmem:[%s3593_s20 + $0x8] sm:$0xe] }
  0x45   : > { %2933 = vmatmul.msk.bf16.gmra.mxu2 %vm218_vm2, %v489_v6  ;;  %v352_v28 = vrot.slane %v351_v18, 4  ;;  %v365_v29 = vunpack.c.l.b16 %v343_v23  ;;  %v655_v30 = vrot.slane %v653_v20, 5  ;;  %v658_v31 = vrot.slane %v656_v21, 6  ;;  %v3021_v16 = vld [vmem:[%s3593_s20 + $0xc] sm:$0x3] }
  0x46   : > { %v641_v33 = vor.u32 %v640_v24, %v637_v19  ;;  %v650_v34 = vor.u32 %v649_v26, %v646_v25  ;;  %v662_v35 = vshrl.u32 %v558_v13, 16  ;;  %v665_v36 = vshll.u32 %v558_v13, 16  ;;  %v3022_v21 = vld [vmem:[%s3593_s20 + $0x10] sm:$0xe] }
  0x47   : > { %v357_v41 = vsel %vm3628_vm8, %v352_v28, %v356_v10  ;;  %v659_v42 = vor.u32 %v658_v31, %v655_v30  ;;  %v3005_v43 = vrot.slane %v2993_v22, 9  ;;  %v1015_v45 = vrot.slane %v2994_v27, 5  ;;  %v3751_v10 = vld [vmem:[%s3593_s20 + $0x1c] sm:$0xf0] }
  0x48   : > { %v366_v47 = vunpack.c.l.b16 %v357_v41  ;;  %v642_v48 = vrot.slane %v641_v33, 4  ;;  %v664_v50 = vrot.slane %v662_v35, 5  ;;  %v667_v51 = vrot.slane %v665_v36, 6  ;;  %v2997_v36 = vld [vmem:[%s3593_s20 + $0x18] sm:$0xe] }
  0x49   : > { %v660_v53 = vrot.slane %v659_v42, 4  ;;  %v1016_v44 = vsel %vm3595_vm3, %v3005_v43, %v1015_v45  ;;  %v3006_v57 = vrot.slane %v2995_v39, 9  ;;  %v1019_v58 = vrot.slane %v2996_v40, 5  ;;  %v2998_v43 = vld [vmem:[%s3593_s20 + $0x1c] sm:$0x1] }
  0x4a   : > { %v369_v60 = vpack.c.b16 %v366_v47, %v365_v29  ;;  %v651_v61 = vsel %vm3644_vm9, %v642_v48, %v650_v34  ;;  %v668_v62 = vor.u32 %v667_v51, %v664_v50  ;;  %v1040_v63 = vunpack.c.l.b16 %v1016_v44  ;;  %v2999_v50 = vld [vmem:[%s3593_s20 + $0x20] sm:$0xe]  ;;  %v3000_v51 = vld [vmem:[%s3593_s20 + $0x24] sm:$0x1] }
  0x4b   : > { %v677_v0 = vunpack.c.l.b16 %v651_v61  ;;  %v1020_v1 = vsel %vm3595_vm3, %v3006_v57, %v1019_v58  ;;  %v837_v3 = vshrl.u32 %v2972_v46, 16  ;;  %v840_v4 = vshll.u32 %v2972_v46, 16  ;;  %v2976_v58 = vld [vmem:[%s3593_s20 + $0x18] sm:$0xf] }
  0x4c   : > { %v669_v6 = vsel %vm3644_vm9, %v660_v53, %v668_v62  ;;  %v1041_v7 = vunpack.c.l.b16 %v1020_v1  ;;  %v846_v38 = vshll.u32 %v2973_v52, 16  ;;  %v851_v54 = vshrl.u32 %v2974_v59, 16 }
  0x4d   : > { %v678_v11 = vunpack.c.l.b16 %v669_v6  ;;  %v839_v12 = vrot.slane %v837_v3, 4  ;;  %v842_v13 = vrot.slane %v840_v4, 5  ;;  %v854_v15 = vshll.u32 %v2974_v59, 16  ;;  %v2977_v6 = vld [vmem:[%s3593_s20 + $0x1c] sm:$0x1] }
  0x4e   : > { %v1046_v17 = vpack.c.b16 %v1041_v7, %v1040_v63  ;;  %v848_v18 = vrot.slane %v846_v38, 5  ;;  %v853_v19 = vrot.slane %v851_v54, 4  ;;  %v860_v20 = vshll.u32 %v2975_v2, 16  ;;  %v2978_v7 = vld [vmem:[%s3593_s20 + $0x20] sm:$0xf] }
  0x4f   : > { %2918 = vmatmul.msk.bf16.gmra.mxu1 %vm218_vm2, %v369_v60  ;;  %2969 = vmatmul.msk.bf16.vlgmr.msrb.gmra.mxu0 %vm218_vm2, %v2956_v37  ;;  %v681_v22 = vpack.c.b16 %v678_v11, %v677_v0  ;;  %v843_v23 = vor.u32 %v842_v13, %v839_v12  ;;  %v856_v24 = vrot.slane %v854_v15, 5  ;;  %v2960_v25 = vor.u32 %v3751_v10, %v3748_v9  ;;  %v2979_v15 = vld [vmem:[%s3593_s20 + $0x24] sm:$0x1]  ;;  %v3002_v10 = vld [vmem:[%s3593_s20 + $0x2c] sm:$0x1] }
  0x50   : > { %v862_v26 = vrot.slane %v860_v20, 5  ;;  %v1119_v27 = vshrl.u32 %v3020_v5, 16  ;;  %v1122_v28 = vshll.u32 %v3020_v5, 16  ;;  %v1128_v29 = vshrl.u32 %v3021_v16, 16 }
  0x51   : > { %v844_v30 = vrot.slane %v843_v23, 4  ;;  %v857_v31 = vor.u32 %v856_v24, %v853_v19  ;;  %v1131_v33 = vshll.u32 %v3021_v16, 16  ;;  %v1137_v34 = vshrl.u32 %v3022_v21, 16  ;;  %v3024_v24 = vld [vmem:[%s3593_s20 + $0x18] sm:$0xe] }
  0x52   : > { %v1121_v55 = vrot.slane %v1119_v27, 5  ;;  %v1124_v56 = vrot.slane %v1122_v28, 6  ;;  %v1130_v37 = vrot.slane %v1128_v29, 5  ;;  %v1140_v35 = vshll.u32 %v3022_v21, 16  ;;  %v3025_v29 = vld [vmem:[%s3593_s20 + $0x1c] sm:$0x3] }
  0x53   : > { %v849_v39 = vsel %vm3628_vm8, %v844_v30, %v848_v18  ;;  %v858_v40 = vrot.slane %v857_v31, 4  ;;  %v1133_v41 = vrot.slane %v1131_v33, 6  ;;  %v1139_v42 = vrot.slane %v1137_v34, 5  ;;  %v3026_v34 = vld [vmem:[%s3593_s20 + $0x20] sm:$0xe] }
  0x54   : > { %2942 = vmatmul.msk.bf16.gmra.mxu3 %vm218_vm2, %v681_v22  ;;  %v923_v45 = vunpack.c.l.b16 %v849_v39  ;;  %v1125_v46 = vor.u32 %v1124_v56, %v1121_v55  ;;  %v1142_v47 = vrot.slane %v1140_v35, 6  ;;  %v1146_v48 = vshrl.u32 %v3023_v32, 16  ;;  %v3789_v35 = vld [vmem:[%s3593_s20 + $0x28] sm:$0xf] }
  0x55   : > { %3017 = vmatmul.msk.bf16.vlgmr.msrb.gmra.mxu2 %vm218_vm2, %v1046_v17  ;;  %v863_v52 = vsel %vm3628_vm8, %v858_v40, %v862_v26  ;;  %v1134_v53 = vor.u32 %v1133_v41, %v1130_v37  ;;  %v1149_v44 = vshll.u32 %v3023_v32, 16  ;;  %v3007_v57 = vrot.slane %v2997_v36, 9  ;;  %v3027_v36 = vld [vmem:[%s3593_s20 + $0x24] sm:$0x3]  ;;  %v3798_v41 = vld [vmem:[%s3593_s20 + $0x2c] sm:$0xf0] }
  0x56   : > { %v924_v59 = vunpack.c.l.b16 %v863_v52  ;;  %v1126_v60 = vrot.slane %v1125_v46, 4  ;;  %v1143_v61 = vor.u32 %v1142_v47, %v1139_v42  ;;  %v1148_v62 = vrot.slane %v1146_v48, 5 }
  0x57   : > { %v1151_v63 = vrot.slane %v1149_v44, 6  ;;  %v1023_v0 = vrot.slane %v2998_v43, 5  ;;  %v3008_v1 = vrot.slane %v2999_v50, 9  ;;  %v1027_v2 = vrot.slane %v3000_v51, 5  ;;  %v3001_v51 = vld [vmem:[%s3593_s20 + $0x28] sm:$0xe] }
  0x58   : > { %v929_v3 = vpack.c.b16 %v924_v59, %v923_v45  ;;  %v1135_v4 = vsel %vm3644_vm9, %v1126_v60, %v1134_v53  ;;  %v1144_v5 = vrot.slane %v1143_v61, 4  ;;  %v865_v38 = vshrl.u32 %v2976_v58, 16  ;;  %v3003_v59 = vld [vmem:[%s3593_s20 + $0x30] sm:$0xe] }
  0x59   : > { %v1152_v54 = vor.u32 %v1151_v63, %v1148_v62  ;;  %v1229_v11 = vunpack.c.l.b16 %v1135_v4  ;;  %v1024_v12 = vsel %vm3595_vm3, %v3007_v57, %v1023_v0  ;;  %v1028_v13 = vsel %vm3595_vm3, %v3008_v1, %v1027_v2  ;;  %v3004_v0 = vld [vmem:[%s3593_s20 + $0x34] sm:$0x1] }
  0x5a   : > { %v1042_v16 = vunpack.c.l.b16 %v1024_v12  ;;  %v1043_v17 = vunpack.c.l.b16 %v1028_v13  ;;  %v867_v18 = vrot.slane %v865_v38, 4  ;;  %v868_v19 = vshll.u32 %v2976_v58, 16 }
  0x5b   : > { %v1153_v20 = vsel %vm3644_vm9, %v1144_v5, %v1152_v54  ;;  %v874_v21 = vshll.u32 %v2977_v6, 16  ;;  %v879_v22 = vshrl.u32 %v2978_v7, 16  ;;  %v882_v23 = vshll.u32 %v2978_v7, 16  ;;  %v2980_v5 = vld [vmem:[%s3593_s20 + $0x28] sm:$0xf]  ;;  %v3291_v6 = vld [vmem:[%s4414_s1 + $0x60] sm:$0xff] }
  0x5c   : > { %v1230_v26 = vunpack.c.l.b16 %v1153_v20  ;;  %v870_v27 = vrot.slane %v868_v19, 5  ;;  %v888_v28 = vshll.u32 %v2979_v15, 16  ;;  %v1047_v30 = vpack.c.b16 %v1043_v17, %v1042_v16  ;;  %v2981_v17 = vld [vmem:[%s3593_s20 + $0x2c] sm:$0x1]  ;;  %1901 = vmatpush.bf16.msrb.mxu0 %v3291_v6  ;;  %v2982_v20 = vld [vmem:[%s3593_s20 + $0x30] sm:$0xf] }
  0x5d   : > { %v876_v31 = vrot.slane %v874_v21, 5  ;;  %v881_v32 = vrot.slane %v879_v22, 4  ;;  %v884_v33 = vrot.slane %v882_v23, 5  ;;  %v1155_v39 = vshrl.u32 %v3024_v24, 16  ;;  %v2983_v21 = vld [vmem:[%s3593_s20 + $0x34] sm:$0x1] }
  0x5e   : > { %v1235_v55 = vpack.c.b16 %v1230_v26, %v1229_v11  ;;  %v871_v56 = vor.u32 %v870_v27, %v867_v18  ;;  %v890_v37 = vrot.slane %v888_v28, 5  ;;  %v1158_v42 = vshll.u32 %v3024_v24, 16 }
  0x5f   : > { %2990 = vmatmul.msk.bf16.vlgmr.msrb.gmra.mxu1 %vm218_vm2, %v929_v3  ;;  %2970 = vmatmul.msk.bf16.gmra.mxu0 %vm218_vm2, %v2960_v25  ;;  %v885_v40 = vor.u32 %v884_v33, %v881_v32  ;;  %v1164_v43 = vshrl.u32 %v3025_v29, 16  ;;  %v1167_v45 = vshll.u32 %v3025_v29, 16  ;;  %v1157_v47 = vrot.slane %v1155_v39, 5 }
  0x60   : > { %v872_v46 = vrot.slane %v871_v56, 4  ;;  %v1173_v48 = vshrl.u32 %v3026_v34, 16  ;;  %v1176_v50 = vshll.u32 %v3026_v34, 16  ;;  %v1160_v53 = vrot.slane %v1158_v42, 6 }
  0x61   : > { %v886_v52 = vrot.slane %v885_v40, 4  ;;  %v1166_v44 = vrot.slane %v1164_v43, 5  ;;  %v1169_v9 = vrot.slane %v1167_v45, 6  ;;  %v1182_v58 = vshrl.u32 %v3027_v36, 16  ;;  %v3029_v43 = vld [vmem:[%s3593_s20 + $0x2c] sm:$0x3] }
  0x62   : > { %v1175_v25 = vrot.slane %v1173_v48, 5  ;;  %v1178_v57 = vrot.slane %v1176_v50, 6  ;;  %v877_v60 = vsel %vm3628_vm8, %v872_v46, %v876_v31  ;;  %v2964_v62 = vor.u32 %v3798_v41, %v3789_v35  ;;  %v3030_v45 = vld [vmem:[%s3593_s20 + $0x30] sm:$0xe] }
  0x63   : > { %v891_v61 = vsel %vm3628_vm8, %v886_v52, %v890_v37  ;;  %v1161_v63 = vor.u32 %v1160_v53, %v1157_v47  ;;  %v1170_v1 = vor.u32 %v1169_v9, %v1166_v44  ;;  %v1184_v3 = vrot.slane %v1182_v58, 5  ;;  %v3028_v37 = vld [vmem:[%s3593_s20 + $0x28] sm:$0xe]  ;;  %v3031_v53 = vld [vmem:[%s3593_s20 + $0x34] sm:$0x3] }
  0x64   : > { %3038 = vmatmul.msk.bf16.vlgmr.msrb.gmra.mxu3 %vm218_vm2, %v1235_v55  ;;  %v1179_v2 = vor.u32 %v1178_v57, %v1175_v25  ;;  %v1185_v4 = vshll.u32 %v3027_v36, 16  ;;  %v3009_v38 = vrot.slane %v3001_v51, 9  ;;  %v1031_v54 = vrot.slane %v3002_v10, 5  ;;  %v3832_v25 = vld [vmem:[%s3593_s20 + $0x10] sm:$0xf] }
  0x65   : > { %3018 = vmatmul.msk.bf16.gmra.mxu2 %vm218_vm2, %v1047_v30  ;;  %v1162_v7 = vrot.slane %v1161_v63, 4  ;;  %v3010_v11 = vrot.slane %v3003_v59, 9  ;;  %v925_v12 = vunpack.c.l.b16 %v877_v60  ;;  %v1035_v16 = vrot.slane %v3004_v0, 5  ;;  %v3835_v57 = vld [vmem:[%s3593_s20 + $0x14] sm:$0xf0] }
  0x66   : > { %v1180_v13 = vrot.slane %v1179_v2, 4  ;;  %v1187_v15 = vrot.slane %v1185_v4, 6  ;;  %v926_v18 = vunpack.c.l.b16 %v891_v61  ;;  %v1032_v19 = vsel %vm3595_vm3, %v3009_v38, %v1031_v54  ;;  %v3091_v61 = vld [vmem:[%s3593_s20 + $0x10] sm:$0xe]  ;;  %v3292_v4 = vld [vmem:[%s4414_s1 + $0x68] sm:$0xff] }
  0x67   : > { %v893_v22 = vshrl.u32 %v2980_v5, 16  ;;  %v896_v23 = vshll.u32 %v2980_v5, 16  ;;  %v1171_v24 = vsel %vm3644_vm9, %v1162_v7, %v1170_v1  ;;  %v1036_v27 = vsel %vm3595_vm3, %v3010_v11, %v1035_v16  ;;  %v3293_v5 = vld [vmem:[%s4414_s1 + $0x70] sm:$0xff]  ;;  %v3093_v7 = vld [vmem:[%s3593_s20 + $0x18] sm:$0xe]  ;;  %2066 = vmatpush.bf16.msrb.mxu1 %v3292_v4 }
  0x68   : > { %v1188_v26 = vor.u32 %v1187_v15, %v1184_v3  ;;  %v1044_v28 = vunpack.c.l.b16 %v1032_v19  ;;  %v1045_v29 = vunpack.c.l.b16 %v1036_v27  ;;  %v902_v32 = vshll.u32 %v2981_v17, 16  ;;  %v3092_v3 = vld [vmem:[%s3593_s20 + $0x14] sm:$0x1]  ;;  %2183 = vmatpush.bf16.msrb.mxu2 %v3293_v5  ;;  %v3070_v19 = vld [vmem:[%s3593_s20 + $0x10] sm:$0xf] }
  0x69   : > { %v895_v30 = vrot.slane %v893_v22, 4  ;;  %v898_v31 = vrot.slane %v896_v23, 5  ;;  %v907_v34 = vshrl.u32 %v2982_v20, 16  ;;  %v910_v55 = vshll.u32 %v2982_v20, 16  ;;  %v3121_v4 = vld [vmem:[%s3593_s20 + $0x1c] sm:$0x3] }
  0x6a   : > { %v1189_v33 = vsel %vm3644_vm9, %v1180_v13, %v1188_v26  ;;  %v916_v56 = vshll.u32 %v2983_v21, 16  ;;  %v930_v36 = vpack.c.b16 %v926_v18, %v925_v12  ;;  %v1231_v39 = vunpack.c.l.b16 %v1171_v24  ;;  %v3094_v13 = vld [vmem:[%s3593_s20 + $0x1c] sm:$0x1] }
  0x6b   : > { %v1232_v40 = vunpack.c.l.b16 %v1189_v33  ;;  %v899_v42 = vor.u32 %v898_v31, %v895_v30  ;;  %v1048_v46 = vpack.c.b16 %v1045_v29, %v1044_v28  ;;  %v904_v47 = vrot.slane %v902_v32, 5  ;;  %v3072_v29 = vld [vmem:[%s3593_s20 + $0x18] sm:$0xf]  ;;  %v3071_v33 = vld [vmem:[%s3593_s20 + $0x14] sm:$0x1] }
  0x6c   : > { %v909_v48 = vrot.slane %v907_v34, 4  ;;  %v912_v50 = vrot.slane %v910_v55, 5  ;;  %v918_v52 = vrot.slane %v916_v56, 5  ;;  %v1191_v44 = vshrl.u32 %v3028_v37, 16  ;;  %v3294_v55 = vld [vmem:[%s4414_s1 + $0x78] sm:$0xff] }
  0x6d   : > { %v900_v51 = vrot.slane %v899_v42, 4  ;;  %v1194_v9 = vshll.u32 %v3028_v37, 16  ;;  %v1200_v58 = vshrl.u32 %v3029_v43, 16  ;;  %v1203_v59 = vshll.u32 %v3029_v43, 16  ;;  %2372 = vmatpush.bf16.msrb.mxu3 %v3294_v55 }
  0x6e   : > { %v913_v10 = vor.u32 %v912_v50, %v909_v48  ;;  %v1209_v60 = vshrl.u32 %v3030_v45, 16  ;;  %v1236_v63 = vpack.c.b16 %v1232_v40, %v1231_v39  ;;  %v1193_v0 = vrot.slane %v1191_v44, 5  ;;  %v3073_v40 = vld [vmem:[%s3593_s20 + $0x1c] sm:$0x1] }
  0x6f   : > { %2991 = vmatmul.msk.bf16.gmra.mxu1 %vm218_vm2, %v930_v36  ;;  %2971 = vmatmul.msk.bf16.gmra.mxu0 %vm218_vm2, %v2964_v62  ;;  %v1196_v1 = vrot.slane %v1194_v9, 6  ;;  %v1212_v2 = vshll.u32 %v3030_v45, 16  ;;  %v905_v6 = vsel %vm3628_vm8, %v900_v51, %v904_v47  ;;  %v1202_v41 = vrot.slane %v1200_v58, 5 }
  0x70   : > { %v914_v35 = vrot.slane %v913_v10, 4  ;;  %v1205_v62 = vrot.slane %v1203_v59, 6  ;;  %v1211_v54 = vrot.slane %v1209_v60, 5  ;;  %v1218_v12 = vshrl.u32 %v3031_v53, 16 }
  0x71   : > { %v1197_v38 = vor.u32 %v1196_v1, %v1193_v0  ;;  %v1214_v11 = vrot.slane %v1212_v2, 6  ;;  %v1221_v17 = vshll.u32 %v3031_v53, 16  ;;  %v3103_v18 = vrot.slane %v3091_v61, 9  ;;  %v3120_v61 = vld [vmem:[%s3593_s20 + $0x18] sm:$0xe] }
  0x72   : > { %v919_v15 = vsel %vm3628_vm8, %v914_v35, %v918_v52  ;;  %v1206_v16 = vor.u32 %v1205_v62, %v1202_v41  ;;  %v3054_v20 = vor.u32 %v3835_v57, %v3832_v25  ;;  %v1220_v23 = vrot.slane %v1218_v12, 5  ;;  %v3118_v52 = vld [vmem:[%s3593_s20 + $0x10] sm:$0xe]  ;;  %v3119_v25 = vld [vmem:[%s3593_s20 + $0x14] sm:$0x3] }
  0x73   : > { %v1198_v21 = vrot.slane %v1197_v38, 4  ;;  %v1215_v22 = vor.u32 %v1214_v11, %v1211_v54  ;;  %v1223_v24 = vrot.slane %v1221_v17, 6  ;;  %v1571_v26 = vrot.slane %v3092_v3, 5  ;;  %v3095_v54 = vld [vmem:[%s3593_s20 + $0x20] sm:$0xe] }
  0x74   : > { %3039 = vmatmul.msk.bf16.gmra.mxu3 %vm218_vm2, %v1236_v63  ;;  %v3104_v27 = vrot.slane %v3093_v7, 9  ;;  %v1575_v28 = vrot.slane %v3094_v13, 5  ;;  %v927_v30 = vunpack.c.l.b16 %v905_v6  ;;  %v928_v31 = vunpack.c.l.b16 %v919_v15 }
  0x75   : > { %3019 = vmatmul.msk.bf16.gmra.mxu2 %vm218_vm2, %v1048_v46  ;;  %v1216_v32 = vrot.slane %v1215_v22, 4  ;;  %v1393_v34 = vshrl.u32 %v3070_v19, 16  ;;  %v1207_v56 = vsel %vm3644_vm9, %v1198_v21, %v1206_v16  ;;  %v1224_v37 = vor.u32 %v1223_v24, %v1220_v23  ;;  %v3096_v16 = vld [vmem:[%s3593_s20 + $0x24] sm:$0x1]  ;;  %v3097_v22 = vld [vmem:[%s3593_s20 + $0x28] sm:$0xe] }
  0x76   : > { %v1572_v36 = vsel %vm3595_vm3, %v3103_v18, %v1571_v26  ;;  %v1576_v39 = vsel %vm3595_vm3, %v3104_v27, %v1575_v28  ;;  %v1396_v46 = vshll.u32 %v3070_v19, 16  ;;  %v1402_v48 = vshll.u32 %v3071_v33, 16  ;;  %v3098_v28 = vld [vmem:[%s3593_s20 + $0x2c] sm:$0x1] }
  0x77   : > { %v1596_v42 = vunpack.c.l.b16 %v1572_v36  ;;  %v1597_v43 = vunpack.c.l.b16 %v1576_v39  ;;  %v1395_v45 = vrot.slane %v1393_v34, 4  ;;  %v1225_v47 = vsel %vm3644_vm9, %v1216_v32, %v1224_v37  ;;  %v3074_v32 = vld [vmem:[%s3593_s20 + $0x20] sm:$0xf] }
  0x78   : > { %v1407_v50 = vshrl.u32 %v3072_v29, 16  ;;  %v1410_v51 = vshll.u32 %v3072_v29, 16  ;;  %v931_v53 = vpack.c.b16 %v928_v31, %v927_v30  ;;  %v1233_v44 = vunpack.c.l.b16 %v1207_v56 }
  0x79   : > { %v1398_v9 = vrot.slane %v1396_v46, 5  ;;  %v1416_v10 = vshll.u32 %v3073_v40, 16  ;;  %v1234_v57 = vunpack.c.l.b16 %v1225_v47  ;;  %v1602_v58 = vpack.c.b16 %v1597_v43, %v1596_v42  ;;  %v3075_v42 = vld [vmem:[%s3593_s20 + $0x24] sm:$0x1]  ;;  %v3076_v46 = vld [vmem:[%s3593_s20 + $0x28] sm:$0xf] }
  0x7a   : > { %v1409_v59 = vrot.slane %v1407_v50, 4  ;;  %v1412_v60 = vrot.slane %v1410_v51, 5  ;;  %v1404_v0 = vrot.slane %v1402_v48, 5  ;;  %v1675_v2 = vshrl.u32 %v3118_v52, 16  ;;  %v3077_v47 = vld [vmem:[%s3593_s20 + $0x2c] sm:$0x1] }
  0x7b   : > { %v1399_v63 = vor.u32 %v1398_v9, %v1395_v45  ;;  %v1418_v1 = vrot.slane %v1416_v10, 5  ;;  %v1678_v5 = vshll.u32 %v3118_v52, 16  ;;  %v1684_v6 = vshrl.u32 %v3119_v25, 16  ;;  %v3057_v51 = vld [vmem:[%s3593_s20 + $0x20] sm:$0xf] }
  0x7c   : > { %v1413_v3 = vor.u32 %v1412_v60, %v1409_v59  ;;  %v1687_v35 = vshll.u32 %v3119_v25, 16  ;;  %v1677_v62 = vrot.slane %v1675_v2, 5  ;;  %v1693_v7 = vshrl.u32 %v3120_v61, 16  ;;  %v3281_v52 = vld [vmem:[%s3593_s20 + $0x24] sm:$0xf0] }
  0x7d   : > { %v1400_v41 = vrot.slane %v1399_v63, 4  ;;  %v1696_v38 = vshll.u32 %v3120_v61, 16  ;;  %v1680_v12 = vrot.slane %v1678_v5, 6  ;;  %v1686_v13 = vrot.slane %v1684_v6, 5  ;;  %v3123_v6 = vld [vmem:[%s3593_s20 + $0x24] sm:$0x3] }
  0x7e   : > { %v1414_v11 = vrot.slane %v1413_v3, 4  ;;  %v1689_v15 = vrot.slane %v1687_v35, 6  ;;  %v1695_v18 = vrot.slane %v1693_v7, 5  ;;  %v1702_v21 = vshrl.u32 %v3121_v4, 16 }
  0x7f   : > { %2992 = vmatmul.msk.bf16.gmra.mxu1 %vm218_vm2, %v931_v53  ;;  %3067 = vmatmul.msk.bf16.vlgmr.msra.gmra.mxu0 %vm218_vm2, %v3054_v20  ;;  %v1405_v17 = vsel %vm3628_vm8, %v1400_v41, %v1404_v0  ;;  %v1698_v19 = vrot.slane %v1696_v38, 6  ;;  %v1237_v23 = vpack.c.b16 %v1234_v57, %v1233_v44  ;;  %v1681_v26 = vor.u32 %v1680_v12, %v1677_v62  ;;  %v3124_v38 = vld [vmem:[%s3593_s20 + $0x28] sm:$0xe] }
  0x80   : > { %v1419_v24 = vsel %vm3628_vm8, %v1414_v11, %v1418_v1  ;;  %v1690_v27 = vor.u32 %v1689_v15, %v1686_v13  ;;  %v3889_v29 = vunpack.c.l.b16 %v1405_v17  ;;  %v1704_v20 = vrot.slane %v1702_v21, 5  ;;  %v3122_v1 = vld [vmem:[%s3593_s20 + $0x20] sm:$0xe] }
  0x81   : > { %v1699_v30 = vor.u32 %v1698_v19, %v1695_v18  ;;  %v1705_v31 = vshll.u32 %v3121_v4, 16  ;;  %v1682_v33 = vrot.slane %v1681_v26, 4  ;;  %v3105_v34 = vrot.slane %v3095_v54, 9  ;;  %v3099_v26 = vld [vmem:[%s3593_s20 + $0x30] sm:$0xe] }
  0x82   : > { %v1579_v55 = vrot.slane %v3096_v16, 5  ;;  %v3106_v56 = vrot.slane %v3097_v22, 9  ;;  %v3892_v37 = vunpack.c.l.b16 %v1419_v24  ;;  %v1583_v40 = vrot.slane %v3098_v28, 5  ;;  %v3125_v16 = vld [vmem:[%s3593_s20 + $0x2c] sm:$0x3] }
  0x83   : > { %v1700_v36 = vrot.slane %v1699_v30, 4  ;;  %v1707_v39 = vrot.slane %v1705_v31, 6  ;;  %v1691_v43 = vsel %vm3644_vm9, %v1682_v33, %v1690_v27  ;;  %v1421_v48 = vshrl.u32 %v3074_v32, 16 }
  0x84   : > { %3040 = vmatmul.msk.bf16.gmra.mxu3 %vm218_vm2, %v1237_v23  ;;  %v1580_v45 = vsel %vm3595_vm3, %v3105_v34, %v1579_v55  ;;  %v1424_v50 = vshll.u32 %v3074_v32, 16  ;;  %v1785_v44 = vunpack.c.l.b16 %v1691_v43  ;;  %v1584_v9 = vsel %vm3595_vm3, %v3106_v56, %v1583_v40  ;;  %v3101_v55 = vld [vmem:[%s3593_s20 + $0x38] sm:$0xe] }
  0x85   : > { %3115 = vmatmul.msk.bf16.vlgmr.msra.gmra.mxu2 %vm218_vm2, %v1602_v58  ;;  %v1708_v53 = vor.u32 %v1707_v39, %v1704_v20  ;;  %v1598_v10 = vunpack.c.l.b16 %v1580_v45  ;;  %v1599_v25 = vunpack.c.l.b16 %v1584_v9  ;;  %v1423_v57 = vrot.slane %v1421_v48, 4  ;;  %v3100_v20 = vld [vmem:[%s3593_s20 + $0x34] sm:$0x1]  ;;  %v3102_v39 = vld [vmem:[%s3593_s20 + $0x3c] sm:$0x1] }
  0x86   : > { %v1426_v59 = vrot.slane %v1424_v50, 5  ;;  %v1430_v60 = vshll.u32 %v3075_v42, 16  ;;  %v1435_v63 = vshrl.u32 %v3076_v46, 16  ;;  %v1438_v0 = vshll.u32 %v3076_v46, 16  ;;  %v3078_v42 = vld [vmem:[%s3593_s20 + $0x30] sm:$0xf] }
  0x87   : > { %v1709_v61 = vsel %vm3644_vm9, %v1700_v36, %v1708_v53  ;;  %v1444_v58 = vshll.u32 %v3077_v47, 16  ;;  %v3058_v2 = vor.u32 %v3281_v52, %v3057_v51  ;;  %v1485_v35 = vpack.c.b16 %v3892_v37, %v3889_v29  ;;  %v3931_v45 = vld [vmem:[%s3593_s20 + $0x30] sm:$0xf]  ;;  %v3934_v50 = vld [vmem:[%s3593_s20 + $0x34] sm:$0xf0] }
  0x88   : > { %v1786_v3 = vunpack.c.l.b16 %v1709_v61  ;;  %v1427_v4 = vor.u32 %v1426_v59, %v1423_v57  ;;  %v1432_v5 = vrot.slane %v1430_v60, 5  ;;  %v1603_v41 = vpack.c.b16 %v1599_v25, %v1598_v10  ;;  %v3079_v25 = vld [vmem:[%s3593_s20 + $0x34] sm:$0x1]  ;;  %v3080_v61 = vld [vmem:[%s3593_s20 + $0x38] sm:$0xf] }
  0x89   : > { %v1437_v62 = vrot.slane %v1435_v63, 4  ;;  %v1440_v7 = vrot.slane %v1438_v0, 5  ;;  %v1446_v12 = vrot.slane %v1444_v58, 5  ;;  %v1711_v13 = vshrl.u32 %v3122_v1, 16  ;;  %v3081_v63 = vld [vmem:[%s3593_s20 + $0x3c] sm:$0x1] }
  0x8a   : > { %v1791_v54 = vpack.c.b16 %v1786_v3, %v1785_v44  ;;  %v1428_v11 = vrot.slane %v1427_v4, 4  ;;  %v1714_v17 = vshll.u32 %v3122_v1, 16  ;;  %v1720_v18 = vshrl.u32 %v3123_v6, 16 }
  0x8b   : > { %v1441_v15 = vor.u32 %v1440_v7, %v1437_v62  ;;  %v1723_v19 = vshll.u32 %v3123_v6, 16  ;;  %v1713_v22 = vrot.slane %v1711_v13, 5  ;;  %v1729_v23 = vshrl.u32 %v3124_v38, 16  ;;  %v3126_v62 = vld [vmem:[%s3593_s20 + $0x30] sm:$0xe] }
  0x8c   : > { %v1433_v21 = vsel %vm3628_vm8, %v1428_v11, %v1432_v5  ;;  %v1732_v24 = vshll.u32 %v3124_v38, 16  ;;  %v1716_v29 = vrot.slane %v1714_v17, 6  ;;  %v1722_v30 = vrot.slane %v1720_v18, 5  ;;  %v3128_v17 = vld [vmem:[%s3593_s20 + $0x38] sm:$0xe] }
  0x8d   : > { %v1442_v27 = vrot.slane %v1441_v15, 4  ;;  %v3918_v28 = vunpack.c.l.b16 %v1433_v21  ;;  %v1725_v31 = vrot.slane %v1723_v19, 6  ;;  %v1731_v32 = vrot.slane %v1729_v23, 5 }
  0x8e   : > { %v1734_v33 = vrot.slane %v1732_v24, 6  ;;  %v1738_v34 = vshrl.u32 %v3125_v16, 16  ;;  %v1717_v37 = vor.u32 %v1716_v29, %v1713_v22  ;;  %v1741_v36 = vshll.u32 %v3125_v16, 16  ;;  %v3129_v24 = vld [vmem:[%s3593_s20 + $0x3c] sm:$0x3] }
  0x8f   : > { %3088 = vmatmul.msk.bf16.vlgmr.msra.gmra.mxu1 %vm218_vm2, %v1485_v35  ;;  %3068 = vmatmul.msk.bf16.gmra.mxu0 %vm218_vm2, %v3058_v2  ;;  %v1447_v56 = vsel %vm3628_vm8, %v1442_v27, %v1446_v12  ;;  %v3107_v40 = vrot.slane %v3099_v26, 9  ;;  %v1726_v46 = vor.u32 %v1725_v31, %v1722_v30  ;;  %v1587_v53 = vrot.slane %v3100_v20, 5  ;;  %v3127_v12 = vld [vmem:[%s3593_s20 + $0x34] sm:$0x3] }
  0x90   : > { %v3928_v43 = vunpack.c.l.b16 %v1447_v56  ;;  %v1735_v47 = vor.u32 %v1734_v33, %v1731_v32  ;;  %v1740_v48 = vrot.slane %v1738_v34, 5  ;;  %v1718_v51 = vrot.slane %v1717_v37, 4  ;;  %v3189_v32 = vld [vmem:[%s3593_s20 + $0x18] sm:$0xe]  ;;  %v3190_v37 = vld [vmem:[%s3593_s20 + $0x1c] sm:$0x1] }
  0x91   : > { %v1743_v52 = vrot.slane %v1741_v36, 6  ;;  %v3108_v44 = vrot.slane %v3101_v55, 9  ;;  %v1591_v10 = vrot.slane %v3102_v39, 5  ;;  %v1449_v57 = vshrl.u32 %v3078_v42, 16 }
  0x92   : > { %v1736_v9 = vrot.slane %v1735_v47, 4  ;;  %v1727_v59 = vsel %vm3644_vm9, %v1718_v51, %v1726_v46  ;;  %v1452_v0 = vshll.u32 %v3078_v42, 16  ;;  %v3062_v58 = vor.u32 %v3934_v50, %v3931_v45  ;;  %v3191_v45 = vld [vmem:[%s3593_s20 + $0x20] sm:$0xe]  ;;  %v3192_v51 = vld [vmem:[%s3593_s20 + $0x24] sm:$0x1] }
  0x93   : > { %v1744_v60 = vor.u32 %v1743_v52, %v1740_v48  ;;  %v3946_v1 = vsel %vm3595_vm3, %v3107_v40, %v1587_v53  ;;  %v3950_v2 = vsel %vm3595_vm3, %v3108_v44, %v1591_v10  ;;  %v1451_v3 = vrot.slane %v1449_v57, 4  ;;  %v3973_v53 = vld [vmem:[%s3593_s20 + $0x18] sm:$0xf]  ;;  %v3976_v44 = vld [vmem:[%s3593_s20 + $0x1c] sm:$0xf0] }
  0x94   : > { %3136 = vmatmul.msk.bf16.vlgmr.msra.gmra.mxu3 %vm218_vm2, %v1791_v54  ;;  %v1486_v4 = vpack.c.b16 %v3928_v43, %v3918_v28  ;;  %v1454_v6 = vrot.slane %v1452_v0, 5  ;;  %v1458_v35 = vshll.u32 %v3079_v25, 16  ;;  %v1787_v7 = vunpack.c.l.b16 %v1727_v59  ;;  %v3169_v0 = vld [vmem:[%s3593_s20 + $0x1c] sm:$0x1] }
  0x95   : > { %3116 = vmatmul.msk.bf16.gmra.mxu2 %vm218_vm2, %v1603_v41  ;;  %v1745_v5 = vsel %vm3644_vm9, %v1736_v9, %v1744_v60  ;;  %v1463_v38 = vshrl.u32 %v3080_v61, 16  ;;  %v1466_v54 = vshll.u32 %v3080_v61, 16  ;;  %v1472_v11 = vshll.u32 %v3081_v63, 16  ;;  %v3168_v63 = vld [vmem:[%s3593_s20 + $0x18] sm:$0xf] }
  0x96   : > { %v1788_v13 = vunpack.c.l.b16 %v1745_v5  ;;  %v1600_v15 = vunpack.c.l.b16 %v3946_v1  ;;  %v1601_v41 = vunpack.c.l.b16 %v3950_v2  ;;  %v1455_v16 = vor.u32 %v1454_v6, %v1451_v3  ;;  %v3170_v6 = vld [vmem:[%s3593_s20 + $0x20] sm:$0xf] }
  0x97   : > { %v1460_v18 = vrot.slane %v1458_v35, 5  ;;  %v1465_v19 = vrot.slane %v1463_v38, 4  ;;  %v1468_v21 = vrot.slane %v1466_v54, 5  ;;  %v1474_v22 = vrot.slane %v1472_v11, 5 }
  0x98   : > { %v1456_v23 = vrot.slane %v1455_v16, 4  ;;  %v1747_v26 = vshrl.u32 %v3126_v62, 16  ;;  %v1750_v27 = vshll.u32 %v3126_v62, 16  ;;  %v1756_v28 = vshrl.u32 %v3127_v12, 16  ;;  %v3171_v62 = vld [vmem:[%s3593_s20 + $0x24] sm:$0x1] }
  0x99   : > { %v1469_v29 = vor.u32 %v1468_v21, %v1465_v19  ;;  %v1759_v30 = vshll.u32 %v3127_v12, 16  ;;  %v1765_v20 = vshrl.u32 %v3128_v17, 16  ;;  %v1768_v31 = vshll.u32 %v3128_v17, 16 }
  0x9a   : > { %v1792_v33 = vpack.c.b16 %v1788_v13, %v1787_v7  ;;  %v1749_v34 = vrot.slane %v1747_v26, 5  ;;  %v1752_v55 = vrot.slane %v1750_v27, 6  ;;  %v1758_v56 = vrot.slane %v1756_v28, 5  ;;  %v3217_v28 = vld [vmem:[%s3593_s20 + $0x1c] sm:$0x3] }
  0x9b   : > { %v1461_v39 = vsel %vm3628_vm8, %v1456_v23, %v1460_v18  ;;  %v1470_v40 = vrot.slane %v1469_v29, 4  ;;  %v1761_v42 = vrot.slane %v1759_v30, 6  ;;  %v1767_v43 = vrot.slane %v1765_v20, 5  ;;  %v3218_v29 = vld [vmem:[%s3593_s20 + $0x20] sm:$0xe] }
  0x9c   : > { %v237_v36 = vpop.f32.mrf.mxu0  ;;  %v1753_v46 = vor.u32 %v1752_v55, %v1749_v34  ;;  %v1770_v47 = vrot.slane %v1768_v31, 6  ;;  %v1774_v48 = vshrl.u32 %v3129_v24, 16  ;;  %v1777_v50 = vshll.u32 %v3129_v24, 16 }
  0x9d   : > { %253 = vst.msk [vmem:[#allocation2] sm:$0xff] %vm252_vm10, %v237_v36  ;;  %v1475_v52 = vsel %vm3628_vm8, %v1470_v40, %v1474_v22  ;;  %v1762_v9 = vor.u32 %v1761_v42, %v1758_v56  ;;  %v3201_v10 = vrot.slane %v3189_v32, 9  ;;  %v2127_v25 = vrot.slane %v3190_v37, 5  ;;  %v3216_v22 = vld [vmem:[%s3593_s20 + $0x18] sm:$0xe] }
  0x9e   : > { %v3980_v57 = vunpack.c.l.b16 %v1461_v39  ;;  %v1754_v59 = vrot.slane %v1753_v46, 4  ;;  %v1771_v60 = vor.u32 %v1770_v47, %v1767_v43  ;;  %v1776_v61 = vrot.slane %v1774_v48, 5  ;;  %v3219_v39 = vld [vmem:[%s3593_s20 + $0x24] sm:$0x3] }
  0x9f   : > { %3089 = vmatmul.msk.bf16.gmra.mxu1 %vm218_vm2, %v1486_v4  ;;  %3069 = vmatmul.msk.bf16.gmra.mxu0 %vm218_vm2, %v3062_v58  ;;  %v3984_v1 = vunpack.c.l.b16 %v1475_v52  ;;  %v1779_v2 = vrot.slane %v1777_v50, 6  ;;  %v3202_v3 = vrot.slane %v3191_v45, 9  ;;  %v2131_v5 = vrot.slane %v3192_v51, 5 }
  0xa0   : > { %v1604_v35 = vpack.c.b16 %v1601_v41, %v1600_v15  ;;  %v3989_v4 = vsel %vm3644_vm9, %v1754_v59, %v1762_v9  ;;  %v3993_v58 = vsel %vm3595_vm3, %v3201_v10, %v2127_v25  ;;  %v1772_v7 = vrot.slane %v1771_v60, 4 }
  0xa1   : > { %v1780_v38 = vor.u32 %v1779_v2, %v1776_v61  ;;  %v3998_v54 = vsel %vm3595_vm3, %v3202_v3, %v2131_v5  ;;  %v1949_v11 = vshrl.u32 %v3168_v63, 16  ;;  %v3152_v12 = vor.u32 %v3976_v44, %v3973_v53 }
  0xa2   : > { %v1952_v13 = vshll.u32 %v3168_v63, 16  ;;  %v1958_v15 = vshll.u32 %v3169_v0, 16  ;;  %v1963_v41 = vshrl.u32 %v3170_v6, 16  ;;  %v1487_v17 = vpack.c.b16 %v3984_v1, %v3980_v57 }
  0xa3   : > { %v1951_v18 = vrot.slane %v1949_v11, 4  ;;  %v1966_v19 = vshll.u32 %v3170_v6, 16  ;;  %v1972_v21 = vshll.u32 %v3171_v62, 16  ;;  %v1789_v23 = vunpack.c.l.b16 %v3989_v4  ;;  %v3193_v4 = vld [vmem:[%s3593_s20 + $0x28] sm:$0xe] }
  0xa4   : > { %3137 = vmatmul.msk.bf16.gmra.mxu3 %vm218_vm2, %v1792_v33  ;;  %v239_v16 = vpop.f32.mrf.mxu0  ;;  %v2152_v24 = vunpack.c.l.b16 %v3993_v58  ;;  %v2153_v26 = vunpack.c.l.b16 %v3998_v54  ;;  %v1954_v27 = vrot.slane %v1952_v13, 5  ;;  %v1781_v30 = vsel %vm3644_vm9, %v1772_v7, %v1780_v38  ;;  %v409_v61 = vld [vmem:[#allocation2] sm:$0xff]  ;;  %v3195_v38 = vld [vmem:[%s3593_s20 + $0x30] sm:$0xe] }
  0xa5   : > { %254 = vst.msk [vmem:[#allocation2 + $0x8] sm:$0xff] %vm252_vm10, %v239_v16  ;;  %3117 = vmatmul.msk.bf16.gmra.mxu2 %vm218_vm2, %v1604_v35  ;;  %v1960_v20 = vrot.slane %v1958_v15, 5  ;;  %v1965_v31 = vrot.slane %v1963_v41, 4  ;;  %v1968_v32 = vrot.slane %v1966_v19, 5  ;;  %v1974_v34 = vrot.slane %v1972_v21, 5 }
  0xa6   : > { %v1955_v33 = vor.u32 %v1954_v27, %v1951_v18  ;;  %v2231_v55 = vshrl.u32 %v3216_v22, 16  ;;  %v2234_v56 = vshll.u32 %v3216_v22, 16  ;;  %v2240_v40 = vshrl.u32 %v3217_v28, 16  ;;  %v3194_v58 = vld [vmem:[%s3593_s20 + $0x2c] sm:$0x1] }
  0xa7   : > { %v1969_v36 = vor.u32 %v1968_v32, %v1965_v31  ;;  %v2243_v42 = vshll.u32 %v3217_v28, 16  ;;  %v2249_v43 = vshrl.u32 %v3218_v29, 16  ;;  %v2252_v48 = vshll.u32 %v3218_v29, 16  ;;  %v3172_v54 = vld [vmem:[%s3593_s20 + $0x28] sm:$0xf] }
  0xa8   : > { %v4015_v37 = vpop.f32.mrf.mxu2  ;;  %v1956_v45 = vrot.slane %v1955_v33, 4  ;;  %v2233_v46 = vrot.slane %v2231_v55, 5  ;;  %v2236_v47 = vrot.slane %v2234_v56, 6  ;;  %v2242_v51 = vrot.slane %v2240_v40, 5  ;;  %v3196_v41 = vld [vmem:[%s3593_s20 + $0x34] sm:$0x1] }
  0xa9   : > { %v1970_v50 = vrot.slane %v1969_v36, 4  ;;  %v2245_v52 = vrot.slane %v2243_v42, 6  ;;  %v2251_v9 = vrot.slane %v2249_v43, 5  ;;  %v1790_v10 = vunpack.c.l.b16 %v1781_v30  ;;  %v3174_v16 = vld [vmem:[%s3593_s20 + $0x30] sm:$0xf] }
  0xaa   : > { %v2237_v25 = vor.u32 %v2236_v47, %v2233_v46  ;;  %v2254_v57 = vrot.slane %v2252_v48, 6  ;;  %v2258_v59 = vshrl.u32 %v3219_v39, 16  ;;  %v1961_v0 = vsel %vm3628_vm8, %v1956_v45, %v1960_v20  ;;  %v4042_v21 = vld [vmem:[%s3593_s20 + $0x28] sm:$0xf]  ;;  %v3173_v31 = vld [vmem:[%s3593_s20 + $0x2c] sm:$0x1] }
  0xab   : > { %v2246_v1 = vor.u32 %v2245_v52, %v2242_v51  ;;  %v2261_v2 = vshll.u32 %v3219_v39, 16  ;;  %v1975_v5 = vsel %vm3628_vm8, %v1970_v50, %v1974_v34  ;;  %v1793_v11 = vpack.c.b16 %v1790_v10, %v1789_v23  ;;  %v3220_v20 = vld [vmem:[%s3593_s20 + $0x28] sm:$0xe]  ;;  %v3175_v32 = vld [vmem:[%s3593_s20 + $0x34] sm:$0x1] }
  0xac   : > { %v394_v60 = vpop.f32.mrf.mxu1  ;;  %v242_v63 = vpop.f32.mrf.mxu0  ;;  %v2238_v6 = vrot.slane %v2237_v25, 4  ;;  %v2255_v35 = vor.u32 %v2254_v57, %v2251_v9  ;;  %v2260_v62 = vrot.slane %v2258_v59, 5  ;;  %v2158_v13 = vpack.c.b16 %v2153_v26, %v2152_v24  ;;  %v410_v56 = vld [vmem:[#allocation2 + $0x8] sm:$0xff]  ;;  %v3221_v48 = vld [vmem:[%s3593_s20 + $0x2c] sm:$0x3] }
  0xad   : > { %v415_v3 = vadd.f32 %v409_v61, %v394_v60  ;;  %255 = vst.msk [vmem:[#allocation2 + $0x10] sm:$0xff] %vm252_vm10, %v242_v63  ;;  %v2263_v7 = vrot.slane %v2261_v2, 6  ;;  %v4033_v15 = vunpack.c.l.b16 %v1961_v0  ;;  %v4039_v19 = vunpack.c.l.b16 %v1975_v5  ;;  %v3222_v50 = vld [vmem:[%s3593_s20 + $0x30] sm:$0xe]  ;;  %v3223_v0 = vld [vmem:[%s3593_s20 + $0x34] sm:$0x3] }
  0xae   : > { %v4046_v53 = vsel %vm3644_vm9, %v2238_v6, %v2246_v1  ;;  %v3203_v44 = vrot.slane %v3193_v4, 9  ;;  %v2256_v22 = vrot.slane %v2255_v35, 4  ;;  %v3204_v23 = vrot.slane %v3195_v38, 9 }
  0xaf   : > { %421 = vst.msk [vmem:[#allocation2] sm:$0xff] %vm252_vm10, %v415_v3  ;;  %3090 = vmatmul.msk.bf16.gmra.mxu1 %vm218_vm2, %v1487_v17  ;;  %3165 = vmatmul.msk.bf16.vlgmr.msrb.gmra.mxu0 %vm218_vm2, %v3152_v12  ;;  %v2135_v12 = vrot.slane %v3194_v58, 5  ;;  %v4049_v17 = vld [vmem:[%s3593_s20 + $0x2c] sm:$0xf0]  ;;  %v1977_v24 = vshrl.u32 %v3172_v54, 16  ;;  %v1980_v26 = vshll.u32 %v3172_v54, 16  ;;  %v2264_v27 = vor.u32 %v2263_v7, %v2260_v62 }
  0xb0   : > { %v4037_v18 = vpop.f32.mrf.mxu2  ;;  %v2139_v28 = vrot.slane %v3196_v41, 5  ;;  %v1991_v29 = vshrl.u32 %v3174_v16, 16  ;;  %v1994_v30 = vshll.u32 %v3174_v16, 16  ;;  %v2041_v39 = vpack.c.b16 %v4039_v19, %v4033_v15 }
  0xb1   : > { %v1979_v33 = vrot.slane %v1977_v24, 4  ;;  %v1982_v34 = vrot.slane %v1980_v26, 5  ;;  %v3156_v40 = vor.u32 %v4049_v17, %v4042_v21  ;;  %v2341_v46 = vunpack.c.l.b16 %v4046_v53  ;;  %v3197_v26 = vld [vmem:[%s3593_s20 + $0x38] sm:$0xe] }
  0xb2   : > { %v1993_v42 = vrot.slane %v1991_v29, 4  ;;  %v1996_v43 = vrot.slane %v1994_v30, 5  ;;  %v2136_v47 = vsel %vm3595_vm3, %v3203_v44, %v2135_v12  ;;  %v2267_v51 = vshrl.u32 %v3220_v20, 16  ;;  %v3199_v29 = vld [vmem:[%s3593_s20 + $0x40] sm:$0xe] }
  0xb3   : > { %v2265_v9 = vsel %vm3644_vm9, %v2256_v22, %v2264_v27  ;;  %v2140_v10 = vsel %vm3595_vm3, %v3204_v23, %v2139_v28  ;;  %v1986_v25 = vshll.u32 %v3173_v31, 16  ;;  %v2000_v57 = vshll.u32 %v3175_v32, 16  ;;  %v3198_v28 = vld [vmem:[%s3593_s20 + $0x3c] sm:$0x1] }
  0xb4   : > { %v396_v55 = vpop.f32.mrf.mxu1  ;;  %3138 = vmatmul.msk.bf16.gmra.mxu3 %vm218_vm2, %v1793_v11  ;;  %v244_v36 = vpop.f32.mrf.mxu0  ;;  %v1983_v61 = vor.u32 %v1982_v34, %v1979_v33  ;;  %v1997_v63 = vor.u32 %v1996_v43, %v1993_v42  ;;  %v2270_v1 = vshll.u32 %v3220_v20, 16  ;;  %v2269_v3 = vrot.slane %v2267_v51, 5  ;;  %v411_v53 = vld [vmem:[#allocation2 + $0x10] sm:$0xff]  ;;  %v3200_v34 = vld [vmem:[%s3593_s20 + $0x44] sm:$0x1] }
  0xb5   : > { %v416_v45 = vadd.f32 %v410_v56, %v396_v55  ;;  %256 = vst.msk [vmem:[#allocation2 + $0x18] sm:$0xff] %vm252_vm10, %v244_v36  ;;  %3213 = vmatmul.msk.bf16.vlgmr.msrb.gmra.mxu2 %vm218_vm2, %v2158_v13  ;;  %v2276_v5 = vshrl.u32 %v3221_v48, 16  ;;  %v2279_v6 = vshll.u32 %v3221_v48, 16  ;;  %v2285_v35 = vshrl.u32 %v3222_v50, 16  ;;  %v3176_v43 = vld [vmem:[%s3593_s20 + $0x38] sm:$0xf] }
  0xb6   : > { %v529_v52 = vld [vmem:[#allocation2] sm:$0xff]  ;;  %v2342_v4 = vunpack.c.l.b16 %v2265_v9  ;;  %v2154_v58 = vunpack.c.l.b16 %v2136_v47  ;;  %v2272_v62 = vrot.slane %v2270_v1, 6  ;;  %v2288_v7 = vshll.u32 %v3222_v50, 16  ;;  %v3178_v50 = vld [vmem:[%s3593_s20 + $0x40] sm:$0xf] }
  0xb7   : > { %v535_v59 = vadd.f32 %v529_v52, %v4015_v37  ;;  %422 = vst.msk [vmem:[#allocation2 + $0x8] sm:$0xff] %vm252_vm10, %v416_v45  ;;  %v706_v60 = vpop.f32.mrf.mxu3  ;;  %v2155_v37 = vunpack.c.l.b16 %v2140_v10  ;;  %v1988_v38 = vrot.slane %v1986_v25, 5  ;;  %v2287_v54 = vrot.slane %v2285_v35, 5  ;;  %v4102_v1 = vld [vmem:[%s3593_s20 + $0x38] sm:$0xf] }
  0xb8   : > { %v4073_v2 = vpop.f32.mrf.mxu2  ;;  %v2294_v11 = vshrl.u32 %v3223_v0, 16  ;;  %v1984_v13 = vrot.slane %v1983_v61, 4  ;;  %v1998_v15 = vrot.slane %v1997_v63, 4  ;;  %v2002_v41 = vrot.slane %v2000_v57, 5  ;;  %v3290_v35 = vld [vmem:[%s3593_s20 + $0x3c] sm:$0xf0] }
  0xb9   : > { %541 = vst.msk [vmem:[#allocation2] sm:$0xff] %vm252_vm10, %v535_v59  ;;  %v2290_v16 = vrot.slane %v2288_v7, 6  ;;  %v2273_v12 = vor.u32 %v2272_v62, %v2269_v3  ;;  %v2278_v22 = vrot.slane %v2276_v5, 5  ;;  %v2281_v23 = vrot.slane %v2279_v6, 6  ;;  %v3224_v3 = vld [vmem:[%s3593_s20 + $0x38] sm:$0xe] }
  0xba   : > { %v2297_v24 = vshll.u32 %v3223_v0, 16  ;;  %v2347_v20 = vpack.c.b16 %v2342_v4, %v2341_v46  ;;  %v2296_v32 = vrot.slane %v2294_v11, 5  ;;  %v2159_v36 = vpack.c.b16 %v2155_v37, %v2154_v58  ;;  %v3226_v62 = vld [vmem:[%s3593_s20 + $0x40] sm:$0xe] }
  0xbb   : > { %v2291_v31 = vor.u32 %v2290_v16, %v2287_v54  ;;  %v1989_v42 = vsel %vm3628_vm8, %v1984_v13, %v1988_v38  ;;  %v2274_v47 = vrot.slane %v2273_v12, 4  ;;  %v2282_v48 = vor.u32 %v2281_v23, %v2278_v22  ;;  %v3177_v54 = vld [vmem:[%s3593_s20 + $0x3c] sm:$0x1]  ;;  %v3179_v16 = vld [vmem:[%s3593_s20 + $0x44] sm:$0x1] }
  0xbc   : > { %v399_v19 = vpop.f32.mrf.mxu1  ;;  %v247_v44 = vpop.f32.mrf.mxu0  ;;  %v2299_v33 = vrot.slane %v2297_v24, 6  ;;  %v2143_v17 = vrot.slane %v3198_v28, 5  ;;  %v2147_v51 = vrot.slane %v3200_v34, 5  ;;  %v2005_v10 = vshrl.u32 %v3176_v43, 16  ;;  %v412_v63 = vld [vmem:[#allocation2 + $0x18] sm:$0xff] }
  0xbd   : > { %v417_v27 = vadd.f32 %v411_v53, %v399_v19  ;;  %257 = vst.msk [vmem:[#allocation2 + $0x20] sm:$0xff] %vm252_vm10, %v247_v44  ;;  %v2292_v52 = vrot.slane %v2291_v31, 4  ;;  %v2008_v25 = vshll.u32 %v3176_v43, 16  ;;  %v2019_v57 = vshrl.u32 %v3178_v50, 16  ;;  %v3227_v34 = vld [vmem:[%s3593_s20 + $0x44] sm:$0x3] }
  0xbe   : > { %v530_v30 = vld [vmem:[#allocation2 + $0x8] sm:$0xff]  ;;  %v2300_v9 = vor.u32 %v2299_v33, %v2296_v32  ;;  %v2022_v59 = vshll.u32 %v3178_v50, 16  ;;  %v4099_v0 = vunpack.c.l.b16 %v1989_v42  ;;  %v2283_v4 = vsel %vm3644_vm9, %v2274_v47, %v2282_v48  ;;  %s2887_s20 = sshll.u32 %s3450_s15, 2  ;;  %s2777_s15 = scalar_lea.sflag [#allocation4], %s175_s9 }
  0xbf   : > { %v536_v55 = vadd.f32 %v530_v30, %v4037_v18  ;;  %423 = vst.msk [vmem:[#allocation2 + $0x10] sm:$0xff] %vm252_vm10, %v417_v27  ;;  %3186 = vmatmul.msk.bf16.vlgmr.msrb.gmra.mxu1 %vm218_vm2, %v2041_v39  ;;  %v708_v56 = vpop.f32.mrf.mxu3  ;;  %3166 = vmatmul.msk.bf16.gmra.mxu0 %vm218_vm2, %v3156_v40  ;;  %v2003_v18 = vsel %vm3628_vm8, %v1998_v15, %v2002_v41  ;;  %v3205_v39 = vrot.slane %v3197_v26, 9  ;;  %v3206_v40 = vrot.slane %v3199_v29, 9  ;;  %s2888_s28 = sadd.s32 4294967295, %s2887_s20  ;;  %s2789_s20 = scalar_lea.hbm %s4416_s3, %s3259_s21 }
  0xc0   : > { %v721_v45 = vld [vmem:[#allocation2] sm:$0xff]  ;;  %v4091_v46 = vpop.f32.mrf.mxu2  ;;  %v2038_v6 = vunpack.c.l.b16 %v2003_v18  ;;  %v2301_v37 = vsel %vm3644_vm9, %v2292_v52, %v2300_v9  ;;  %v2007_v11 = vrot.slane %v2005_v10, 4  ;;  %v2010_v13 = vrot.slane %v2008_v25, 5  ;;  %s2793_s4 = sshll.u32 %s2789_s20, 4  ;;  %s2794_s4 = int_to_ptr.hbm [resolvable:$true] %s2793_s4 }
  0xc1   : > { %542 = vst.msk [vmem:[#allocation2 + $0x8] sm:$0xff] %vm252_vm10, %v536_v55  ;;  %v727_v21 = vadd.f32 %v721_v45, %v706_v60  ;;  %v2144_v58 = vsel %vm3595_vm3, %v3205_v39, %v2143_v17  ;;  %v2148_v38 = vsel %vm3595_vm3, %v3206_v40, %v2147_v51  ;;  %v2021_v19 = vrot.slane %v2019_v57, 4  ;;  %s3386_s16 = sshra.s32 %s2794_s4, 4  ;;  %s3387_s16 = int_to_ptr.hbm [resolvable:$true] %s3386_s16 }
  0xc2   : > { %v2024_v53 = vrot.slane %v2022_v59, 5  ;;  %v2303_v44 = vshrl.u32 %v3224_v3, 16  ;;  %v3160_v23 = vor.u32 %v3290_v35, %v4102_v1  ;;  %v2306_v24 = vshll.u32 %v3224_v3, 16  ;;  %p3393_p2 = scmp.lt.s32.totalorder %s3387_s16, %s4416_s3 }
  0xc3   : > { %733 = vst.msk [vmem:[#allocation2] sm:$0xff] %vm252_vm10, %v727_v21  ;;  %v2321_v26 = vshrl.u32 %v3226_v62, 16  ;;  %v2324_v27 = vshll.u32 %v3226_v62, 16  ;;  %v2042_v28 = vpack.c.b16 %v2038_v6, %v4099_v0  ;;  %v2343_v29 = vunpack.c.l.b16 %v2283_v4 }
  0xc4   : > { %v401_v61 = vpop.f32.mrf.mxu1  ;;  %3234 = vmatmul.msk.bf16.vlgmr.msrb.gmra.mxu3 %vm218_vm2, %v2347_v20  ;;  %v249_v60 = vpop.f32.mrf.mxu0  ;;  %v2156_v30 = vunpack.c.l.b16 %v2144_v58  ;;  %v2344_v20 = vunpack.c.l.b16 %v2301_v37  ;;  %v2157_v31 = vunpack.c.l.b16 %v2148_v38  ;;  %v2014_v32 = vshll.u32 %v3177_v54, 16  ;;  %v413_v18 = vld [vmem:[#allocation2 + $0x20] sm:$0xff] }
  0xc5   : > { %v418_v5 = vadd.f32 %v412_v63, %v401_v61  ;;  %258 = vst.msk [vmem:[#allocation2 + $0x28] sm:$0xff] %vm252_vm10, %v249_v60  ;;  %3214 = vmatmul.msk.bf16.gmra.mxu2 %vm218_vm2, %v2159_v36  ;;  %v2028_v33 = vshll.u32 %v3179_v16, 16  ;;  %v2011_v55 = vor.u32 %v2010_v13, %v2007_v11  ;;  %v2025_v36 = vor.u32 %v2024_v53, %v2021_v19 }
  0xc6   : > { %v531_v7 = vld [vmem:[#allocation2 + $0x10] sm:$0xff]  ;;  %v2305_v42 = vrot.slane %v2303_v44, 5  ;;  %v2312_v43 = vshrl.u32 %v3225_v8, 16  ;;  %v2315_v39 = vshll.u32 %v3225_v8, 16  ;;  %v2323_v50 = vrot.slane %v2321_v26, 5 }
  0xc7   : > { %v537_v15 = vadd.f32 %v531_v7, %v4073_v2  ;;  %424 = vst.msk [vmem:[#allocation2 + $0x18] sm:$0xff] %vm252_vm10, %v418_v5  ;;  %v711_v41 = vpop.f32.mrf.mxu3  ;;  %v2326_v21 = vrot.slane %v2324_v27, 6  ;;  %v2330_v51 = vshrl.u32 %v3227_v34, 16  ;;  %v2333_v52 = vshll.u32 %v3227_v34, 16 }
  0xc8   : > { %v722_v12 = vld [vmem:[#allocation2 + $0x8] sm:$0xff]  ;;  %v4121_v22 = vpop.f32.mrf.mxu2  ;;  %v2160_v10 = vpack.c.b16 %v2157_v31, %v2156_v30  ;;  %v2016_v25 = vrot.slane %v2014_v32, 5  ;;  %v2348_v61 = vpack.c.b16 %v2344_v20, %v2343_v29  ;;  %v2012_v63 = vrot.slane %v2011_v55, 4 }
  0xc9   : > { %543 = vst.msk [vmem:[#allocation2 + $0x10] sm:$0xff] %vm252_vm10, %v537_v15  ;;  %v728_v2 = vadd.f32 %v722_v12, %v708_v56  ;;  %v2308_v56 = vrot.slane %v2306_v24, 6  ;;  %v2030_v60 = vrot.slane %v2028_v33, 5  ;;  %v2026_v3 = vrot.slane %v2025_v36, 4 }
  0xca   : > { %v806_v48 = vld [vmem:[#allocation2] sm:$0xff]  ;;  %v2314_v6 = vrot.slane %v2312_v43, 5  ;;  %v2317_v35 = vrot.slane %v2315_v39, 6  ;;  %v2327_v4 = vor.u32 %v2326_v21, %v2323_v50  ;;  %v2332_v58 = vrot.slane %v2330_v51, 5 }
  0xcb   : > { %734 = vst.msk [vmem:[#allocation2 + $0x8] sm:$0xff] %vm252_vm10, %v728_v2  ;;  %v2309_v5 = vor.u32 %v2308_v56, %v2305_v42  ;;  %v2335_v62 = vrot.slane %v2333_v52, 6  ;;  %v2017_v11 = vsel %vm3628_vm8, %v2012_v63, %v2016_v25  ;;  %v2031_v13 = vsel %vm3628_vm8, %v2026_v3, %v2030_v60 }
  0xcc   : > { %v404_v45 = vpop.f32.mrf.mxu1  ;;  %v791_v47 = vpop.f32.mrf.mxu0  ;;  %v414_v37 = vld [vmem:[#allocation2 + $0x28] sm:$0xff]  ;;  %v2318_v16 = vor.u32 %v2317_v35, %v2314_v6  ;;  %v2328_v53 = vrot.slane %v2327_v4, 4  ;;  %v2039_v24 = vunpack.c.l.b16 %v2017_v11  ;;  %v2040_v26 = vunpack.c.l.b16 %v2031_v13 }
  0xcd   : > { %v419_v17 = vadd.f32 %v413_v18, %v404_v45  ;;  %v812_v40 = vadd.f32 %v806_v48, %v791_v47  ;;  %v2310_v15 = vrot.slane %v2309_v5, 4  ;;  %v2336_v44 = vor.u32 %v2335_v62, %v2332_v58 }
  0xce   : > { %v532_v9 = vld [vmem:[#allocation2 + $0x18] sm:$0xff]  ;;  %vm2513_vm3 = vcmask 1043459  }
  0xcf   : > { %v538_v57 = vadd.f32 %v532_v9, %v4091_v46  ;;  %425 = vst.msk [vmem:[#allocation2 + $0x20] sm:$0xff] %vm252_vm10, %v419_v17  ;;  %3187 = vmatmul.msk.bf16.gmra.mxu1 %vm218_vm2, %v2042_v28  ;;  %v713_v59 = vpop.f32.mrf.mxu3  ;;  %3167 = vmatmul.msk.bf16.gmra.mxu0 %vm218_vm2, %v3160_v23  ;;  %v2319_v28 = vsel %vm3644_vm9, %v2310_v15, %v2318_v16 }
  0xd0   : > { %v723_v0 = vld [vmem:[#allocation2 + $0x10] sm:$0xff]  ;;  %818 = vst.msk [vmem:[#allocation2] sm:$0xff] %vm252_vm10, %v812_v40  ;;  %v526_v1 = vpop.f32.mrf.mxu2  ;;  %v2337_v29 = vsel %vm3644_vm9, %v2328_v53, %v2336_v44  ;;  %v2345_v33 = vunpack.c.l.b16 %v2319_v28 }
  0xd1   : > { %544 = vst.msk [vmem:[#allocation2 + $0x18] sm:$0xff] %vm252_vm10, %v538_v57  ;;  %v729_v46 = vadd.f32 %v723_v0, %v711_v41  ;;  %v2346_v34 = vunpack.c.l.b16 %v2337_v29 }
  0xd2   : > { %v807_v54 = vld [vmem:[#allocation2 + $0x8] sm:$0xff] }
  0xd3   : > { %735 = vst.msk [vmem:[#allocation2 + $0x10] sm:$0xff] %vm252_vm10, %v729_v46  ;;  %v2349_v18 = vpack.c.b16 %v2346_v34, %v2345_v33 }
  0xd4   : > { %v406_v7 = vpop.f32.mrf.mxu1  ;;  %3235 = vmatmul.msk.bf16.gmra.mxu3 %vm218_vm2, %v2348_v61  ;;  %v793_v38 = vpop.f32.mrf.mxu0 }
  0xd5   : > { %v420_v41 = vadd.f32 %v414_v37, %v406_v7  ;;  %v813_v19 = vadd.f32 %v807_v54, %v793_v38  ;;  %3215 = vmatmul.msk.bf16.gmra.mxu2 %vm218_vm2, %v2160_v10 }
  0xd6   : > { %v533_v12 = vld [vmem:[#allocation2 + $0x20] sm:$0xff] }
  0xd7   : > { %v539_v23 = vadd.f32 %v533_v12, %v4121_v22  ;;  %426 = vst.msk [vmem:[#allocation2 + $0x28] sm:$0xff] %vm252_vm10, %v420_v41  ;;  %v716_v8 = vpop.f32.mrf.mxu3  ;;  %v971_v30 = vld [vmem:[#allocation2] sm:$0xff]  ;;  %v2043_v22 = vpack.c.b16 %v2040_v26, %v2039_v24 }
  0xd8   : > { %v724_v27 = vld [vmem:[#allocation2 + $0x18] sm:$0xff]  ;;  %819 = vst.msk [vmem:[#allocation2 + $0x8] sm:$0xff] %vm252_vm10, %v813_v19  ;;  %v1073_v49 = vpop.f32.mrf.mxu2 }
  0xd9   : > { %545 = vst.msk [vmem:[#allocation2 + $0x20] sm:$0xff] %vm252_vm10, %v539_v23  ;;  %v730_v2 = vadd.f32 %v724_v27, %v713_v59 }
  0xda   : > { %v808_v32 = vld [vmem:[#allocation2 + $0x10] sm:$0xff] }
  0xdb   : > { %736 = vst.msk [vmem:[#allocation2 + $0x18] sm:$0xff] %vm252_vm10, %v730_v2 }
  0xdc   : > { %v956_v20 = vpop.f32.mrf.mxu1  ;;  %v796_v31 = vpop.f32.mrf.mxu0 }
  0xdd   : > { %v977_v55 = vadd.f32 %v971_v30, %v956_v20  ;;  %v814_v36 = vadd.f32 %v808_v32, %v796_v31 }
  0xde   : > { %v534_v42 = vld [vmem:[#allocation2 + $0x28] sm:$0xff] }
  0xdf   : > { %v540_v43 = vadd.f32 %v534_v42, %v526_v1  ;;  %983 = vst.msk [vmem:[#allocation2] sm:$0xff] %vm252_vm10, %v977_v55  ;;  %3188 = vmatmul.msk.bf16.gmra.mxu1 %vm218_vm2, %v2043_v22  ;;  %v718_v45 = vpop.f32.mrf.mxu3  ;;  %v972_v56 = vld [vmem:[#allocation2 + $0x8] sm:$0xff] }
  0xe0   : > { %v725_v14 = vld [vmem:[#allocation2 + $0x20] sm:$0xff]  ;;  %820 = vst.msk [vmem:[#allocation2 + $0x10] sm:$0xff] %vm252_vm10, %v814_v36  ;;  %v1075_v47 = vpop.f32.mrf.mxu2 }
  0xe1   : > { %546 = vst.msk [vmem:[#allocation2 + $0x28] sm:$0xff] %vm252_vm10, %v540_v43  ;;  %v731_v48 = vadd.f32 %v725_v14, %v716_v8 }
  0xe2   : > { %v809_v21 = vld [vmem:[#allocation2 + $0x18] sm:$0xff] }
  0xe3   : > { %737 = vst.msk [vmem:[#allocation2 + $0x20] sm:$0xff] %vm252_vm10, %v731_v48 }
  0xe4   : > { %v958_v39 = vpop.f32.mrf.mxu1  ;;  %3236 = vmatmul.msk.bf16.gmra.mxu3 %vm218_vm2, %v2349_v18  ;;  %v798_v50 = vpop.f32.mrf.mxu0 }
  0xe5   : > { %v978_v17 = vadd.f32 %v972_v56, %v958_v39  ;;  %v815_v40 = vadd.f32 %v809_v21, %v798_v50 }
  0xe6   : > { %v1088_v51 = vld [vmem:[#allocation2] sm:$0xff] }
  0xe7   : > { %v1094_v52 = vadd.f32 %v1088_v51, %v1073_v49  ;;  %984 = vst.msk [vmem:[#allocation2 + $0x8] sm:$0xff] %vm252_vm10, %v978_v17  ;;  %v1262_v9 = vpop.f32.mrf.mxu3  ;;  %v973_v59 = vld [vmem:[#allocation2 + $0x10] sm:$0xff] }
  0xe8   : > { %v726_v10 = vld [vmem:[#allocation2 + $0x28] sm:$0xff]  ;;  %821 = vst.msk [vmem:[#allocation2 + $0x18] sm:$0xff] %vm252_vm10, %v815_v40  ;;  %v1078_v25 = vpop.f32.mrf.mxu2 }
  0xe9   : > { %1100 = vst.msk [vmem:[#allocation2] sm:$0xff] %vm252_vm10, %v1094_v52  ;;  %v732_v57 = vadd.f32 %v726_v10, %v718_v45 }
  0xea   : > { %v810_v60 = vld [vmem:[#allocation2 + $0x20] sm:$0xff] }
  0xeb   : > { %738 = vst.msk [vmem:[#allocation2 + $0x28] sm:$0xff] %vm252_vm10, %v732_v57 }
  0xec   : > { %v961_v61 = vpop.f32.mrf.mxu1  ;;  %v801_v63 = vpop.f32.mrf.mxu0 }
  0xed   : > { %v979_v0 = vadd.f32 %v973_v59, %v961_v61  ;;  %v816_v1 = vadd.f32 %v810_v60, %v801_v63 }
  0xee   : > { %v1089_v3 = vld [vmem:[#allocation2 + $0x8] sm:$0xff] }
  0xef   : > { %v1095_v5 = vadd.f32 %v1089_v3, %v1075_v47  ;;  %985 = vst.msk [vmem:[#allocation2 + $0x10] sm:$0xff] %vm252_vm10, %v979_v0  ;;  %v1264_v6 = vpop.f32.mrf.mxu3  ;;  %v974_v58 = vld [vmem:[#allocation2 + $0x18] sm:$0xff] }
  0xf0   : > { %v1277_v35 = vld [vmem:[#allocation2] sm:$0xff]  ;;  %822 = vst.msk [vmem:[#allocation2 + $0x20] sm:$0xff] %vm252_vm10, %v816_v1  ;;  %v1080_v46 = vpop.f32.mrf.mxu2 }
  0xf1   : > { %1101 = vst.msk [vmem:[#allocation2 + $0x8] sm:$0xff] %vm252_vm10, %v1095_v5  ;;  %v1283_v4 = vadd.f32 %v1277_v35, %v1262_v9 }
  0xf2   : > { %v811_v37 = vld [vmem:[#allocation2 + $0x28] sm:$0xff] }
  0xf3   : > { %1289 = vst.msk [vmem:[#allocation2] sm:$0xff] %vm252_vm10, %v1283_v4 }
  0xf4   : > { %v963_v62 = vpop.f32.mrf.mxu1  ;;  %v803_v7 = vpop.f32.mrf.mxu0 }
  0xf5   : > { %v980_v38 = vadd.f32 %v974_v58, %v963_v62  ;;  %v817_v54 = vadd.f32 %v811_v37, %v803_v7 }
  0xf6   : > { %v1090_v11 = vld [vmem:[#allocation2 + $0x10] sm:$0xff] }
  0xf7   : > { %v1096_v13 = vadd.f32 %v1090_v11, %v1078_v25  ;;  %986 = vst.msk [vmem:[#allocation2 + $0x18] sm:$0xff] %vm252_vm10, %v980_v38  ;;  %v1267_v15 = vpop.f32.mrf.mxu3  ;;  %v975_v53 = vld [vmem:[#allocation2 + $0x20] sm:$0xff] }
  0xf8   : > { %v1278_v16 = vld [vmem:[#allocation2 + $0x8] sm:$0xff]  ;;  %823 = vst.msk [vmem:[#allocation2 + $0x28] sm:$0xff] %vm252_vm10, %v817_v54  ;;  %v1083_v41 = vpop.f32.mrf.mxu2 }
  0xf9   : > { %1102 = vst.msk [vmem:[#allocation2 + $0x10] sm:$0xff] %vm252_vm10, %v1096_v13  ;;  %v1284_v19 = vadd.f32 %v1278_v16, %v1264_v6 }
  0xfa   : > { %v1362_v23 = vld [vmem:[#allocation2] sm:$0xff] }
  0xfb   : > { %1290 = vst.msk [vmem:[#allocation2 + $0x8] sm:$0xff] %vm252_vm10, %v1284_v19 }
  0xfc   : > { %v966_v44 = vpop.f32.mrf.mxu1  ;;  %v1347_v12 = vpop.f32.mrf.mxu0 }
  0xfd   : > { %v981_v8 = vadd.f32 %v975_v53, %v966_v44  ;;  %v1368_v24 = vadd.f32 %v1362_v23, %v1347_v12 }
  0xfe   : > { %v1091_v26 = vld [vmem:[#allocation2 + $0x18] sm:$0xff] }
  0xff   : > { %v1097_v27 = vadd.f32 %v1091_v26, %v1080_v46  ;;  %987 = vst.msk [vmem:[#allocation2 + $0x20] sm:$0xff] %vm252_vm10, %v981_v8  ;;  %v1269_v49 = vpop.f32.mrf.mxu3  ;;  %v976_v30 = vld [vmem:[#allocation2 + $0x28] sm:$0xff] }
 0x100   : > { %v1279_v2 = vld [vmem:[#allocation2 + $0x10] sm:$0xff]  ;;  %1374 = vst.msk [vmem:[#allocation2] sm:$0xff] %vm252_vm10, %v1368_v24  ;;  %v1085_v28 = vpop.f32.mrf.mxu2 }
 0x101   : > { %1103 = vst.msk [vmem:[#allocation2 + $0x18] sm:$0xff] %vm252_vm10, %v1097_v27  ;;  %v1285_v29 = vadd.f32 %v1279_v2, %v1267_v15 }
 0x102   : > { %v1363_v31 = vld [vmem:[#allocation2 + $0x8] sm:$0xff] }
 0x103   : > { %1291 = vst.msk [vmem:[#allocation2 + $0x10] sm:$0xff] %vm252_vm10, %v1285_v29 }
 0x104   : > { %v968_v22 = vpop.f32.mrf.mxu1  ;;  %v1349_v20 = vpop.f32.mrf.mxu0 }
 0x105   : > { %v982_v32 = vadd.f32 %v976_v30, %v968_v22  ;;  %v1369_v33 = vadd.f32 %v1363_v31, %v1349_v20 }
 0x106   : > { %v1092_v34 = vld [vmem:[#allocation2 + $0x20] sm:$0xff] }
 0x107   : > { %v1098_v55 = vadd.f32 %v1092_v34, %v1083_v41  ;;  %988 = vst.msk [vmem:[#allocation2 + $0x28] sm:$0xff] %vm252_vm10, %v982_v32  ;;  %v1272_v36 = vpop.f32.mrf.mxu3  ;;  %v1527_v14 = vld [vmem:[#allocation2] sm:$0xff] }
 0x108   : > { %v1280_v42 = vld [vmem:[#allocation2 + $0x18] sm:$0xff]  ;;  %1375 = vst.msk [vmem:[#allocation2 + $0x8] sm:$0xff] %vm252_vm10, %v1369_v33  ;;  %v1629_v43 = vpop.f32.mrf.mxu2 }
 0x109   : > { %1104 = vst.msk [vmem:[#allocation2 + $0x20] sm:$0xff] %vm252_vm10, %v1098_v55  ;;  %v1286_v45 = vadd.f32 %v1280_v42, %v1269_v49 }
 0x10a   : > { %v1364_v48 = vld [vmem:[#allocation2 + $0x10] sm:$0xff] }
 0x10b   : > { %1292 = vst.msk [vmem:[#allocation2 + $0x18] sm:$0xff] %vm252_vm10, %v1286_v45 }
 0x10c   : > { %v1512_v18 = vpop.f32.mrf.mxu1  ;;  %v1352_v47 = vpop.f32.mrf.mxu0 }
 0x10d   : > { %v1533_v56 = vadd.f32 %v1527_v14, %v1512_v18  ;;  %v1370_v39 = vadd.f32 %v1364_v48, %v1352_v47 }
 0x10e   : > { %v1093_v50 = vld [vmem:[#allocation2 + $0x28] sm:$0xff] }
 0x10f   : > { %v1099_v21 = vadd.f32 %v1093_v50, %v1085_v28  ;;  %1539 = vst.msk [vmem:[#allocation2] sm:$0xff] %vm252_vm10, %v1533_v56  ;;  %v1274_v17 = vpop.f32.mrf.mxu3  ;;  %v1528_v9 = vld [vmem:[#allocation2 + $0x8] sm:$0xff] }
 0x110   : > { %v1281_v40 = vld [vmem:[#allocation2 + $0x20] sm:$0xff]  ;;  %1376 = vst.msk [vmem:[#allocation2 + $0x10] sm:$0xff] %vm252_vm10, %v1370_v39  ;;  %v1631_v51 = vpop.f32.mrf.mxu2 }
 0x111   : > { %1105 = vst.msk [vmem:[#allocation2 + $0x28] sm:$0xff] %vm252_vm10, %v1099_v21  ;;  %v1287_v52 = vadd.f32 %v1281_v40, %v1272_v36 }
 0x112   : > { %v1365_v57 = vld [vmem:[#allocation2 + $0x18] sm:$0xff] }
 0x113   : > { %1293 = vst.msk [vmem:[#allocation2 + $0x20] sm:$0xff] %vm252_vm10, %v1287_v52 }
 0x114   : > { %v1514_v10 = vpop.f32.mrf.mxu1  ;;  %v1354_v25 = vpop.f32.mrf.mxu0 }
 0x115   : > { %v1534_v59 = vadd.f32 %v1528_v9, %v1514_v10  ;;  %v1371_v61 = vadd.f32 %v1365_v57, %v1354_v25 }
 0x116   : > { %v1644_v63 = vld [vmem:[#allocation2] sm:$0xff] }
 0x117   : > { %v1650_v60 = vadd.f32 %v1644_v63, %v1629_v43  ;;  %1540 = vst.msk [vmem:[#allocation2 + $0x8] sm:$0xff] %vm252_vm10, %v1534_v59  ;;  %v1818_v0 = vpop.f32.mrf.mxu3  ;;  %v1529_v6 = vld [vmem:[#allocation2 + $0x10] sm:$0xff] }
 0x118   : > { %v1282_v1 = vld [vmem:[#allocation2 + $0x28] sm:$0xff]  ;;  %1377 = vst.msk [vmem:[#allocation2 + $0x18] sm:$0xff] %vm252_vm10, %v1371_v61  ;;  %v1634_v3 = vpop.f32.mrf.mxu2 }
 0x119   : > { %1656 = vst.msk [vmem:[#allocation2] sm:$0xff] %vm252_vm10, %v1650_v60  ;;  %v1288_v5 = vadd.f32 %v1282_v1, %v1274_v17 }
 0x11a   : > { %v1366_v4 = vld [vmem:[#allocation2 + $0x20] sm:$0xff] }
 0x11b   : > { %1294 = vst.msk [vmem:[#allocation2 + $0x28] sm:$0xff] %vm252_vm10, %v1288_v5 }
 0x11c   : > { %v1517_v35 = vpop.f32.mrf.mxu1  ;;  %v1357_v46 = vpop.f32.mrf.mxu0 }
 0x11d   : > { %v1535_v58 = vadd.f32 %v1529_v6, %v1517_v35  ;;  %v1372_v62 = vadd.f32 %v1366_v4, %v1357_v46 }
 0x11e   : > { %v1645_v7 = vld [vmem:[#allocation2 + $0x8] sm:$0xff] }
 0x11f   : > { %v1651_v37 = vadd.f32 %v1645_v7, %v1631_v51  ;;  %1541 = vst.msk [vmem:[#allocation2 + $0x10] sm:$0xff] %vm252_vm10, %v1535_v58  ;;  %v1820_v38 = vpop.f32.mrf.mxu3  ;;  %v1530_v15 = vld [vmem:[#allocation2 + $0x18] sm:$0xff] }
 0x120   : > { %v1833_v54 = vld [vmem:[#allocation2] sm:$0xff]  ;;  %1378 = vst.msk [vmem:[#allocation2 + $0x20] sm:$0xff] %vm252_vm10, %v1372_v62  ;;  %v1636_v11 = vpop.f32.mrf.mxu2 }
 0x121   : > { %1657 = vst.msk [vmem:[#allocation2 + $0x8] sm:$0xff] %vm252_vm10, %v1651_v37  ;;  %v1839_v13 = vadd.f32 %v1833_v54, %v1818_v0 }
 0x122   : > { %v1367_v19 = vld [vmem:[#allocation2 + $0x28] sm:$0xff] }
 0x123   : > { %1845 = vst.msk [vmem:[#allocation2] sm:$0xff] %vm252_vm10, %v1839_v13 }
 0x124   : > { %v1519_v16 = vpop.f32.mrf.mxu1  ;;  %v1359_v41 = vpop.f32.mrf.mxu0 }
 0x125   : > { %v1536_v53 = vadd.f32 %v1530_v15, %v1519_v16  ;;  %v1373_v44 = vadd.f32 %v1367_v19, %v1359_v41 }
 0x126   : > { %v1646_v12 = vld [vmem:[#allocation2 + $0x10] sm:$0xff] }
 0x127   : > { %v1652_v23 = vadd.f32 %v1646_v12, %v1634_v3  ;;  %1542 = vst.msk [vmem:[#allocation2 + $0x18] sm:$0xff] %vm252_vm10, %v1536_v53  ;;  %v1823_v8 = vpop.f32.mrf.mxu3  ;;  %v1531_v49 = vld [vmem:[#allocation2 + $0x20] sm:$0xff] }
 0x128   : > { %v1834_v24 = vld [vmem:[#allocation2 + $0x8] sm:$0xff]  ;;  %1379 = vst.msk [vmem:[#allocation2 + $0x28] sm:$0xff] %vm252_vm10, %v1373_v44  ;;  %v1639_v26 = vpop.f32.mrf.mxu2 }
 0x129   : > { %1658 = vst.msk [vmem:[#allocation2 + $0x10] sm:$0xff] %vm252_vm10, %v1652_v23  ;;  %v1840_v27 = vadd.f32 %v1834_v24, %v1820_v38 }
 0x12a   : > { %v1918_v29 = vld [vmem:[#allocation2] sm:$0xff] }
 0x12b   : > { %1846 = vst.msk [vmem:[#allocation2 + $0x8] sm:$0xff] %vm252_vm10, %v1840_v27 }
 0x12c   : > { %v1522_v2 = vpop.f32.mrf.mxu1  ;;  %v1903_v28 = vpop.f32.mrf.mxu0 }
 0x12d   : > { %v1537_v30 = vadd.f32 %v1531_v49, %v1522_v2  ;;  %v1924_v22 = vadd.f32 %v1918_v29, %v1903_v28  ;;  %v4214_v28 = vstv %s2888_s28  ;;  %v4219_v29 = vld [vmem:[%s4415_s2] ss:$0 sm:$0xff]  ;;  %s177_s28 = scalar_lea.vmem [#allocation3], %s2885_s11 }
 0x12e   : > { %v1647_v20 = vld [vmem:[#allocation2 + $0x18] sm:$0xff]  ;;  %vm2431_vm11 = vcmp.ge.s32.totalorder %v4214_v28, 0  ;;  %vm2436_vm12 = vcmp.lt.s32.totalorder %v4214_v28, 8  ;;  %s2791_s29 = sshll.u32 %s177_s28, 4  ;;  %s2792_s29 = int_to_ptr.vmem [resolvable:$true] %s2791_s29 }
 0x12f   : > { %v1653_v31 = vadd.f32 %v1647_v20, %v1636_v11  ;;  %1543 = vst.msk [vmem:[#allocation2 + $0x20] sm:$0xff] %vm252_vm10, %v1537_v30  ;;  %v1825_v32 = vpop.f32.mrf.mxu3  ;;  %v1532_v36 = vld [vmem:[#allocation2 + $0x28] sm:$0xff]  ;;  %vm2441_vm13 = vmand %vm2431_vm11, %vm2436_vm12 }
 0x130   : > { %v1835_v33 = vld [vmem:[#allocation2 + $0x10] sm:$0xff]  ;;  %1930 = vst.msk [vmem:[#allocation2] sm:$0xff] %vm252_vm10, %v1924_v22  ;;  %v1641_v55 = vpop.f32.mrf.mxu2 }
 0x131   : > { %1659 = vst.msk [vmem:[#allocation2 + $0x18] sm:$0xff] %vm252_vm10, %v1653_v31  ;;  %v1841_v34 = vadd.f32 %v1835_v33, %v1823_v8 }
 0x132   : > { %v1919_v45 = vld [vmem:[#allocation2 + $0x8] sm:$0xff] }
 0x133   : > { %1847 = vst.msk [vmem:[#allocation2 + $0x10] sm:$0xff] %vm252_vm10, %v1841_v34 }
 0x134   : > { %v1524_v42 = vpop.f32.mrf.mxu1  ;;  %v1905_v43 = vpop.f32.mrf.mxu0 }
 0x135   : > { %v1538_v14 = vadd.f32 %v1532_v36, %v1524_v42  ;;  %v1925_v18 = vadd.f32 %v1919_v45, %v1905_v43  ;;  %v2427_v45 = vadd.s32 1, %v4214_v28 }
 0x136   : > { %v1648_v47 = vld [vmem:[#allocation2 + $0x20] sm:$0xff] }
 0x137   : > { %v1654_v48 = vadd.f32 %v1648_v47, %v1639_v26  ;;  %1544 = vst.msk [vmem:[#allocation2 + $0x28] sm:$0xff] %vm252_vm10, %v1538_v14  ;;  %v1828_v56 = vpop.f32.mrf.mxu3  ;;  %v2083_v21 = vld [vmem:[#allocation2] sm:$0xff]  ;;  %vm2432_vm14 = vcmp.ge.s32.totalorder %v2427_v45, 0  ;;  %vm2437_vm15 = vcmp.lt.s32.totalorder %v2427_v45, 8 }
 0x138   : > { %v1836_v39 = vld [vmem:[#allocation2 + $0x18] sm:$0xff]  ;;  %1931 = vst.msk [vmem:[#allocation2 + $0x8] sm:$0xff] %vm252_vm10, %v1925_v18  ;;  %v2185_v17 = vpop.f32.mrf.mxu2  ;;  %vm2442_vm1 = vmand %vm2432_vm14, %vm2437_vm15  ;;  %vm2703_vm15 = vcmask 1041409  }
 0x139   : > { %1660 = vst.msk [vmem:[#allocation2 + $0x20] sm:$0xff] %vm252_vm10, %v1654_v48  ;;  %v1842_v50 = vadd.f32 %v1836_v39, %v1825_v32 }
 0x13a   : > { %v1920_v52 = vld [vmem:[#allocation2 + $0x10] sm:$0xff] }
 0x13b   : > { %1848 = vst.msk [vmem:[#allocation2 + $0x18] sm:$0xff] %vm252_vm10, %v1842_v50 }
 0x13c   : > { %v2068_v40 = vpop.f32.mrf.mxu1  ;;  %v1908_v51 = vpop.f32.mrf.mxu0 }
 0x13d   : > { %v2089_v9 = vadd.f32 %v2083_v21, %v2068_v40  ;;  %v1926_v10 = vadd.f32 %v1920_v52, %v1908_v51  ;;  %v2428_v40 = vadd.s32 2, %v4214_v28 }
 0x13e   : > { %v1649_v25 = vld [vmem:[#allocation2 + $0x28] sm:$0xff] }
 0x13f   : > { %v1655_v57 = vadd.f32 %v1649_v25, %v1641_v55  ;;  %2095 = vst.msk [vmem:[#allocation2] sm:$0xff] %vm252_vm10, %v2089_v9  ;;  %v1830_v59 = vpop.f32.mrf.mxu3  ;;  %v2084_v60 = vld [vmem:[#allocation2 + $0x8] sm:$0xff]  ;;  %vm2433_vm4 = vcmp.ge.s32.totalorder %v2428_v40, 0  ;;  %vm2438_vm6 = vcmp.lt.s32.totalorder %v2428_v40, 8 }
 0x140   : > { %v1837_v61 = vld [vmem:[#allocation2 + $0x20] sm:$0xff]  ;;  %1932 = vst.msk [vmem:[#allocation2 + $0x10] sm:$0xff] %vm252_vm10, %v1926_v10  ;;  %v2187_v6 = vpop.f32.mrf.mxu2  ;;  %vm2443_vm9 = vmand %vm2433_vm4, %vm2438_vm6  ;;  %vm2736_vm4 = vcmask 1047556  }
 0x141   : > { %1661 = vst.msk [vmem:[#allocation2 + $0x28] sm:$0xff] %vm252_vm10, %v1655_v57  ;;  %v1843_v63 = vadd.f32 %v1837_v61, %v1828_v56 }
 0x142   : > { %v1921_v3 = vld [vmem:[#allocation2 + $0x18] sm:$0xff] }
 0x143   : > { %1849 = vst.msk [vmem:[#allocation2 + $0x20] sm:$0xff] %vm252_vm10, %v1843_v63 }
 0x144   : > { %v2070_v0 = vpop.f32.mrf.mxu1  ;;  %v1910_v1 = vpop.f32.mrf.mxu0 }
 0x145   : > { %v2090_v5 = vadd.f32 %v2084_v60, %v2070_v0  ;;  %v1927_v35 = vadd.f32 %v1921_v3, %v1910_v1 }
 0x146   : > { %v2200_v46 = vld [vmem:[#allocation2] sm:$0xff] }
 0x147   : > { %v2206_v4 = vadd.f32 %v2200_v46, %v2185_v17  ;;  %2096 = vst.msk [vmem:[#allocation2 + $0x8] sm:$0xff] %vm252_vm10, %v2090_v5  ;;  %v2374_v58 = vpop.f32.mrf.mxu3  ;;  %v2085_v37 = vld [vmem:[#allocation2 + $0x10] sm:$0xff]  ;;  %v2429_v46 = vadd.s32 3, %v4214_v28 }
 0x148   : > { %v1838_v62 = vld [vmem:[#allocation2 + $0x28] sm:$0xff]  ;;  %1933 = vst.msk [vmem:[#allocation2 + $0x18] sm:$0xff] %vm252_vm10, %v1927_v35  ;;  %v2190_v19 = vpop.f32.mrf.mxu2 }
 0x149   : > { %2212 = vst.msk [vmem:[#allocation2] sm:$0xff] %vm252_vm10, %v2206_v4  ;;  %v1844_v7 = vadd.f32 %v1838_v62, %v1830_v59  ;;  %vm2434_vm7 = vcmp.ge.s32.totalorder %v2429_v46, 0  ;;  %vm2439_vm8 = vcmp.lt.s32.totalorder %v2429_v46, 8 }
 0x14a   : > { %v1922_v11 = vld [vmem:[#allocation2 + $0x20] sm:$0xff] }
 0x14b   : > { %1850 = vst.msk [vmem:[#allocation2 + $0x28] sm:$0xff] %vm252_vm10, %v1844_v7 }
 0x14c   : > { %v2073_v38 = vpop.f32.mrf.mxu1  ;;  %v1913_v54 = vpop.f32.mrf.mxu0 }
 0x14d   : > { %v2091_v13 = vadd.f32 %v2085_v37, %v2073_v38  ;;  %v1928_v15 = vadd.f32 %v1922_v11, %v1913_v54 }
 0x14e   : > { %v2201_v16 = vld [vmem:[#allocation2 + $0x8] sm:$0xff] }
 0x14f   : > { %v2207_v41 = vadd.f32 %v2201_v16, %v2187_v6  ;;  %2097 = vst.msk [vmem:[#allocation2 + $0x10] sm:$0xff] %vm252_vm10, %v2091_v13  ;;  %v2376_v44 = vpop.f32.mrf.mxu3  ;;  %v2086_v23 = vld [vmem:[#allocation2 + $0x18] sm:$0xff] }
 0x150   : > { %v2389_v53 = vld [vmem:[#allocation2] sm:$0xff]  ;;  %1934 = vst.msk [vmem:[#allocation2 + $0x20] sm:$0xff] %vm252_vm10, %v1928_v15  ;;  %v2192_v31 = vpop.f32.mrf.mxu2 }
 0x151   : > { %2213 = vst.msk [vmem:[#allocation2 + $0x8] sm:$0xff] %vm252_vm10, %v2207_v41  ;;  %v2395_v12 = vadd.f32 %v2389_v53, %v2374_v58 }
 0x152   : > { %v1923_v26 = vld [vmem:[#allocation2 + $0x28] sm:$0xff] }
 0x153   : > { %2401 = vst.msk [vmem:[#allocation2] sm:$0xff] %vm252_vm10, %v2395_v12  ;;  %v4266_v12 = vadd.s32 4, %v4214_v28 }
 0x154   : > { %v2075_v8 = vpop.f32.mrf.mxu1  ;;  %v1915_v24 = vpop.f32.mrf.mxu0 }
 0x155   : > { %v2092_v27 = vadd.f32 %v2086_v23, %v2075_v8  ;;  %v1929_v49 = vadd.f32 %v1923_v26, %v1915_v24  ;;  %vm2435_vm11 = vcmp.ge.s32.totalorder %v4266_v12, 0  ;;  %vm2440_vm12 = vcmp.lt.s32.totalorder %v4266_v12, 8 }
 0x156   : > { %v2202_v2 = vld [vmem:[#allocation2 + $0x10] sm:$0xff]  ;;  %vm2445_vm14 = vmand %vm2435_vm11, %vm2440_vm12 }
 0x157   : > { %v2208_v30 = vadd.f32 %v2202_v2, %v2190_v19  ;;  %2098 = vst.msk [vmem:[#allocation2 + $0x18] sm:$0xff] %vm252_vm10, %v2092_v27  ;;  %v2379_v33 = vpop.f32.mrf.mxu3  ;;  %v2087_v34 = vld [vmem:[#allocation2 + $0x20] sm:$0xff] }
 0x158   : > { %v2390_v22 = vld [vmem:[#allocation2 + $0x8] sm:$0xff]  ;;  %1935 = vst.msk [vmem:[#allocation2 + $0x28] sm:$0xff] %vm252_vm10, %v1929_v49  ;;  %v2195_v10 = vpop.f32.mrf.mxu2 }
 0x159   : > { %2214 = vst.msk [vmem:[#allocation2 + $0x10] sm:$0xff] %vm252_vm10, %v2208_v30  ;;  %v2396_v20 = vadd.f32 %v2390_v22, %v2376_v44 }
 0x15a   : > { %v2407_v32 = vld [vmem:[#allocation2] sm:$0xff] }
 0x15b   : > { %v2416_v55 = vadd.f32 %v4219_v29, %v2407_v32  ;;  %2402 = vst.msk [vmem:[#allocation2 + $0x8] sm:$0xff] %vm252_vm10, %v2396_v20 }
 0x15c   : > { %v2078_v36 = vpop.f32.mrf.mxu1 }
 0x15d   : > { %v2421_v42 = vmax.f32 %v2416_v55, 0.0  ;;  %v2093_v43 = vadd.f32 %v2087_v34, %v2078_v36 }
 0x15e   : > { %v2203_v14 = vld [vmem:[#allocation2 + $0x18] sm:$0xff] }
 0x15f   : > { %v2209_v18 = vadd.f32 %v2203_v14, %v2192_v31  ;;  %2099 = vst.msk [vmem:[#allocation2 + $0x20] sm:$0xff] %vm252_vm10, %v2093_v43  ;;  %v4230_v47 = vsel %vm2441_vm13, %v2421_v42, 0.0  ;;  %v2088_v17 = vld [vmem:[#allocation2 + $0x28] sm:$0xff]  ;;  %v2381_v57 = vpop.f32.mrf.mxu3  ;;  %vm2444_vm13 = vmand %vm2434_vm7, %vm2439_vm8 }
 0x160   : > { %v2391_v48 = vld [vmem:[#allocation2 + $0x10] sm:$0xff]  ;;  %v2466_v56 = vrot.slane %v4230_v47, 2  ;;  %v2467_v39 = vrot.slane %v4230_v47, 4  ;;  %v2496_v51 = vperm.slane %v4230_v47, 1  ;;  %v2468_v5 = vrot.slane %v4230_v47, 6  ;;  %v2197_v24 = vpop.f32.mrf.mxu2 }
 0x161   : > { %2215 = vst.msk [vmem:[#allocation2 + $0x18] sm:$0xff] %vm252_vm10, %v2209_v18  ;;  %v2397_v50 = vadd.f32 %v2391_v48, %v2379_v33  ;;  %v3237_v7 = vrot.slane %v4230_v47, 9 }
 0x162   : > { %v2408_v21 = vld [vmem:[#allocation2 + $0x8] sm:$0xff]  ;;  %v2497_v52 = vperm.slane %v2466_v56, 1  ;;  %v2498_v25 = vperm.slane %v2467_v39, 1  ;;  %v3238_v37 = vrot.slane %v2466_v56, 9  ;;  %v3239_v38 = vrot.slane %v2467_v39, 9 }
 0x163   : > { %v2417_v9 = vadd.f32 %v4219_v29, %v2408_v21  ;;  %2403 = vst.msk [vmem:[#allocation2 + $0x10] sm:$0xff] %vm252_vm10, %v2397_v50  ;;  %v3240_v19 = vrot.slane %v2468_v5, 9  ;;  %v4272_v2 = vmax.f32 %v4230_v47, %v3237_v7 }
 0x164   : > { %v2080_v59 = vpop.f32.mrf.mxu1  ;;  %v2512_v61 = vsel %vm2511_vm0, %v2497_v52, %v2496_v51  ;;  %v2595_v30 = vmax.f32 %v2466_v56, %v3238_v37  ;;  %v4274_v22 = vmax.f32 %v2467_v39, %v3239_v38 }
 0x165   : > { %v2422_v63 = vmax.f32 %v2417_v9, 0.0  ;;  %v2094_v60 = vadd.f32 %v2088_v17, %v2080_v59  ;;  %v2514_v6 = vsel %vm2513_vm3, %v2498_v25, %v2512_v61  ;;  %v4279_v32 = vmax.f32 %v2468_v5, %v3240_v19 }
 0x166   : > { %v2204_v0 = vld [vmem:[#allocation2 + $0x20] sm:$0xff]  ;;  %v4258_v16 = vsel %vm2528_vm5, 0.0, %v2514_v6 }
 0x167   : > { %v2210_v1 = vadd.f32 %v2204_v0, %v2195_v10  ;;  %2100 = vst.msk [vmem:[#allocation2 + $0x28] sm:$0xff] %vm252_vm10, %v2094_v60  ;;  %v4241_v3 = vsel %vm2442_vm1, %v2422_v63, 0.0  ;;  %v2619_v8 = vrot.slane %v4258_v16, 2  ;;  %v2384_v27 = vpop.f32.mrf.mxu3  ;;  %v2624_v42 = vrot.slane %v4258_v16, 1 }
 0x168   : > { %v2392_v35 = vld [vmem:[#allocation2 + $0x18] sm:$0xff]  ;;  %v4247_v4 = vrot.slane %v4241_v3, 2  ;;  %v4250_v58 = vrot.slane %v4241_v3, 4  ;;  %v2499_v11 = vperm.slane %v4241_v3, 1  ;;  %v2471_v49 = vrot.slane %v4241_v3, 6 }
 0x169   : > { %2216 = vst.msk [vmem:[#allocation2 + $0x20] sm:$0xff] %vm252_vm10, %v2210_v1  ;;  %v2398_v62 = vadd.f32 %v2392_v35, %v2381_v57  ;;  %v3241_v28 = vrot.slane %v4241_v3, 9  ;;  %v4294_v18 = vrot.slane %v2619_v8, 1  ;;  %v2654_v51 = vmax.f32 %v4272_v2, %v4258_v16 }
 0x16a   : > { %v2409_v54 = vld [vmem:[#allocation2 + $0x10] sm:$0xff]  ;;  %v2500_v13 = vperm.slane %v4247_v4, 1  ;;  %v2501_v15 = vperm.slane %v4250_v58, 1  ;;  %v3242_v45 = vrot.slane %v4247_v4, 9  ;;  %v3243_v14 = vrot.slane %v4250_v58, 9 }
 0x16b   : > { %2404 = vst.msk [vmem:[#allocation2 + $0x18] sm:$0xff] %vm252_vm10, %v2398_v62  ;;  %v2418_v41 = vadd.f32 %v4219_v29, %v2409_v54  ;;  %v3244_v50 = vrot.slane %v2471_v49, 9  ;;  %v2598_v17 = vmax.f32 %v4241_v3, %v3241_v28  ;;  %v4308_v25 = vmax.f32 %v2595_v30, %v2624_v42 }
 0x16c   : > { %v2515_v53 = vsel %vm2511_vm0, %v2500_v13, %v2499_v11  ;;  %v2599_v0 = vmax.f32 %v4247_v4, %v3242_v45  ;;  %v2600_v1 = vmax.f32 %v4250_v58, %v3243_v14  ;;  %v2657_v35 = vmax.f32 %v4279_v32, %v4294_v18 }
 0x16d   : > { %v2423_v44 = vmax.f32 %v2418_v41, 0.0  ;;  %v2516_v23 = vsel %vm2513_vm3, %v2501_v15, %v2515_v53  ;;  %v4314_v3 = vmax.f32 %v2471_v49, %v3244_v50  ;;  %v3468_v32 = vmov 1934713408  }
 0x16e   : > { %v2205_v26 = vld [vmem:[#allocation2 + $0x28] sm:$0xff]  ;;  %v4284_v36 = vsel %vm2528_vm5, 0.0, %v2516_v23  ;;  %v2739_v18 = vunpack.c.l.s4 %v3468_v32  ;;  %vm2708_vm1 = vcmask 1047559  }
 0x16f   : > { %v2211_v20 = vadd.f32 %v2205_v26, %v2197_v24  ;;  %v4276_v31 = vsel %vm2443_vm9, %v2423_v44, 0.0  ;;  %v2620_v40 = vrot.slane %v4284_v36, 2  ;;  %v2626_v10 = vrot.slane %v4284_v36, 1  ;;  %v2386_v62 = vpop.f32.mrf.mxu3 }
 0x170   : > { %v2393_v33 = vld [vmem:[#allocation2 + $0x20] sm:$0xff]  ;;  %v2472_v34 = vrot.slane %v4276_v31, 2  ;;  %v2473_v55 = vrot.slane %v4276_v31, 4  ;;  %v2502_v48 = vperm.slane %v4276_v31, 1  ;;  %v2474_v52 = vrot.slane %v4276_v31, 6 }
 0x171   : > { %2217 = vst.msk [vmem:[#allocation2 + $0x28] sm:$0xff] %vm252_vm10, %v2211_v20  ;;  %v2399_v43 = vadd.f32 %v2393_v33, %v2384_v27  ;;  %v3245_v61 = vrot.slane %v4276_v31, 9  ;;  %v4316_v6 = vrot.slane %v2620_v40, 1  ;;  %v2658_v46 = vmax.f32 %v2598_v17, %v4284_v36 }
 0x172   : > { %v2410_v47 = vld [vmem:[#allocation2 + $0x18] sm:$0xff]  ;;  %v2503_v56 = vperm.slane %v2472_v34, 1  ;;  %v2504_v39 = vperm.slane %v2473_v55, 1  ;;  %v3246_v63 = vrot.slane %v2472_v34, 9  ;;  %v3247_v60 = vrot.slane %v2473_v55, 9 }
 0x173   : > { %v2419_v21 = vadd.f32 %v4219_v29, %v2410_v47  ;;  %2405 = vst.msk [vmem:[#allocation2 + $0x20] sm:$0xff] %vm252_vm10, %v2399_v43  ;;  %v3248_v11 = vrot.slane %v2474_v52, 9  ;;  %v2602_v58 = vmax.f32 %v4276_v31, %v3245_v61  ;;  %v2659_v15 = vmax.f32 %v2599_v0, %v2626_v10 }
 0x174   : > { %v2517_v9 = vsel %vm2511_vm0, %v2503_v56, %v2502_v48  ;;  %v2603_v13 = vmax.f32 %v2472_v34, %v3246_v63  ;;  %v2604_v23 = vmax.f32 %v2473_v55, %v3247_v60  ;;  %v4325_v49 = vmax.f32 %v2600_v1, %v2620_v40 }
 0x175   : > { %v2424_v57 = vmax.f32 %v2419_v21, 0.0  ;;  %v2518_v59 = vsel %vm2513_vm3, %v2504_v39, %v2517_v9  ;;  %v2605_v20 = vmax.f32 %v2474_v52, %v3248_v11  ;;  %v2661_v31 = vmax.f32 %v4314_v3, %v4316_v6 }
 0x176   : > { %v2531_v54 = vsel %vm2528_vm5, 0.0, %v2518_v59  ;;  %v2674_v34 = vmax.f32 %v2654_v51, %v2658_v46  ;;  %v2675_v43 = vmax.f32 %v4308_v25, %v2659_v15 }
 0x177   : > { %v2459_v5 = vsel %vm2444_vm13, %v2424_v57, 0.0  ;;  %v2621_v26 = vrot.slane %v2531_v54, 2  ;;  %v2628_v27 = vrot.slane %v2531_v54, 1  ;;  %v2662_v42 = vmax.f32 %v2602_v58, %v2531_v54 }
 0x178   : > { %v2394_v7 = vld [vmem:[#allocation2 + $0x28] sm:$0xff]  ;;  %v2475_v37 = vrot.slane %v2459_v5, 2  ;;  %v2476_v38 = vrot.slane %v2459_v5, 4  ;;  %v2505_v19 = vperm.slane %v2459_v5, 1  ;;  %v2477_v2 = vrot.slane %v2459_v5, 6 }
 0x179   : > { %v2400_v4 = vadd.f32 %v2394_v7, %v2386_v62  ;;  %v3249_v36 = vrot.slane %v2459_v5, 9  ;;  %v2629_v14 = vrot.slane %v2621_v26, 1  ;;  %v2663_v47 = vmax.f32 %v2603_v13, %v2628_v27 }
 0x17a   : > { %v2411_v41 = vld [vmem:[#allocation2 + $0x20] sm:$0xff]  ;;  %v2506_v53 = vperm.slane %v2475_v37, 1  ;;  %v2507_v44 = vperm.slane %v2476_v38, 1  ;;  %v3250_v33 = vrot.slane %v2475_v37, 9  ;;  %v3252_v39 = vrot.slane %v2477_v2, 9 }
 0x17b   : > { %v2420_v24 = vadd.f32 %v4219_v29, %v2411_v41  ;;  %2406 = vst.msk [vmem:[#allocation2 + $0x28] sm:$0xff] %vm252_vm10, %v2400_v4  ;;  %v3251_v40 = vrot.slane %v2476_v38, 9  ;;  %v2606_v61 = vmax.f32 %v2459_v5, %v3249_v36  ;;  %v2664_v25 = vmax.f32 %v2604_v23, %v2621_v26 }
 0x17c   : > { %v2519_v30 = vsel %vm2511_vm0, %v2506_v53, %v2505_v19  ;;  %v2607_v52 = vmax.f32 %v2475_v37, %v3250_v33  ;;  %v2683_v63 = vmax.f32 %v2675_v43, %v2663_v47  ;;  %v2609_v1 = vmax.f32 %v2477_v2, %v3252_v39 }
 0x17d   : > { %v2425_v28 = vmax.f32 %v2420_v24, 0.0  ;;  %v2520_v29 = vsel %vm2513_vm3, %v2507_v44, %v2519_v30  ;;  %v2608_v62 = vmax.f32 %v2476_v38, %v3251_v40  ;;  %v2665_v7 = vmax.f32 %v2605_v20, %v2629_v14 }
 0x17e   : > { %v2532_v55 = vsel %vm2528_vm5, 0.0, %v2520_v29  ;;  %v2702_v5 = vrot.slane %v2683_v63, 7  ;;  %v2682_v44 = vmax.f32 %v2674_v34, %v2662_v42  ;;  %v2677_v38 = vmax.f32 %v2657_v35, %v2661_v31 }
 0x17f   : > { %v2460_v12 = vsel %vm2445_vm14, %v2425_v28, 0.0  ;;  %v2622_v45 = vrot.slane %v2532_v55, 2  ;;  %v2630_v50 = vrot.slane %v2532_v55, 1  ;;  %v2666_v11 = vmax.f32 %v2606_v61, %v2532_v55 }
 0x180   : > { %v2478_v48 = vrot.slane %v2460_v12, 2  ;;  %v2479_v56 = vrot.slane %v2460_v12, 4  ;;  %v2480_v21 = vrot.slane %v2460_v12, 6  ;;  %v2508_v17 = vperm.slane %v2460_v12, 1 }
 0x181   : > { %v3253_v10 = vrot.slane %v2460_v12, 9  ;;  %v2631_v57 = vrot.slane %v2622_v45, 1  ;;  %v2667_v3 = vmax.f32 %v2607_v52, %v2630_v50  ;;  %v2668_v19 = vmax.f32 %v2608_v62, %v2622_v45 }
 0x182   : > { %v2509_v51 = vperm.slane %v2478_v48, 1  ;;  %v2510_v9 = vperm.slane %v2479_v56, 1  ;;  %v3254_v59 = vrot.slane %v2478_v48, 9  ;;  %v3255_v0 = vrot.slane %v2479_v56, 9 }
 0x183   : > { %v3256_v46 = vrot.slane %v2480_v21, 9  ;;  %v2610_v54 = vmax.f32 %v2460_v12, %v3253_v10  ;;  %v2669_v4 = vmax.f32 %v2609_v1, %v2631_v57  ;;  %v2679_v53 = vmax.f32 %v2663_v47, %v2667_v3 }
 0x184   : > { %v2521_v60 = vsel %vm2511_vm0, %v2509_v51, %v2508_v17  ;;  %v2611_v58 = vmax.f32 %v2478_v48, %v3254_v59  ;;  %v2612_v41 = vmax.f32 %v2479_v56, %v3255_v0  ;;  %v2678_v2 = vmax.f32 %v2662_v42, %v2666_v11 }
 0x185   : > { %v2522_v6 = vsel %vm2513_vm3, %v2510_v9, %v2521_v60  ;;  %v2613_v23 = vmax.f32 %v2480_v21, %v3256_v46  ;;  %v2681_v30 = vmax.f32 %v2665_v7, %v2669_v4  ;;  %v2704_v28 = vsel %vm2703_vm15, %v2702_v5, %v2682_v44 }
 0x186   : > { %v2533_v37 = vsel %vm2528_vm5, 0.0, %v2522_v6  ;;  %v2656_v55 = vmax.f32 %v4274_v22, %v2619_v8  ;;  %v2685_v34 = vmax.f32 %v2677_v38, %v2665_v7  ;;  %v2680_v36 = vmax.f32 %v2664_v25, %v2668_v19 }
 0x187   : > { %v2632_v13 = vrot.slane %v2533_v37, 1  ;;  %v2623_v15 = vrot.slane %v2533_v37, 2  ;;  %v2670_v24 = vmax.f32 %v2610_v54, %v2533_v37  ;;  %v2705_v14 = vsel %vm2513_vm3, %v2702_v5, %v2704_v28 }
 0x188   : > { %vm2706_vm0 = vcmask 1045509   ;;  %v2676_v35 = vmax.f32 %v2656_v55, %v4325_v49  ;;  %v2712_v16 = vrot.slane %v2685_v34, 7  ;;  %v2740_v21 = vunpack.c.0.s8 %v2739_v18 }
 0x189   : > { %v2671_v26 = vmax.f32 %v2611_v58, %v2632_v13  ;;  %v2633_v27 = vrot.slane %v2623_v15, 1  ;;  %v2672_v29 = vmax.f32 %v2612_v41, %v2623_v15  ;;  %v2686_v43 = vmax.f32 %v2678_v2, %v2670_v24 }
 0x18a   : > { %v2684_v22 = vmax.f32 %v2676_v35, %v2664_v25  ;;  %v2707_v48 = vsel %vm2706_vm0, %v2702_v5, %v2705_v14  ;;  %vm2774_vm5 = vcmask 254976  }
 0x18b   : > { %v2687_v20 = vmax.f32 %v2679_v53, %v2671_v26  ;;  %v2673_v33 = vmax.f32 %v2613_v23, %v2633_v27  ;;  %v2688_v42 = vmax.f32 %v2680_v36, %v2672_v29  ;;  %v2709_v40 = vsel %vm2708_vm1, %v2702_v5, %v2707_v48 }
 0x18c   : > { %v2713_v52 = vsel %vm2703_vm15, %v2712_v16, %v2684_v22 }
 0x18d   : > { %v2719_v12 = vrot.slane %v2687_v20, 7  ;;  %v2689_v45 = vmax.f32 %v2681_v30, %v2673_v33  ;;  %v2714_v57 = vsel %vm2513_vm3, %v2712_v16, %v2713_v52 }
 0x18e   : > { %v2715_v25 = vsel %vm2706_vm0, %v2712_v16, %v2714_v57 }
 0x18f   : > { %v2720_v31 = vsel %vm2703_vm15, %v2719_v12, %v2686_v43  ;;  %v2726_v47 = vrot.slane %v2689_v45, 7  ;;  %v2716_v0 = vsel %vm2708_vm1, %v2712_v16, %v2715_v25 }
 0x190   : > { %v2721_v8 = vsel %vm2513_vm3, %v2719_v12, %v2720_v31 }
 0x191   : > { %v2722_v56 = vsel %vm2706_vm0, %v2719_v12, %v2721_v8  ;;  %v2727_v39 = vsel %vm2703_vm15, %v2726_v47, %v2688_v42 }
 0x192   : > { %v2723_v50 = vsel %vm2708_vm1, %v2719_v12, %v2722_v56  ;;  %v2728_v49 = vsel %vm2513_vm3, %v2726_v47, %v2727_v39  ;;  %vm2772_vm3 = vcmask 195584  }
 0x193   : > { %v2735_v17 = vrot.slane %v2723_v50, 4  ;;  %v2729_v51 = vsel %vm2706_vm0, %v2726_v47, %v2728_v49 }
 0x194   : > { %v2730_v59 = vsel %vm2708_vm1, %v2726_v47, %v2729_v51 }
 0x195   : > { %v2737_v9 = vsel %vm2736_vm4, %v2735_v17, %v2709_v40  ;;  %v2744_v60 = vrot.slane %v2730_v59, 4 }
 0x196   : > { %v2741_v10 = vperm.slane %v2737_v9, %v2740_v21 }
 0x197   : > { %v2745_v1 = vsel %vm2736_vm4, %v2744_v60, %v2716_v0 }
 0x198   : > { %v2742_v61 = vrot.slane %v2741_v10, 4  ;;  %v2749_v3 = vperm.slane %v2745_v1, %v2740_v21 }
 0x19a   : > { %v2743_v63 = vsel %vm2736_vm4, 0.0, %v2742_v61  ;;  %v2750_v46 = vrot.slane %v2749_v3, 4 }
 0x19b   : > { %2753 = vst [vmem:[#allocation1] ss:$4 sm:$0xff] %v2743_v63 }
 0x19c   : > { %v2751_v7 = vsel %vm2736_vm4, 0.0, %v2750_v46 }
 0x1a2   : > { %v2754_v6 = vld.sshfl [vmem:[#allocation1] sm:$0xff pattern:$0x73625140] }
 0x1a3   : > { %2755 = vrot.lane.b32.xlu0 %v2754_v6, %s3469_s5  ;;  %2759 = vst [vmem:[#allocation1] ss:$4 sm:$0xff] %v2749_v3  ;;  %s3388_s5 = scalar_lea.hbm %s3387_s16, 2 }
 0x1a4   : > { %p3389_p13 = scmp.ne.s32.totalorder %s3387_s16, %s3388_s5  ;;  %p3394_p4 = scmp.lt.s32.totalorder %s3392_s8, %s3388_s5 }
 0x1a6   : > { %p3390_p0 = pnand %p3389_p13, %p3543_p3  ;;  %p3395_p5 = por %p3394_p4, %p3393_p2 }
 0x1a8   : > { %p3391_p1 = pneg %p3390_p0 }
 0x1aa   : > { %v2760_v62 = vld.sshfl [vmem:[#allocation1] sm:$0xff pattern:$0x73625140]  ;;  %p3396_p6 = pnand %p3395_p5, %p3391_p1 }
 0x1ab   : > { %2761 = vrot.lane.b32.xlu0 %v2760_v62, %s3470_s6  ;;  %2765 = vst [vmem:[#allocation1] ss:$4 sm:$0xff] %v2751_v7 }
 0x1b2   : > { %v2766_v37 = vld.sshfl [vmem:[#allocation1] sm:$0xff pattern:$0x73625140] }
 0x1b3   : > { %2767 = vrot.lane.b32.xlu1 %v2766_v37, %s3471_s7 }
 0x215   : > { %v2756_v54 = vpop.permute.xlu0 %2755 }
 0x216   : > { %v2770_v4 = vsel %vm252_vm10, %v2741_v10, %v2756_v54 }
 0x21d   : > { %v2762_v11 = vpop.permute.xlu0 %2761 }
 0x21e   : > { %v2771_v58 = vsel %vm218_vm2, %v2770_v4, %v2762_v11 }
 0x225   : > { %v2768_v13 = vpop.permute.xlu1 %2767 }
 0x226   : > { %v2773_v5 = vsel %vm2772_vm3, %v2771_v58, %v2768_v13 }
 0x227   : > { %2775 = vst.msk [vmem:[%s177_s28] sm:$0x3] %vm2774_vm5, %v2773_v5 }
 0x228   : > { %3399 = shalt.err (!%p3396_p6)
}
 0x229   : > { %3296 = dma.vmem_to_hbm [thread:$0]  (%p3543_p3), %s2792_s29, 32, %s2794_s4, %s2777_s15  }
 0x22a PF: > { %p3302_p7 = scmp.ge.s32.totalorder %s3466_s19, 2  ;;  %s2805_s9 = sand.u32 1, %s3438_s12  }
 0x22b   : > { %s2806_s21 = scalar_lea.sflag [#allocation4], %s2805_s9 }
 0x22c   : > { %p3299_p9 = pnand %p3302_p7, %p3552_p8 }
 0x22e   : > { %p3300_p10 = pneg %p3299_p9 }
 0x230   : > { %3433 = dma.done.wait (%p3300_p10), %s2806_s21, 32  }
 0x231   : > { %3435 = vsyncadd (%p3300_p10), %s2806_s21, 4294967264  ;;  %s16_s19 = sadd.s32 1, %s3466_s19   ;;  %s4425_s12 = smov %s3442_s13 }
 0x232   : > { %p13_p11 = scmp.ge.s32.totalorder %s16_s19, 6   ;;  %s4426_s13 = smov %s3446_s14 }
 0x233   : > { %s4427_s14 = smov %s3561_s30  ;;  %s4428_s15 = smov %s3458_s17 }
 0x234   : > { %s4429_s16 = smov %s3462_s18  ;;  %s4430_s17 = smov %s4433_s22 }
 0x235   : > { %s4431_s18 = smov %s4437_s23  ;;  %15 = sbr.rel (!%p13_p11) target bundleno = 5 (0x5), region = 86 }
 0x23a   :  { %2812 = vsyncpa [#allocation4], 1 }
 0x23b   :  { %2814 = vsyncpa [#allocation4 + $0x1], 1 }

</bundles_post_ra>
